<compile_context>
chip_gen: v5e
topology: v5e:2x2
jax: 0.10.0
libtpu: 0.0.40
codegen_flags: <defaults>
</compile_context>

<pallas_src>
import jax
import jax.numpy as jnp
from jax.experimental import pallas as pl
from jax.experimental.pallas import tpu as pltpu


# ----------------------------------------------------------------------------
# One-time parameter preparation (all layout transforms hoisted out of forward)
# ----------------------------------------------------------------------------
def prepare_params(params, height=32, width=32):
    hidden = int(params["w1"].shape[0])
    latent = int(params["w_fc"].shape[0])
    lpad = ((latent + 127) // 128) * 128          # lane-dense output width

    def conv_bigw(w, wo):
        # w: (Cout, Cin, 4, 4) torch layout.  Build the block-banded matrix
        # BigW[kh*Wp*Cin + win*Cin + c, oj*Cout + o] = w[o, c, kh, win - 2*oj]
        # (zero outside the 4-tap window), Wp = 2*wo + 2 (padded input width).
        cout, cin = int(w.shape[0]), int(w.shape[1])
        wp = 2 * wo + 2
        wt = jnp.transpose(w, (2, 3, 1, 0)).astype(jnp.float32)   # (kh,kw,ci,co)
        big = jnp.zeros((4, wp, cin, wo, cout), jnp.float32)
        for kw in range(4):
            for oj in range(wo):
                big = big.at[:, 2 * oj + kw, :, oj, :].set(wt[:, kw])
        return big.reshape(4 * wp * cin, wo * cout).astype(jnp.bfloat16)

    def conv_bias(b, wo):
        # bias flattened in (w, c) lane order of the conv output rows
        return jnp.tile(b, wo).reshape(1, -1).astype(jnp.float32)

    def sel(ho, parity):
        # 0/1 row-selection matrix: picks rows parity, parity+2, ... (exact)
        rows = jnp.arange(ho // 2)
        m = jnp.zeros((ho // 2, ho), jnp.float32)
        m = m.at[rows, 2 * rows + parity].set(1.0)
        return m.astype(jnp.bfloat16)

    hs = [height // 2, height // 4, height // 8, height // 16]
    ws = [width // 2, width // 4, width // 8, width // 16]

    prep = {
        "bw1": conv_bigw(params["w1"], ws[0]), "cb1": conv_bias(params["b1"], ws[0]),
        "bw2": conv_bigw(params["w2"], ws[1]), "cb2": conv_bias(params["b2"], ws[1]),
        "bw3": conv_bigw(params["w3"], ws[2]), "cb3": conv_bias(params["b3"], ws[2]),
        "bw4": conv_bigw(params["w4"], ws[3]), "cb4": conv_bias(params["b4"], ws[3]),
        "se1": sel(hs[0], 0), "so1": sel(hs[0], 1),
        "se2": sel(hs[1], 0), "so2": sel(hs[1], 1),
        "se3": sel(hs[2], 0), "so3": sel(hs[2], 1),
    }

    # fc weight: PyTorch flatten order is (c, h, w); kernel's fc LHS lane order
    # is (h, w, c) -> pre-permute so the kernel needs a single plain dot.
    wfc = params["w_fc"].reshape(latent, hidden, hs[3], ws[3])   # (l, c, h, w)
    wfc = jnp.transpose(wfc, (2, 3, 1, 0)).reshape(hs[3] * ws[3] * hidden, latent)
    wfc = jnp.pad(wfc, ((0, 0), (0, lpad - latent))).astype(jnp.bfloat16)
    prep["wfc"] = wfc
    prep["bfc"] = jnp.pad(params["b_fc"], (0, lpad - latent)
                          ).reshape(1, lpad).astype(jnp.float32)
    return prep


# ----------------------------------------------------------------------------
# Forward pass: single fused pallas_call, gridded over batch
# ----------------------------------------------------------------------------
def encoder_forward(x_nchw, prep, latent):
    B, cin, H, W = x_nchw.shape
    assert H % 16 == 0 and W % 16 == 0, "spatial dims must be divisible by 16"
    h1, w1 = H // 2, W // 2
    h2, w2 = H // 4, W // 4
    h3, w3 = H // 8, W // 8
    h4, w4 = H // 16, W // 16
    # nn.Linear(hidden_dim * 4, latent_dim) requires a 2x2 conv4 output.
    assert h4 == 2 and w4 == 2, "fc expects a 32x32 input (2x2 after 4 convs)"

    hidden = prep["cb4"].shape[1] // w4
    lpad = prep["bfc"].shape[1]

    # ---- host-side input prep: NCHW -> padded NHWC -> row-parity planes ----
    # plane_p[b, blk, w*Cin + c] = x_pad[b, 2*blk + p, w, c]
    xp = jnp.transpose(x_nchw, (0, 2, 3, 1)).astype(jnp.float32)
    xp = jnp.pad(xp, ((0, 0), (1, 1), (1, 1), (0, 0)))         # (B, H+2, W+2, C)
    hb0 = (H + 2) // 2
    wf0 = (W + 2) * cin
    xp = xp.reshape(B, hb0, 2, W + 2, cin)
    p0 = xp[:, :, 0].reshape(B, hb0, wf0).astype(jnp.bfloat16)
    p1 = xp[:, :, 1].reshape(B, hb0, wf0).astype(jnp.bfloat16)

    def kernel(p0_ref, p1_ref,
               bw1_ref, cb1_ref, se1_ref, so1_ref,
               bw2_ref, cb2_ref, se2_ref, so2_ref,
               bw3_ref, cb3_ref, se3_ref, so3_ref,
               bw4_ref, cb4_ref, wfc_ref, bfc_ref, o_ref):

        def conv_relu(pla0, pla1, bw_ref, cb_ref, ho):
            # Four kernel-row taps = four contiguous row-slices of the two
            # parity planes, concatenated along lanes -> one MXU dot.
            lhs = jnp.concatenate(
                [pla0[0:ho, :], pla1[0:ho, :],
                 pla0[1:ho + 1, :], pla1[1:ho + 1, :]], axis=1)
            acc = jnp.dot(lhs, bw_ref[...], preferred_element_type=jnp.float32)
            return jnp.maximum(acc + cb_ref[...], 0.0)     # (ho, wo*cout) f32

        def to_planes(act, se_ref, so_ref):
            # Build next layer's padded row-parity planes.  Even/odd output
            # rows are extracted with exact 0/1 selection matmuls; spatial
            # zero-padding is done with lane/sublane concatenation of zeros.
            act_bf = act.astype(jnp.bfloat16)
            ev = jnp.dot(se_ref[...], act_bf,
                         preferred_element_type=jnp.float32).astype(jnp.bfloat16)
            od = jnp.dot(so_ref[...], act_bf,
                         preferred_element_type=jnp.float32).astype(jnp.bfloat16)
            hb = ev.shape[0]
            zc = jnp.zeros((hb, hidden), jnp.bfloat16)
            zr = jnp.zeros((1, ev.shape[1] + 2 * hidden), jnp.bfloat16)
            pe = jnp.concatenate([zc, ev, zc], axis=1)
            po = jnp.concatenate([zc, od, zc], axis=1)
            return (jnp.concatenate([zr, po], axis=0),     # parity-0 plane
                    jnp.concatenate([pe, zr], axis=0))     # parity-1 plane

        a = conv_relu(p0_ref[...], p1_ref[...], bw1_ref, cb1_ref, h1)
        q0, q1 = to_planes(a, se1_ref, so1_ref)
        a = conv_relu(q0, q1, bw2_ref, cb2_ref, h2)
        q0, q1 = to_planes(a, se2_ref, so2_ref)
        a = conv_relu(q0, q1, bw3_ref, cb3_ref, h3)
        q0, q1 = to_planes(a, se3_ref, so3_ref)
        a = conv_relu(q0, q1, bw4_ref, cb4_ref, h4)        # (2, 2*hidden) f32

        # fc: flatten the 2x2 spatial output in (h, w, c) lane order and do
        # one dot against the pre-permuted, lane-padded fc weight.
        zlhs = jnp.concatenate([a[h:h + 1, :] for h in range(h4)],
                               axis=1).astype(jnp.bfloat16)   # (1, 4*hidden)
        o_ref[...] = (jnp.dot(zlhs, wfc_ref[...],
                              preferred_element_type=jnp.float32) + bfc_ref[...])

    weight_names = ("bw1", "cb1", "se1", "so1", "bw2", "cb2", "se2", "so2",
                    "bw3", "cb3", "se3", "so3", "bw4", "cb4", "wfc", "bfc")
    weights = [prep[k] for k in weight_names]

    in_specs = [pl.BlockSpec((None, hb0, wf0), lambda b: (b, 0, 0)),
                pl.BlockSpec((None, hb0, wf0), lambda b: (b, 0, 0))]
    for wgt in weights:
        in_specs.append(
            pl.BlockSpec(wgt.shape, lambda b, _n=wgt.ndim: (0,) * _n))

    out = pl.pallas_call(
        kernel,
        out_shape=jax.ShapeDtypeStruct((B, 1, lpad), jnp.float32),
        grid=(B,),
        in_specs=in_specs,
        out_specs=pl.BlockSpec((None, 1, lpad), lambda b: (b, 0, 0)),
        compiler_params=pltpu.CompilerParams(
            dimension_semantics=("parallel",)),   # batch split across v7x TCs
    )(p0, p1, *weights)

    return out[:, 0, :latent]


encoder_apply = jax.jit(encoder_forward, static_argnums=2)


# ----------------------------------------------------------------------------
# Pure-JAX reference (mirrors the PyTorch module exactly) for validation
# ----------------------------------------------------------------------------
def encoder_reference(x_nchw, params):
    def conv(x, w, b):
        y = jax.lax.conv_general_dilated(
            x, w, window_strides=(2, 2), padding=[(1, 1), (1, 1)],
            dimension_numbers=("NCHW", "OIHW", "NCHW"))
        return jax.nn.relu(y + b[None, :, None, None])

    x = conv(x_nchw, params["w1"], params["b1"])
    x = conv(x, params["w2"], params["b2"])
    x = conv(x, params["w3"], params["b3"])
    x = conv(x, params["w4"], params["b4"])
    x = x.reshape(x.shape[0], -1)
    return x @ params["w_fc"].T + params["b_fc"]


def init_params(key, in_channels, hidden_dim, latent_dim):
    ks = jax.random.split(key, 10)

    def u(k, shape, fan_in):
        bound = 1.0 / jnp.sqrt(fan_in)
        return jax.random.uniform(k, shape, jnp.float32, -bound, bound)

    p = {}
    p["w1"] = u(ks[0], (hidden_dim, in_channels, 4, 4), in_channels * 16)
    p["b1"] = u(ks[1], (hidden_dim,), in_channels * 16)
    p["w2"] = u(ks[2], (hidden_dim, hidden_dim, 4, 4), hidden_dim * 16)
    p["b2"] = u(ks[3], (hidden_dim,), hidden_dim * 16)
    p["w3"] = u(ks[4], (hidden_dim, hidden_dim, 4, 4), hidden_dim * 16)
    p["b3"] = u(ks[5], (hidden_dim,), hidden_dim * 16)
    p["w4"] = u(ks[6], (hidden_dim, hidden_dim, 4, 4), hidden_dim * 16)
    p["b4"] = u(ks[7], (hidden_dim,), hidden_dim * 16)
    p["w_fc"] = u(ks[8], (latent_dim, hidden_dim * 4), hidden_dim * 4)
    p["b_fc"] = u(ks[9], (latent_dim,), hidden_dim * 4)
    return p


if __name__ == "__main__":
    # Input spatial size must be 32: four stride-2 convs give 2x2, so the
    # flattened fc input is hidden_dim*4, matching nn.Linear(hidden_dim*4, ...).
    B, C_IN, H, W = 2, 3, 32, 32
    HIDDEN, LATENT = 32, 16

    key = jax.random.PRNGKey(0)
    k_x, k_p = jax.random.split(key)
    x = jax.random.normal(k_x, (B, C_IN, H, W), jnp.float32)
    params = init_params(k_p, C_IN, HIDDEN, LATENT)
    prep = prepare_params(params, H, W)           # one-time layout/bf16 prep

    z = jax.block_until_ready(encoder_apply(x, prep, LATENT))
    assert z.shape == (B, LATENT), z.shape

    z_ref = jax.block_until_ready(encoder_reference(x, params))
    # bf16 MXU operands with f32 accumulation -> slightly looser tolerance
    # than a pure-f32 path.
    assert jnp.allclose(z, z_ref, atol=2e-2, rtol=2e-2), "mismatch vs reference"

    print("KERNEL_OK")
</pallas_src>

<mosaic_0001>
module attributes {stable_mosaic.version = 11 : i64} {
  func.func @kernel(%arg0: i32, %arg1: memref<1x17x102xbf16, #tpu.memory_space<vmem>>, %arg2: memref<1x17x102xbf16, #tpu.memory_space<vmem>>, %arg3: memref<408x512xbf16, #tpu.memory_space<vmem>>, %arg4: memref<1x512xf32, #tpu.memory_space<vmem>>, %arg5: memref<8x16xbf16, #tpu.memory_space<vmem>>, %arg6: memref<8x16xbf16, #tpu.memory_space<vmem>>, %arg7: memref<2304x256xbf16, #tpu.memory_space<vmem>>, %arg8: memref<1x256xf32, #tpu.memory_space<vmem>>, %arg9: memref<4x8xbf16, #tpu.memory_space<vmem>>, %arg10: memref<4x8xbf16, #tpu.memory_space<vmem>>, %arg11: memref<1280x128xbf16, #tpu.memory_space<vmem>>, %arg12: memref<1x128xf32, #tpu.memory_space<vmem>>, %arg13: memref<2x4xbf16, #tpu.memory_space<vmem>>, %arg14: memref<2x4xbf16, #tpu.memory_space<vmem>>, %arg15: memref<768x64xbf16, #tpu.memory_space<vmem>>, %arg16: memref<1x64xf32, #tpu.memory_space<vmem>>, %arg17: memref<128x128xbf16, #tpu.memory_space<vmem>>, %arg18: memref<1x128xf32, #tpu.memory_space<vmem>>, %arg19: memref<1x1x128xf32, #tpu.memory_space<vmem>>) attributes {dimension_semantics = [#tpu.dimension_semantics<parallel>], iteration_bounds = array<i64: 2>, scalar_prefetch = 0 : i64, scratch_operands = 0 : i64, tpu.core_type = #tpu.core_type<tc>, window_params = [{transform_indices = @transform_0, window_bounds = array<i64: 1, 17, 102>}, {transform_indices = @transform_1, window_bounds = array<i64: 1, 17, 102>}, {pipeline_mode = #tpu.pipeline_mode<synchronous>, transform_indices = @transform_2, window_bounds = array<i64: 408, 512>}, {pipeline_mode = #tpu.pipeline_mode<synchronous>, transform_indices = @transform_3, window_bounds = array<i64: 1, 512>}, {pipeline_mode = #tpu.pipeline_mode<synchronous>, transform_indices = @transform_4, window_bounds = array<i64: 8, 16>}, {pipeline_mode = #tpu.pipeline_mode<synchronous>, transform_indices = @transform_5, window_bounds = array<i64: 8, 16>}, {pipeline_mode = #tpu.pipeline_mode<synchronous>, transform_indices = @transform_6, window_bounds = array<i64: 2304, 256>}, {pipeline_mode = #tpu.pipeline_mode<synchronous>, transform_indices = @transform_7, window_bounds = array<i64: 1, 256>}, {pipeline_mode = #tpu.pipeline_mode<synchronous>, transform_indices = @transform_8, window_bounds = array<i64: 4, 8>}, {pipeline_mode = #tpu.pipeline_mode<synchronous>, transform_indices = @transform_9, window_bounds = array<i64: 4, 8>}, {pipeline_mode = #tpu.pipeline_mode<synchronous>, transform_indices = @transform_10, window_bounds = array<i64: 1280, 128>}, {pipeline_mode = #tpu.pipeline_mode<synchronous>, transform_indices = @transform_11, window_bounds = array<i64: 1, 128>}, {pipeline_mode = #tpu.pipeline_mode<synchronous>, transform_indices = @transform_12, window_bounds = array<i64: 2, 4>}, {pipeline_mode = #tpu.pipeline_mode<synchronous>, transform_indices = @transform_13, window_bounds = array<i64: 2, 4>}, {pipeline_mode = #tpu.pipeline_mode<synchronous>, transform_indices = @transform_14, window_bounds = array<i64: 768, 64>}, {pipeline_mode = #tpu.pipeline_mode<synchronous>, transform_indices = @transform_15, window_bounds = array<i64: 1, 64>}, {pipeline_mode = #tpu.pipeline_mode<synchronous>, transform_indices = @transform_16, window_bounds = array<i64: 128, 128>}, {pipeline_mode = #tpu.pipeline_mode<synchronous>, transform_indices = @transform_17, window_bounds = array<i64: 1, 128>}, {transform_indices = @transform_18, window_bounds = array<i64: 1, 1, 128>}]} {
    %c0 = arith.constant 0 : index
    %c0_0 = arith.constant 0 : index
    %c0_1 = arith.constant 0 : index
    %0 = vector.load %arg1[%c0, %c0_0, %c0_1] : memref<1x17x102xbf16, #tpu.memory_space<vmem>>, vector<1x17x102xbf16>
    %1 = vector.shape_cast %0 : vector<1x17x102xbf16> to vector<17x102xbf16>
    %c0_2 = arith.constant 0 : index
    %c0_3 = arith.constant 0 : index
    %c0_4 = arith.constant 0 : index
    %2 = vector.load %arg2[%c0_2, %c0_3, %c0_4] : memref<1x17x102xbf16, #tpu.memory_space<vmem>>, vector<1x17x102xbf16>
    %3 = vector.shape_cast %2 : vector<1x17x102xbf16> to vector<17x102xbf16>
    %4 = vector.extract_strided_slice %1 {offsets = [0, 0], sizes = [16, 102], strides = [1, 1]} : vector<17x102xbf16> to vector<16x102xbf16>
    %5 = vector.extract_strided_slice %3 {offsets = [0, 0], sizes = [16, 102], strides = [1, 1]} : vector<17x102xbf16> to vector<16x102xbf16>
    %6 = vector.extract_strided_slice %1 {offsets = [1, 0], sizes = [16, 102], strides = [1, 1]} : vector<17x102xbf16> to vector<16x102xbf16>
    %7 = vector.extract_strided_slice %3 {offsets = [1, 0], sizes = [16, 102], strides = [1, 1]} : vector<17x102xbf16> to vector<16x102xbf16>
    %8 = tpu.concatenate %4, %5, %6, %7 in 1 : vector<16x102xbf16>, vector<16x102xbf16>, vector<16x102xbf16>, vector<16x102xbf16> -> vector<16x408xbf16>
    %c0_5 = arith.constant 0 : index
    %c0_6 = arith.constant 0 : index
    %9 = vector.load %arg3[%c0_5, %c0_6] : memref<408x512xbf16, #tpu.memory_space<vmem>>, vector<408x512xbf16>
    %cst = arith.constant dense<0.000000e+00> : vector<16x512xf32>
    %10 = tpu.matmul %8, %9, %cst {dimension_numbers = #tpu.dot_dimension_numbers<[1], [0], [0], [1], [0, 0, 1, 1], [], []>} : vector<16x408xbf16>, vector<408x512xbf16>, vector<16x512xf32> -> vector<16x512xf32>
    %c0_7 = arith.constant 0 : index
    %c0_8 = arith.constant 0 : index
    %11 = vector.load %arg4[%c0_7, %c0_8] : memref<1x512xf32, #tpu.memory_space<vmem>>, vector<1x512xf32>
    %12 = vector.broadcast %11 : vector<1x512xf32> to vector<16x512xf32>
    %13 = arith.addf %10, %12 : vector<16x512xf32>
    %cst_9 = arith.constant 0.000000e+00 : f32
    %14 = vector.broadcast %cst_9 : f32 to vector<16x512xf32>
    %15 = arith.maximumf %13, %14 : vector<16x512xf32>
    %16 = arith.truncf %15 : vector<16x512xf32> to vector<16x512xbf16>
    %c0_10 = arith.constant 0 : index
    %c0_11 = arith.constant 0 : index
    %17 = vector.load %arg5[%c0_10, %c0_11] : memref<8x16xbf16, #tpu.memory_space<vmem>>, vector<8x16xbf16>
    %cst_12 = arith.constant dense<0.000000e+00> : vector<8x512xf32>
    %18 = tpu.matmul %17, %16, %cst_12 {dimension_numbers = #tpu.dot_dimension_numbers<[1], [0], [0], [1], [0, 0, 1, 1], [], []>} : vector<8x16xbf16>, vector<16x512xbf16>, vector<8x512xf32> -> vector<8x512xf32>
    %19 = arith.truncf %18 : vector<8x512xf32> to vector<8x512xbf16>
    %c0_13 = arith.constant 0 : index
    %c0_14 = arith.constant 0 : index
    %20 = vector.load %arg6[%c0_13, %c0_14] : memref<8x16xbf16, #tpu.memory_space<vmem>>, vector<8x16xbf16>
    %cst_15 = arith.constant dense<0.000000e+00> : vector<8x512xf32>
    %21 = tpu.matmul %20, %16, %cst_15 {dimension_numbers = #tpu.dot_dimension_numbers<[1], [0], [0], [1], [0, 0, 1, 1], [], []>} : vector<8x16xbf16>, vector<16x512xbf16>, vector<8x512xf32> -> vector<8x512xf32>
    %22 = arith.truncf %21 : vector<8x512xf32> to vector<8x512xbf16>
    %cst_16 = arith.constant 0.000000e+00 : bf16
    %23 = vector.broadcast %cst_16 : bf16 to vector<8x32xbf16>
    %cst_17 = arith.constant 0.000000e+00 : bf16
    %24 = vector.broadcast %cst_17 : bf16 to vector<1x576xbf16>
    %25 = tpu.concatenate %23, %19, %23 in 1 : vector<8x32xbf16>, vector<8x512xbf16>, vector<8x32xbf16> -> vector<8x576xbf16>
    %26 = tpu.concatenate %23, %22, %23 in 1 : vector<8x32xbf16>, vector<8x512xbf16>, vector<8x32xbf16> -> vector<8x576xbf16>
    %27 = tpu.concatenate %24, %26 in 0 : vector<1x576xbf16>, vector<8x576xbf16> -> vector<9x576xbf16>
    %28 = tpu.concatenate %25, %24 in 0 : vector<8x576xbf16>, vector<1x576xbf16> -> vector<9x576xbf16>
    %29 = vector.extract_strided_slice %27 {offsets = [0, 0], sizes = [8, 576], strides = [1, 1]} : vector<9x576xbf16> to vector<8x576xbf16>
    %30 = vector.extract_strided_slice %28 {offsets = [0, 0], sizes = [8, 576], strides = [1, 1]} : vector<9x576xbf16> to vector<8x576xbf16>
    %31 = vector.extract_strided_slice %27 {offsets = [1, 0], sizes = [8, 576], strides = [1, 1]} : vector<9x576xbf16> to vector<8x576xbf16>
    %32 = vector.extract_strided_slice %28 {offsets = [1, 0], sizes = [8, 576], strides = [1, 1]} : vector<9x576xbf16> to vector<8x576xbf16>
    %33 = tpu.concatenate %29, %30, %31, %32 in 1 : vector<8x576xbf16>, vector<8x576xbf16>, vector<8x576xbf16>, vector<8x576xbf16> -> vector<8x2304xbf16>
    %c0_18 = arith.constant 0 : index
    %c0_19 = arith.constant 0 : index
    %34 = vector.load %arg7[%c0_18, %c0_19] : memref<2304x256xbf16, #tpu.memory_space<vmem>>, vector<2304x256xbf16>
    %cst_20 = arith.constant dense<0.000000e+00> : vector<8x256xf32>
    %35 = tpu.matmul %33, %34, %cst_20 {dimension_numbers = #tpu.dot_dimension_numbers<[1], [0], [0], [1], [0, 0, 1, 1], [], []>} : vector<8x2304xbf16>, vector<2304x256xbf16>, vector<8x256xf32> -> vector<8x256xf32>
    %c0_21 = arith.constant 0 : index
    %c0_22 = arith.constant 0 : index
    %36 = vector.load %arg8[%c0_21, %c0_22] : memref<1x256xf32, #tpu.memory_space<vmem>>, vector<1x256xf32>
    %37 = vector.broadcast %36 : vector<1x256xf32> to vector<8x256xf32>
    %38 = arith.addf %35, %37 : vector<8x256xf32>
    %cst_23 = arith.constant 0.000000e+00 : f32
    %39 = vector.broadcast %cst_23 : f32 to vector<8x256xf32>
    %40 = arith.maximumf %38, %39 : vector<8x256xf32>
    %41 = arith.truncf %40 : vector<8x256xf32> to vector<8x256xbf16>
    %c0_24 = arith.constant 0 : index
    %c0_25 = arith.constant 0 : index
    %42 = vector.load %arg9[%c0_24, %c0_25] : memref<4x8xbf16, #tpu.memory_space<vmem>>, vector<4x8xbf16>
    %cst_26 = arith.constant dense<0.000000e+00> : vector<4x256xf32>
    %43 = tpu.matmul %42, %41, %cst_26 {dimension_numbers = #tpu.dot_dimension_numbers<[1], [0], [0], [1], [0, 0, 1, 1], [], []>} : vector<4x8xbf16>, vector<8x256xbf16>, vector<4x256xf32> -> vector<4x256xf32>
    %44 = arith.truncf %43 : vector<4x256xf32> to vector<4x256xbf16>
    %c0_27 = arith.constant 0 : index
    %c0_28 = arith.constant 0 : index
    %45 = vector.load %arg10[%c0_27, %c0_28] : memref<4x8xbf16, #tpu.memory_space<vmem>>, vector<4x8xbf16>
    %cst_29 = arith.constant dense<0.000000e+00> : vector<4x256xf32>
    %46 = tpu.matmul %45, %41, %cst_29 {dimension_numbers = #tpu.dot_dimension_numbers<[1], [0], [0], [1], [0, 0, 1, 1], [], []>} : vector<4x8xbf16>, vector<8x256xbf16>, vector<4x256xf32> -> vector<4x256xf32>
    %47 = arith.truncf %46 : vector<4x256xf32> to vector<4x256xbf16>
    %cst_30 = arith.constant 0.000000e+00 : bf16
    %48 = vector.broadcast %cst_30 : bf16 to vector<4x32xbf16>
    %cst_31 = arith.constant 0.000000e+00 : bf16
    %49 = vector.broadcast %cst_31 : bf16 to vector<1x320xbf16>
    %50 = tpu.concatenate %48, %44, %48 in 1 : vector<4x32xbf16>, vector<4x256xbf16>, vector<4x32xbf16> -> vector<4x320xbf16>
    %51 = tpu.concatenate %48, %47, %48 in 1 : vector<4x32xbf16>, vector<4x256xbf16>, vector<4x32xbf16> -> vector<4x320xbf16>
    %52 = tpu.concatenate %49, %51 in 0 : vector<1x320xbf16>, vector<4x320xbf16> -> vector<5x320xbf16>
    %53 = tpu.concatenate %50, %49 in 0 : vector<4x320xbf16>, vector<1x320xbf16> -> vector<5x320xbf16>
    %54 = vector.extract_strided_slice %52 {offsets = [0, 0], sizes = [4, 320], strides = [1, 1]} : vector<5x320xbf16> to vector<4x320xbf16>
    %55 = vector.extract_strided_slice %53 {offsets = [0, 0], sizes = [4, 320], strides = [1, 1]} : vector<5x320xbf16> to vector<4x320xbf16>
    %56 = vector.extract_strided_slice %52 {offsets = [1, 0], sizes = [4, 320], strides = [1, 1]} : vector<5x320xbf16> to vector<4x320xbf16>
    %57 = vector.extract_strided_slice %53 {offsets = [1, 0], sizes = [4, 320], strides = [1, 1]} : vector<5x320xbf16> to vector<4x320xbf16>
    %58 = tpu.concatenate %54, %55, %56, %57 in 1 : vector<4x320xbf16>, vector<4x320xbf16>, vector<4x320xbf16>, vector<4x320xbf16> -> vector<4x1280xbf16>
    %c0_32 = arith.constant 0 : index
    %c0_33 = arith.constant 0 : index
    %59 = vector.load %arg11[%c0_32, %c0_33] : memref<1280x128xbf16, #tpu.memory_space<vmem>>, vector<1280x128xbf16>
    %cst_34 = arith.constant dense<0.000000e+00> : vector<4x128xf32>
    %60 = tpu.matmul %58, %59, %cst_34 {dimension_numbers = #tpu.dot_dimension_numbers<[1], [0], [0], [1], [0, 0, 1, 1], [], []>} : vector<4x1280xbf16>, vector<1280x128xbf16>, vector<4x128xf32> -> vector<4x128xf32>
    %c0_35 = arith.constant 0 : index
    %c0_36 = arith.constant 0 : index
    %61 = vector.load %arg12[%c0_35, %c0_36] : memref<1x128xf32, #tpu.memory_space<vmem>>, vector<1x128xf32>
    %62 = vector.broadcast %61 : vector<1x128xf32> to vector<4x128xf32>
    %63 = arith.addf %60, %62 : vector<4x128xf32>
    %cst_37 = arith.constant 0.000000e+00 : f32
    %64 = vector.broadcast %cst_37 : f32 to vector<4x128xf32>
    %65 = arith.maximumf %63, %64 : vector<4x128xf32>
    %66 = arith.truncf %65 : vector<4x128xf32> to vector<4x128xbf16>
    %c0_38 = arith.constant 0 : index
    %c0_39 = arith.constant 0 : index
    %67 = vector.load %arg13[%c0_38, %c0_39] : memref<2x4xbf16, #tpu.memory_space<vmem>>, vector<2x4xbf16>
    %cst_40 = arith.constant dense<0.000000e+00> : vector<2x128xf32>
    %68 = tpu.matmul %67, %66, %cst_40 {dimension_numbers = #tpu.dot_dimension_numbers<[1], [0], [0], [1], [0, 0, 1, 1], [], []>} : vector<2x4xbf16>, vector<4x128xbf16>, vector<2x128xf32> -> vector<2x128xf32>
    %69 = arith.truncf %68 : vector<2x128xf32> to vector<2x128xbf16>
    %c0_41 = arith.constant 0 : index
    %c0_42 = arith.constant 0 : index
    %70 = vector.load %arg14[%c0_41, %c0_42] : memref<2x4xbf16, #tpu.memory_space<vmem>>, vector<2x4xbf16>
    %cst_43 = arith.constant dense<0.000000e+00> : vector<2x128xf32>
    %71 = tpu.matmul %70, %66, %cst_43 {dimension_numbers = #tpu.dot_dimension_numbers<[1], [0], [0], [1], [0, 0, 1, 1], [], []>} : vector<2x4xbf16>, vector<4x128xbf16>, vector<2x128xf32> -> vector<2x128xf32>
    %72 = arith.truncf %71 : vector<2x128xf32> to vector<2x128xbf16>
    %cst_44 = arith.constant 0.000000e+00 : bf16
    %73 = vector.broadcast %cst_44 : bf16 to vector<2x32xbf16>
    %cst_45 = arith.constant 0.000000e+00 : bf16
    %74 = vector.broadcast %cst_45 : bf16 to vector<1x192xbf16>
    %75 = tpu.concatenate %73, %69, %73 in 1 : vector<2x32xbf16>, vector<2x128xbf16>, vector<2x32xbf16> -> vector<2x192xbf16>
    %76 = tpu.concatenate %73, %72, %73 in 1 : vector<2x32xbf16>, vector<2x128xbf16>, vector<2x32xbf16> -> vector<2x192xbf16>
    %77 = tpu.concatenate %74, %76 in 0 : vector<1x192xbf16>, vector<2x192xbf16> -> vector<3x192xbf16>
    %78 = tpu.concatenate %75, %74 in 0 : vector<2x192xbf16>, vector<1x192xbf16> -> vector<3x192xbf16>
    %79 = vector.extract_strided_slice %77 {offsets = [0, 0], sizes = [2, 192], strides = [1, 1]} : vector<3x192xbf16> to vector<2x192xbf16>
    %80 = vector.extract_strided_slice %78 {offsets = [0, 0], sizes = [2, 192], strides = [1, 1]} : vector<3x192xbf16> to vector<2x192xbf16>
    %81 = vector.extract_strided_slice %77 {offsets = [1, 0], sizes = [2, 192], strides = [1, 1]} : vector<3x192xbf16> to vector<2x192xbf16>
    %82 = vector.extract_strided_slice %78 {offsets = [1, 0], sizes = [2, 192], strides = [1, 1]} : vector<3x192xbf16> to vector<2x192xbf16>
    %83 = tpu.concatenate %79, %80, %81, %82 in 1 : vector<2x192xbf16>, vector<2x192xbf16>, vector<2x192xbf16>, vector<2x192xbf16> -> vector<2x768xbf16>
    %c0_46 = arith.constant 0 : index
    %c0_47 = arith.constant 0 : index
    %84 = vector.load %arg15[%c0_46, %c0_47] : memref<768x64xbf16, #tpu.memory_space<vmem>>, vector<768x64xbf16>
    %cst_48 = arith.constant dense<0.000000e+00> : vector<2x64xf32>
    %85 = tpu.matmul %83, %84, %cst_48 {dimension_numbers = #tpu.dot_dimension_numbers<[1], [0], [0], [1], [0, 0, 1, 1], [], []>} : vector<2x768xbf16>, vector<768x64xbf16>, vector<2x64xf32> -> vector<2x64xf32>
    %c0_49 = arith.constant 0 : index
    %c0_50 = arith.constant 0 : index
    %86 = vector.load %arg16[%c0_49, %c0_50] : memref<1x64xf32, #tpu.memory_space<vmem>>, vector<1x64xf32>
    %87 = vector.broadcast %86 : vector<1x64xf32> to vector<2x64xf32>
    %88 = arith.addf %85, %87 : vector<2x64xf32>
    %cst_51 = arith.constant 0.000000e+00 : f32
    %89 = vector.broadcast %cst_51 : f32 to vector<2x64xf32>
    %90 = arith.maximumf %88, %89 : vector<2x64xf32>
    %91 = vector.extract_strided_slice %90 {offsets = [0, 0], sizes = [1, 64], strides = [1, 1]} : vector<2x64xf32> to vector<1x64xf32>
    %92 = vector.extract_strided_slice %90 {offsets = [1, 0], sizes = [1, 64], strides = [1, 1]} : vector<2x64xf32> to vector<1x64xf32>
    %93 = tpu.concatenate %91, %92 in 1 : vector<1x64xf32>, vector<1x64xf32> -> vector<1x128xf32>
    %94 = arith.truncf %93 : vector<1x128xf32> to vector<1x128xbf16>
    %c0_52 = arith.constant 0 : index
    %c0_53 = arith.constant 0 : index
    %95 = vector.load %arg17[%c0_52, %c0_53] : memref<128x128xbf16, #tpu.memory_space<vmem>>, vector<128x128xbf16>
    %cst_54 = arith.constant dense<0.000000e+00> : vector<1x128xf32>
    %96 = tpu.matmul %94, %95, %cst_54 {dimension_numbers = #tpu.dot_dimension_numbers<[1], [0], [0], [1], [0, 0, 1, 1], [], []>} : vector<1x128xbf16>, vector<128x128xbf16>, vector<1x128xf32> -> vector<1x128xf32>
    %c0_55 = arith.constant 0 : index
    %c0_56 = arith.constant 0 : index
    %97 = vector.load %arg18[%c0_55, %c0_56] : memref<1x128xf32, #tpu.memory_space<vmem>>, vector<1x128xf32>
    %98 = arith.addf %96, %97 : vector<1x128xf32>
    %c0_57 = arith.constant 0 : index
    %c0_58 = arith.constant 0 : index
    %c0_59 = arith.constant 0 : index
    %99 = vector.load %arg19[%c0_57, %c0_58, %c0_59] : memref<1x1x128xf32, #tpu.memory_space<vmem>>, vector<1x1x128xf32>
    %100 = vector.shape_cast %99 : vector<1x1x128xf32> to vector<1x128xf32>
    %101 = vector.shape_cast %98 : vector<1x128xf32> to vector<1x1x128xf32>
    tpu.vector_store %arg19[%c0_57, %c0_58, %c0_59], %101 {strides = array<i32>} : memref<1x1x128xf32, #tpu.memory_space<vmem>>, vector<1x1x128xf32>,
    return
  }
  func.func @transform_0(%arg0: i32) -> (i32, i32, i32) {
    %c0_i32 = arith.constant 0 : i32
    %c0_i32_0 = arith.constant 0 : i32
    %c0_i32_1 = arith.constant 0 : i32
    return %arg0, %c0_i32, %c0_i32_0 : i32, i32, i32
  }
  func.func @transform_1(%arg0: i32) -> (i32, i32, i32) {
    %c0_i32 = arith.constant 0 : i32
    %c0_i32_0 = arith.constant 0 : i32
    %c0_i32_1 = arith.constant 0 : i32
    return %arg0, %c0_i32, %c0_i32_0 : i32, i32, i32
  }
  func.func @transform_2(%arg0: i32) -> (i32, i32) {
    %c0_i32 = arith.constant 0 : i32
    %c0_i32_0 = arith.constant 0 : i32
    %c0_i32_1 = arith.constant 0 : i32
    return %c0_i32, %c0_i32_0 : i32, i32
  }
  func.func @transform_3(%arg0: i32) -> (i32, i32) {
    %c0_i32 = arith.constant 0 : i32
    %c0_i32_0 = arith.constant 0 : i32
    %c0_i32_1 = arith.constant 0 : i32
    return %c0_i32, %c0_i32_0 : i32, i32
  }
  func.func @transform_4(%arg0: i32) -> (i32, i32) {
    %c0_i32 = arith.constant 0 : i32
    %c0_i32_0 = arith.constant 0 : i32
    %c0_i32_1 = arith.constant 0 : i32
    return %c0_i32, %c0_i32_0 : i32, i32
  }
  func.func @transform_5(%arg0: i32) -> (i32, i32) {
    %c0_i32 = arith.constant 0 : i32
    %c0_i32_0 = arith.constant 0 : i32
    %c0_i32_1 = arith.constant 0 : i32
    return %c0_i32, %c0_i32_0 : i32, i32
  }
  func.func @transform_6(%arg0: i32) -> (i32, i32) {
    %c0_i32 = arith.constant 0 : i32
    %c0_i32_0 = arith.constant 0 : i32
    %c0_i32_1 = arith.constant 0 : i32
    return %c0_i32, %c0_i32_0 : i32, i32
  }
  func.func @transform_7(%arg0: i32) -> (i32, i32) {
    %c0_i32 = arith.constant 0 : i32
    %c0_i32_0 = arith.constant 0 : i32
    %c0_i32_1 = arith.constant 0 : i32
    return %c0_i32, %c0_i32_0 : i32, i32
  }
  func.func @transform_8(%arg0: i32) -> (i32, i32) {
    %c0_i32 = arith.constant 0 : i32
    %c0_i32_0 = arith.constant 0 : i32
    %c0_i32_1 = arith.constant 0 : i32
    return %c0_i32, %c0_i32_0 : i32, i32
  }
  func.func @transform_9(%arg0: i32) -> (i32, i32) {
    %c0_i32 = arith.constant 0 : i32
    %c0_i32_0 = arith.constant 0 : i32
    %c0_i32_1 = arith.constant 0 : i32
    return %c0_i32, %c0_i32_0 : i32, i32
  }
  func.func @transform_10(%arg0: i32) -> (i32, i32) {
    %c0_i32 = arith.constant 0 : i32
    %c0_i32_0 = arith.constant 0 : i32
    %c0_i32_1 = arith.constant 0 : i32
    return %c0_i32, %c0_i32_0 : i32, i32
  }
  func.func @transform_11(%arg0: i32) -> (i32, i32) {
    %c0_i32 = arith.constant 0 : i32
    %c0_i32_0 = arith.constant 0 : i32
    %c0_i32_1 = arith.constant 0 : i32
    return %c0_i32, %c0_i32_0 : i32, i32
  }
  func.func @transform_12(%arg0: i32) -> (i32, i32) {
    %c0_i32 = arith.constant 0 : i32
    %c0_i32_0 = arith.constant 0 : i32
    %c0_i32_1 = arith.constant 0 : i32
    return %c0_i32, %c0_i32_0 : i32, i32
  }
  func.func @transform_13(%arg0: i32) -> (i32, i32) {
    %c0_i32 = arith.constant 0 : i32
    %c0_i32_0 = arith.constant 0 : i32
    %c0_i32_1 = arith.constant 0 : i32
    return %c0_i32, %c0_i32_0 : i32, i32
  }
  func.func @transform_14(%arg0: i32) -> (i32, i32) {
    %c0_i32 = arith.constant 0 : i32
    %c0_i32_0 = arith.constant 0 : i32
    %c0_i32_1 = arith.constant 0 : i32
    return %c0_i32, %c0_i32_0 : i32, i32
  }
  func.func @transform_15(%arg0: i32) -> (i32, i32) {
    %c0_i32 = arith.constant 0 : i32
    %c0_i32_0 = arith.constant 0 : i32
    %c0_i32_1 = arith.constant 0 : i32
    return %c0_i32, %c0_i32_0 : i32, i32
  }
  func.func @transform_16(%arg0: i32) -> (i32, i32) {
    %c0_i32 = arith.constant 0 : i32
    %c0_i32_0 = arith.constant 0 : i32
    %c0_i32_1 = arith.constant 0 : i32
    return %c0_i32, %c0_i32_0 : i32, i32
  }
  func.func @transform_17(%arg0: i32) -> (i32, i32) {
    %c0_i32 = arith.constant 0 : i32
    %c0_i32_0 = arith.constant 0 : i32
    %c0_i32_1 = arith.constant 0 : i32
    return %c0_i32, %c0_i32_0 : i32, i32
  }
  func.func @transform_18(%arg0: i32) -> (i32, i32, i32) {
    %c0_i32 = arith.constant 0 : i32
    %c0_i32_0 = arith.constant 0 : i32
    %c0_i32_1 = arith.constant 0 : i32
    return %arg0, %c0_i32, %c0_i32_0 : i32, i32, i32
  }
}

</mosaic_0001>

<bundles_post_ra>
// kernel: encoder_forward.1
= control target key start
LH: loop header
LB: loop body
LE: loop exit
PB: predicated region body
PF: predicated region fallthrough
CT: control target
= control target key end

     0   :  { %s10470_s0 = inlined_call_operand.vmem [shape: bf16[2,17,102], index: 0, kind: input, shape index: {}]   ;;  %s10471_s1 = inlined_call_operand.vmem [shape: bf16[2,17,102], index: 1, kind: input, shape index: {}]   ;;  %s10472_s2 = inlined_call_operand.hbm [shape: bf16[408,512], index: 2, kind: input, shape index: {}]   ;;  %s10473_s3 = inlined_call_operand.hbm [shape: f32[1,512], index: 3, kind: input, shape index: {}]   ;;  %s10474_s4 = inlined_call_operand.hbm [shape: bf16[8,16], index: 4, kind: input, shape index: {}]   ;;  %s10475_s5 = inlined_call_operand.hbm [shape: bf16[8,16], index: 5, kind: input, shape index: {}]   ;;  %s10476_s6 = inlined_call_operand.hbm [shape: bf16[2304,256], index: 6, kind: input, shape index: {}]   ;;  %s10477_s7 = inlined_call_operand.hbm [shape: f32[1,256], index: 7, kind: input, shape index: {}]   ;;  %s10478_s8 = inlined_call_operand.hbm [shape: bf16[4,8], index: 8, kind: input, shape index: {}]   ;;  %s10479_s9 = inlined_call_operand.hbm [shape: bf16[4,8], index: 9, kind: input, shape index: {}]   ;;  %s10480_s10 = inlined_call_operand.hbm [shape: bf16[1280,128], index: 10, kind: input, shape index: {}]   ;;  %s10481_s11 = inlined_call_operand.hbm [shape: f32[1,128], index: 11, kind: input, shape index: {}]   ;;  %s10482_s12 = inlined_call_operand.hbm [shape: bf16[2,4], index: 12, kind: input, shape index: {}]   ;;  %s10483_s13 = inlined_call_operand.hbm [shape: bf16[2,4], index: 13, kind: input, shape index: {}]   ;;  %s10484_s14 = inlined_call_operand.vmem [shape: bf16[768,64], index: 14, kind: input, shape index: {}]   ;;  %s10485_s15 = inlined_call_operand.hbm [shape: f32[1,64], index: 15, kind: input, shape index: {}]   ;;  %s10486_s16 = inlined_call_operand.hbm [shape: bf16[128,128], index: 16, kind: input, shape index: {}]   ;;  %s10487_s17 = inlined_call_operand.hbm [shape: f32[1,128], index: 17, kind: input, shape index: {}]   ;;  %s10488_s18 = inlined_call_operand.hbm [shape: f32[2,1,128], index: 18, kind: output, shape index: {}]  }
   0x1   :  { %10497 = sst [smem:[#allocation43_spill]] %s10470_s0 }
   0x2   :  { %10498 = sst [smem:[#allocation44_spill]] %s10471_s1 }
   0x3   :  { %10499 = sst [smem:[#allocation45_spill]] %s10472_s2 }
   0x4   :  { %10500 = sst [smem:[#allocation46_spill]] %s10473_s3 }
   0x5   :  { %10501 = sst [smem:[#allocation47_spill]] %s10475_s5 }
   0x6   :  { %10502 = sst [smem:[#allocation48_spill]] %s10477_s7 }
   0x7   :  { %10503 = sst [smem:[#allocation49_spill]] %s10479_s9 }
   0x8   :  { %10504 = sst [smem:[#allocation50_spill]] %s10481_s11 }
   0x9   :  { %23 = vsyncpa [#allocation3], 0 }
   0xa   :  { %24 = vsyncpa [#allocation6], 0 }
   0xb   :  { %25 = vsyncpa [#allocation9], 0 }
   0xc   :  { %26 = vsyncpa [#allocation12], 0 }
   0xd   :  { %27 = vsyncpa [#allocation15], 0 }
   0xe   :  { %28 = vsyncpa [#allocation18], 0 }
   0xf   :  { %29 = vsyncpa [#allocation21], 0 }
  0x10   :  { %30 = vsyncpa [#allocation24], 0 }
  0x11   :  { %31 = vsyncpa [#allocation4], 0 }
  0x12   :  { %33 = vsyncpa [#allocation4 + $0x1], 0  ;;  %s9741_s27 = smov 0   ;;  %s9743_s28 = smov 0  }
  0x13   :  { %s9745_s29 = smov 0   ;;  %s9747_s30 = smov 0  }
  0x14 LB: > { %10505 = sst [smem:[#allocation36_spill]] %s9606_s27  ;;  %s9762_s0 = sadd.s32 4294967295, %s9618_s30   ;;  %s9618_s30 = sphi %s9747_s30, %s10530_s30   ;;  %s9614_s29 = sphi %s9745_s29, %s10532_s29   ;;  %s9610_s28 = sphi %s9743_s28, %s10534_s28   ;;  %s9606_s27 = sphi %s9741_s27, %s10533_s27  }
  0x15   : > { %10506 = sst [smem:[#allocation37_spill]] %s9614_s29  ;;  %s6183_s19 = sadd.s32 4294967294, %s9618_s30  }
  0x16   : > { %10507 = sst [smem:[#allocation38_spill]] %s9618_s30  ;;  %s9766_s1 = sadd.s32 1, %s9618_s30  }
  0x17   : > { %10508 = sst [smem:[#allocation39_spill]] %s9766_s1  ;;  %s434_s20 = sadd.s32 1, %s9614_s29 }
  0x18   : > { %s431_s21 = ssub.s32 %s9618_s30, %s9766_s1  ;;  %p444_p0 = scmp.ne.s32.totalorder %s9614_s29, %s9610_s28 }
  0x19   : > { %p432_p1 = scmp.eq.s32.totalorder %s431_s21, 0  ;;  %p445_p2 = scmp.eq.s32.totalorder %s9762_s0, 1 }
  0x1a   : > { %p450_p3 = scmp.ne.s32.totalorder %s9610_s28, %s9606_s27  ;;  %p451_p4 = scmp.eq.s32.totalorder %s6183_s19, 1 }
  0x1b   : > { %s9777_s22 = scalar_select %p432_p1, %s9614_s29, %s434_s20  }
  0x1c   : > { %p9779_p5 = por %p445_p2, %p444_p0  ;;  %p9783_p6 = por %p451_p4, %p450_p3 }
  0x1d   : > { %10509 = sst [smem:[#allocation40_spill]] %s9777_s22  ;;  %p6184_p7 = scmp.ge.s32.totalorder %s9618_s30, 1 }
  0x1e   : > { %s10510_s2 = scalar_select %p9779_p5, 1, 0 }
  0x1f   : > { %s10512_s23 = scalar_select %p9783_p6, 1, 0 }
  0x20   : > { %10511 = sst [smem:[#allocation41_spill]] %s10510_s2  ;;  %p458_p8 = scmp.lt.s32.totalorder %s9618_s30, 3 }
  0x21   : > { %10513 = sst [smem:[#allocation42_spill]] %s10512_s23  ;;  %p8982_p9 = scmp.eq.s32.totalorder %s9762_s0, 0 }
  0x22   : > { %p9790_p10 = pnand %p6184_p7, %p458_p8  ;;  %s10515_s3 = sld [smem:[#allocation46_spill]] }
  0x23   : > { %s9620_s20 = smov [#allocation5]   ;;  %s10516_s5 = sld [smem:[#allocation47_spill]] }
  0x24   : > { %p8932_p11 = pneg %p9790_p10  ;;  %s486_s21 = sshll.u32 %s9620_s20, 4  ;;  %s487_s21 = int_to_ptr.vmem [resolvable:$true] %s486_s21 }
  0x25   : > { %s10518_s7 = sld [smem:[#allocation48_spill]]  ;;  %s9621_s27 = smov [#allocation8]  }
  0x26   : > { %p9804_p12 = pnand %p8982_p9, %p8932_p11  ;;  %s510_s20 = sshll.u32 %s9621_s27, 4  ;;  %s511_s20 = int_to_ptr.vmem [resolvable:$true] %s510_s20 }
  0x27   : > { %s10519_s9 = sld [smem:[#allocation49_spill]]  ;;  %s9622_s30 = smov [#allocation11]  }
  0x28   : > { %s484_s19 = sshll.u32 %s10515_s3, 4  ;;  %s536_s2 = sshll.u32 %s9622_s30, 4  ;;  %s485_s19 = int_to_ptr.hbm [resolvable:$true] %s484_s19  ;;  %s537_s2 = int_to_ptr.vmem [resolvable:$true] %s536_s2 }
  0x29   : > { %s508_s1 = sshll.u32 %s10516_s5, 4  ;;  %s9623_s27 = smov [#allocation14]   ;;  %s509_s1 = int_to_ptr.hbm [resolvable:$true] %s508_s1 }
  0x2a   : > { %8938 = dma.hbm_to_vmem [thread:$0]  (!%p9804_p12), %s485_s19, 64, %s487_s21, [#allocation6]  }
  0x2b   : > { %s534_s3 = sshll.u32 %s10518_s7, 4  ;;  %s560_s25 = sshll.u32 %s9623_s27, 4  ;;  %s535_s3 = int_to_ptr.hbm [resolvable:$true] %s534_s3  ;;  %s561_s25 = int_to_ptr.vmem [resolvable:$true] %s560_s25 }
  0x2c   : > { %8944 = dma.hbm_to_vmem [thread:$0]  (!%p9804_p12), %s509_s1, 64, %s511_s20, [#allocation9]  }
  0x2d   : > { %s558_s5 = sshll.u32 %s10519_s9, 4  ;;  %s10520_s11 = sld [smem:[#allocation50_spill]]  ;;  %s559_s5 = int_to_ptr.hbm [resolvable:$true] %s558_s5 }
  0x2e   : > { %8950 = dma.hbm_to_vmem [thread:$0]  (!%p9804_p12), %s535_s3, 32, %s537_s2, [#allocation12]  }
  0x2f   : > { %8956 = dma.hbm_to_vmem [thread:$0]  (!%p9804_p12), %s559_s5, 32, %s561_s25, [#allocation15]  }
  0x30   : > { %s608_s29 = sshll.u32 %s10483_s13, 4  ;;  %s9624_s30 = smov [#allocation17]   ;;  %s609_s29 = int_to_ptr.hbm [resolvable:$true] %s608_s29 }
  0x31   : > { %s586_s22 = sshll.u32 %s9624_s30, 4  ;;  %s9625_s3 = smov [#allocation20]   ;;  %s587_s22 = int_to_ptr.vmem [resolvable:$true] %s586_s22 }
  0x32   : > { %s610_s2 = sshll.u32 %s9625_s3, 4  ;;  %s634_s5 = sshll.u32 %s10486_s16, 4  ;;  %s611_s2 = int_to_ptr.vmem [resolvable:$true] %s610_s2  ;;  %s635_s5 = int_to_ptr.hbm [resolvable:$true] %s634_s5 }
  0x33   : > { %s584_s21 = sshll.u32 %s10520_s11, 4  ;;  %s9626_s25 = smov [#allocation23]   ;;  %s585_s21 = int_to_ptr.hbm [resolvable:$true] %s584_s21 }
  0x34   : > { %8962 = dma.hbm_to_vmem [thread:$0]  (!%p9804_p12), %s585_s21, 16, %s587_s22, [#allocation18]  }
  0x35   : > { %8968 = dma.hbm_to_vmem [thread:$0]  (!%p9804_p12), %s609_s29, 16, %s611_s2, [#allocation21]  }
  0x36   : > { %s636_s19 = sshll.u32 %s9626_s25, 4  ;;  %s10521_s30 = sld [smem:[#allocation45_spill]]  ;;  %s637_s19 = int_to_ptr.vmem [resolvable:$true] %s636_s19 }
  0x37   : > { %s9627_s9 = smov 64   ;;  %s9628_s21 = smov 4  }
  0x38   : > { %8974 = dma.hbm_to_vmem [thread:$0]  (!%p9804_p12), %s635_s5, 1024, %s637_s19, [#allocation24], %s9627_s9, %s9627_s9, %s9628_s21  }
  0x39   : > { %s9629_s29 = smov [#allocation2]   ;;  %s9630_s3 = smov 256  }
  0x3a   : > { %s471_s22 = sshll.u32 %s9629_s29, 4  ;;  %s9631_s2 = smov 16   ;;  %s472_s22 = int_to_ptr.vmem [resolvable:$true] %s471_s22 }
  0x3b   : > { %s496_s25 = sshll.u32 %s10474_s4, 4  ;;  %s9632_s1 = smov [#allocation7]   ;;  %s497_s25 = int_to_ptr.hbm [resolvable:$true] %s496_s25 }
  0x3c   : > { %s469_s7 = sshll.u32 %s10521_s30, 4  ;;  %s498_s20 = sshll.u32 %s9632_s1, 4  ;;  %s470_s7 = int_to_ptr.hbm [resolvable:$true] %s469_s7  ;;  %s499_s20 = int_to_ptr.vmem [resolvable:$true] %s498_s20 }
  0x3d   : > { %8935 = dma.hbm_to_vmem [thread:$0]  (!%p9804_p12), %s470_s7, 13056, %s472_s22, [#allocation3], %s9630_s3, %s9630_s3, %s9631_s2  }
  0x3e   : > { %s519_s5 = sshll.u32 %s10476_s6, 4  ;;  %s9633_s19 = smov [#allocation10]   ;;  %s520_s5 = int_to_ptr.hbm [resolvable:$true] %s519_s5 }
  0x3f   : > { %8941 = dma.hbm_to_vmem [thread:$0]  (!%p9804_p12), %s497_s25, 64, %s499_s20, [#allocation6]  }
  0x40   : > { %s521_s29 = sshll.u32 %s9633_s19, 4  ;;  %s9634_s7 = smov 128   ;;  %s522_s29 = int_to_ptr.vmem [resolvable:$true] %s521_s29 }
  0x41   : > { %s9635_s22 = smov 8   ;;  %s546_s27 = sshll.u32 %s10478_s8, 4  ;;  %s547_s27 = int_to_ptr.hbm [resolvable:$true] %s546_s27 }
  0x42   : > { %8947 = dma.hbm_to_vmem [thread:$0]  (!%p9804_p12), %s520_s5, 36864, %s522_s29, [#allocation9], %s9634_s7, %s9634_s7, %s9635_s22  }
  0x43   : > { %s9636_s26 = smov [#allocation13]   ;;  %s569_s20 = sshll.u32 %s10480_s10, 4  ;;  %s570_s20 = int_to_ptr.hbm [resolvable:$true] %s569_s20 }
  0x44   : > { %s548_s11 = sshll.u32 %s9636_s26, 4  ;;  %s9637_s30 = smov [#allocation16]   ;;  %s549_s11 = int_to_ptr.vmem [resolvable:$true] %s548_s11 }
  0x45   : > { %8953 = dma.hbm_to_vmem [thread:$0]  (!%p9804_p12), %s547_s27, 32, %s549_s11, [#allocation12]  }
  0x46   : > { %s571_s19 = sshll.u32 %s9637_s30, 4  ;;  %s596_s7 = sshll.u32 %s10482_s12, 4  ;;  %s572_s19 = int_to_ptr.vmem [resolvable:$true] %s571_s19  ;;  %s597_s7 = int_to_ptr.hbm [resolvable:$true] %s596_s7 }
  0x47   : > { %8959 = dma.hbm_to_vmem [thread:$0]  (!%p9804_p12), %s570_s20, 10240, %s572_s19, [#allocation15], %s9627_s9, %s9627_s9, %s9628_s21  }
  0x48   : > { %s623_s2 = sshll.u32 %s10485_s15, 4  ;;  %s9638_s27 = smov [#allocation19]   ;;  %s624_s2 = int_to_ptr.hbm [resolvable:$true] %s623_s2 }
  0x49   : > { %s598_s26 = sshll.u32 %s9638_s27, 4  ;;  %s9639_s11 = smov [#allocation22]   ;;  %s599_s26 = int_to_ptr.vmem [resolvable:$true] %s598_s26 }
  0x4a   : > { %8965 = dma.hbm_to_vmem [thread:$0]  (!%p9804_p12), %s597_s7, 16, %s599_s26, [#allocation18]  }
  0x4b   : > { %s625_s1 = sshll.u32 %s9639_s11, 4  ;;  %s649_s5 = sshll.u32 %s10487_s17, 4  ;;  %s626_s1 = int_to_ptr.vmem [resolvable:$true] %s625_s1  ;;  %s650_s5 = int_to_ptr.hbm [resolvable:$true] %s649_s5 }
  0x4c   : > { %8971 = dma.hbm_to_vmem [thread:$0]  (!%p9804_p12), %s624_s2, 16, %s626_s1, [#allocation21]  }
  0x4d   : > { %s9640_s9 = smov [#allocation25]   ;;  %680 = sbr.rel (%p9790_p10) target bundleno = 2455 (0x997), region = 92 }
  0x4e   : > { %s651_s21 = sshll.u32 %s9640_s9, 4  ;;  %s652_s21 = int_to_ptr.vmem [resolvable:$true] %s651_s21 }
  0x4f   : > { %8977 = dma.hbm_to_vmem [thread:$0]  (!%p9804_p12), %s650_s5, 16, %s652_s21, [#allocation24]  }
  0x52   : > { %9569 = dma.done.wait (%p8982_p9), [#allocation3], 13056  }
  0x53   : > { %9571 = vsyncadd (%p8982_p9), [#allocation3], 4294954240 }
  0x54   : > { %9573 = dma.done.wait (%p8982_p9), [#allocation6], 128  }
  0x55   : > { %9575 = vsyncadd (%p8982_p9), [#allocation6], 4294967168 }
  0x56   : > { %9577 = dma.done.wait (%p8982_p9), [#allocation9], 36928  }
  0x57   : > { %9579 = vsyncadd (%p8982_p9), [#allocation9], 4294930368 }
  0x58   : > { %9581 = dma.done.wait (%p8982_p9), [#allocation12], 64  }
  0x59   : > { %9583 = vsyncadd (%p8982_p9), [#allocation12], 4294967232 }
  0x5a   : > { %9585 = dma.done.wait (%p8982_p9), [#allocation15], 10272  }
  0x5b   : > { %9587 = vsyncadd (%p8982_p9), [#allocation15], 4294957024 }
  0x5c   : > { %9589 = dma.done.wait (%p8982_p9), [#allocation18], 32  }
  0x5d   : > { %9591 = vsyncadd (%p8982_p9), [#allocation18], 4294967264 }
  0x5e   : > { %9593 = dma.done.wait (%p8982_p9), [#allocation21], 32  }
  0x5f   : > { %9595 = vsyncadd (%p8982_p9), [#allocation21], 4294967264 }
  0x60   : > { %9597 = dma.done.wait (%p8982_p9), [#allocation24], 1040  }
  0x61   : > { %9599 = vsyncadd (%p8982_p9), [#allocation24], 4294966256  ;;  %p809_p13 = scmp.lt.s32.totalorder %s9762_s0, 1  ;;  %s10522_s29 = sld [smem:[#allocation44_spill]]  ;;  %v8373_v5 = vld [vmem:[#allocation2 + $0xe4] sm:$0xf] }
  0x62   : > { %s10523_s2 = sld [smem:[#allocation43_spill]]  ;;  %v6343_v6 = vld [vmem:[#allocation2 + $0xf0] sm:$0xf0]  ;;  %s9641_s26 = smov 102   ;;  %v8369_v10 = vld [vmem:[#allocation2 + $0xc4] sm:$0xf] }
  0x63   : > { %s810_s23 = scalar_select %p809_p13, %s9762_s0, 1  ;;  %v6346_v14 = vor.u32 %v8373_v5, %v6343_v6  ;;  %v6327_v15 = vld [vmem:[#allocation2 + $0xd0] sm:$0xf0]  ;;  %vm841_vm0 = vsmask.f32 7424  ;;  %vm1510_vm1 = vcmask 1043456  }
  0x64   : > { %v6330_v20 = vor.u32 %v8369_v10, %v6327_v15  ;;  %v8365_v21 = vld [vmem:[#allocation2 + $0xa4] sm:$0xf]  ;;  %v6311_v24 = vld [vmem:[#allocation2 + $0xb0] sm:$0xf0]  ;;  %v6469_v25 = vld [vmem:[#allocation2 + $0x1e0] sm:$0xf] }
  0x65   : > { %s8869_s24 = smul.u32 12, %s810_s23  ;;  %1579 = vmatpush.bf16.msra.mxu3 %v6346_v14  ;;  %v8407_v28 = vld [vmem:[#allocation2 + $0x1ec] sm:$0xf0]  ;;  %v6341_v31 = vld [vmem:[#allocation2 + $0xe0] sm:$0xf]  ;;  %v6314_v33 = vor.u32 %v8365_v21, %v6311_v24  ;;  %s9642_s11 = smov 50  }
  0x66   : > { %v6470_v30 = vor.u32 %v8407_v28, %v6469_v25  ;;  %v8375_v34 = vld [vmem:[#allocation2 + $0xec] sm:$0xf0]  ;;  %v6453_v35 = vld [vmem:[#allocation2 + $0x1c0] sm:$0xf]  ;;  %v8361_v38 = vld [vmem:[#allocation2 + $0x84] sm:$0xf] }
  0x67   : > { %s818_s7 = scalar_lea.vmem %s10522_s29, %s8869_s24  ;;  %v8403_v36 = vld [vmem:[#allocation2 + $0x1cc] sm:$0xf0]  ;;  %v6295_v39 = vld [vmem:[#allocation2 + $0x90] sm:$0xf0]  ;;  %v6342_v40 = vor.u32 %v8375_v34, %v6341_v31  ;;  %v6325_v42 = vld [vmem:[#allocation2 + $0xc0] sm:$0xf] }
  0x68   : > { %s813_s27 = scalar_lea.vmem %s10523_s2, %s8869_s24  ;;  %v8344_v0 = vld [vmem:[%s818_s7] sm:$0xff]  ;;  %v825_v1 = vld [vmem:[%s818_s7 + $0x8] sm:$0x1]  ;;  %1537 = vmatpush.bf16.msra.mxu1 %v6470_v30  ;;  %v6454_v41 = vor.u32 %v8403_v36, %v6453_v35  ;;  %s9643_s1 = smov 76   ;;  %v8371_v43 = vld [vmem:[#allocation2 + $0xcc] sm:$0xf0]  ;;  %v6298_v47 = vor.u32 %v8361_v38, %v6295_v39 }
  0x69   : > { %v9925_v2 = vld [vmem:[%s813_s27] sm:$0xff]  ;;  %v857_v3 = vunpack.c.l.b16 %v825_v1  ;;  %v822_v4 = vld [vmem:[%s813_s27 + $0x8] sm:$0x1]  ;;  %836 = vrot.lane.b32.xlu0 %v8344_v0, %s9641_s26  ;;  %v860_v7 = vshrl.u32 %v8344_v0, 16  ;;  %v862_v8 = vshll.u32 %v8344_v0, 16  ;;  %1580 = vmatpush.bf16.msra.mxu3 %v6330_v20  ;;  %v6326_v46 = vor.u32 %v8371_v43, %v6325_v42  ;;  %s9644_s25 = smov 32  }
  0x6a   : > { %v839_v9 = vunpack.c.l.b16 %v822_v4  ;;  %v843_v12 = vshrl.u32 %v9925_v2, 16  ;;  %v845_v13 = vshll.u32 %v9925_v2, 16  ;;  %v6437_v44 = vld [vmem:[#allocation2 + $0x1a0] sm:$0xf]  ;;  %v8399_v45 = vld [vmem:[#allocation2 + $0x1ac] sm:$0xf0]  ;;  %1523 = vmatpush.bf16.msra.mxu0 %v6342_v40 }
  0x6b   : > { %v858_v11 = vpack.c.b16 %v857_v3, %v857_v3  ;;  %v864_v16 = vrot.slane %v862_v8, 1  ;;  %v6309_v48 = vld [vmem:[#allocation2 + $0xa0] sm:$0xf]  ;;  %v8367_v49 = vld [vmem:[#allocation2 + $0xac] sm:$0xf0]  ;;  %v6438_v52 = vor.u32 %v8399_v45, %v6437_v44  ;;  %vm873_vm2 = vcmask 834560  }
  0x6c   : > { %v840_v17 = vpack.c.b16 %v839_v9, %v839_v9  ;;  %v847_v19 = vrot.slane %v845_v13, 1  ;;  %v8357_v50 = vld [vmem:[#allocation2 + $0x64] sm:$0xf]  ;;  %v6279_v51 = vld [vmem:[#allocation2 + $0x70] sm:$0xf0]  ;;  %1538 = vmatpush.bf16.msra.mxu1 %v6454_v41  ;;  %v6310_v57 = vor.u32 %v8367_v49, %v6309_v48  ;;  %vm877_vm3 = vcmask 621568  }
  0x6d   : > { %v867_v18 = vshll.u32 %v858_v11, 16  ;;  %v865_v22 = vor.u32 %v864_v16, %v860_v7  ;;  %1581 = vmatpush.bf16.msra.mxu3 %v6314_v33  ;;  %v6597_v53 = vld [vmem:[#allocation2 + $0x2e0] sm:$0xf]  ;;  %v8395_v55 = vld [vmem:[#allocation2 + $0x18c] sm:$0xf0]  ;;  %v6282_v60 = vor.u32 %v8357_v50, %v6279_v51  ;;  %vm881_vm4 = vcmask 408576  }
  0x6e   : > { %v850_v23 = vshll.u32 %v840_v17, 16  ;;  %v848_v27 = vor.u32 %v847_v19, %v843_v12  ;;  %v6421_v54 = vld [vmem:[#allocation2 + $0x180] sm:$0xf]  ;;  %v8439_v56 = vld [vmem:[#allocation2 + $0x2ec] sm:$0xf0]  ;;  %1524 = vmatpush.bf16.msra.mxu0 %v6326_v46  ;;  %vm1507_vm5 = vcmask 195584  }
  0x6f   : > { %v869_v26 = vrot.slane %v867_v18, 1  ;;  %v6598_v58 = vor.u32 %v8439_v56, %v6597_v53  ;;  %v6293_v59 = vld [vmem:[#allocation2 + $0x80] sm:$0xf]  ;;  %v8363_v61 = vld [vmem:[#allocation2 + $0x8c] sm:$0xf0]  ;;  %v6422_v3 = vor.u32 %v8395_v55, %v6421_v54  ;;  %vm1760_vm6 = vcmask 130048  }
  0x70   : > { %v852_v29 = vrot.slane %v850_v23, 1  ;;  %v6581_v62 = vld [vmem:[#allocation2 + $0x2c0] sm:$0xf]  ;;  %v8435_v63 = vld [vmem:[#allocation2 + $0x2cc] sm:$0xf0]  ;;  %1539 = vmatpush.bf16.msra.mxu1 %v6438_v52  ;;  %v6294_v7 = vor.u32 %v8363_v61, %v6293_v59  ;;  %vm1894_vm7 = vcmask 261120  }
  0x71   : > { %v870_v32 = vsel %vm841_vm0, %v865_v22, %v869_v26  ;;  %1582 = vmatpush.bf16.msra.mxu3 %v6298_v47  ;;  %v8353_v0 = vld [vmem:[#allocation2 + $0x44] sm:$0xf]  ;;  %v6263_v1 = vld [vmem:[#allocation2 + $0x50] sm:$0xf0]  ;;  %1551 = vmatpush.bf16.msra.mxu2 %v6598_v58  ;;  %v6582_v4 = vor.u32 %v8435_v63, %v6581_v62  ;;  %v6405_v5 = vld [vmem:[#allocation2 + $0x160] sm:$0xf] }
  0x72   : > { %871 = vrot.lane.b32.xlu1 %v870_v32, %s9642_s11  ;;  %v853_v37 = vsel %vm841_vm0, %v848_v27, %v852_v29  ;;  %v8391_v6 = vld [vmem:[#allocation2 + $0x16c] sm:$0xf0]  ;;  %1525 = vmatpush.bf16.msra.mxu0 %v6310_v57  ;;  %v6565_v8 = vld [vmem:[#allocation2 + $0x2a0] sm:$0xf]  ;;  %v6266_v10 = vor.u32 %v8353_v0, %v6263_v1  ;;  %v8349_v13 = vld [vmem:[#allocation2 + $0x24] sm:$0xf] }
  0x73   : > { %854 = vrot.lane.b32.xlu0 %v853_v37, %s9643_s1  ;;  %v8431_v9 = vld [vmem:[#allocation2 + $0x2ac] sm:$0xf0]  ;;  %v6277_v11 = vld [vmem:[#allocation2 + $0x60] sm:$0xf]  ;;  %v6247_v14 = vld [vmem:[#allocation2 + $0x30] sm:$0xf0]  ;;  %v6406_v15 = vor.u32 %v8391_v6, %v6405_v5  ;;  %s5967_s1 = scalar_lea.hbm %s10488_s18, %s9762_s0 }
  0x74   : > { %v8359_v12 = vld [vmem:[#allocation2 + $0x6c] sm:$0xf0]  ;;  %1540 = vmatpush.bf16.msra.mxu1 %v6422_v3  ;;  %v6389_v16 = vld [vmem:[#allocation2 + $0x140] sm:$0xf]  ;;  %v6566_v17 = vor.u32 %v8431_v9, %v6565_v8  ;;  %v6250_v22 = vor.u32 %v8349_v13, %v6247_v14  ;;  %v8345_v25 = vld [vmem:[#allocation2 + $0x4] sm:$0xf] }
  0x75   : > { %1583 = vmatpush.bf16.msra.mxu3 %v6282_v60  ;;  %1552 = vmatpush.bf16.msra.mxu2 %v6582_v4  ;;  %v8387_v18 = vld [vmem:[#allocation2 + $0x14c] sm:$0xf0]  ;;  %v6549_v19 = vld [vmem:[#allocation2 + $0x280] sm:$0xf]  ;;  %v6278_v21 = vor.u32 %v8359_v12, %v6277_v11  ;;  %v6231_v26 = vld [vmem:[#allocation2 + $0x10] sm:$0xf0] }
  0x76   : > { %v8427_v20 = vld [vmem:[#allocation2 + $0x28c] sm:$0xf0]  ;;  %1526 = vmatpush.bf16.msra.mxu0 %v6294_v7  ;;  %v6261_v23 = vld [vmem:[#allocation2 + $0x40] sm:$0xf]  ;;  %v6349_v27 = vld [vmem:[#allocation2 + $0xe8] sm:$0xf]  ;;  %v6390_v28 = vor.u32 %v8387_v18, %v6389_v16  ;;  %v6234_v37 = vor.u32 %v8345_v25, %v6231_v26 }
  0x77   : > { %v8355_v24 = vld [vmem:[#allocation2 + $0x4c] sm:$0xf0]  ;;  %v6550_v29 = vor.u32 %v8427_v20, %v6549_v19  ;;  %v8376_v30 = vld [vmem:[#allocation2 + $0xf4] sm:$0xf0]  ;;  %v6373_v31 = vld [vmem:[#allocation2 + $0x120] sm:$0xf] }
  0x78   : > { %1541 = vmatpush.bf16.msra.mxu1 %v6406_v15  ;;  %v8383_v32 = vld [vmem:[#allocation2 + $0x12c] sm:$0xf0]  ;;  %v6262_v33 = vor.u32 %v8355_v24, %v6261_v23  ;;  %v6533_v34 = vld [vmem:[#allocation2 + $0x260] sm:$0xf]  ;;  %v6333_v38 = vld [vmem:[#allocation2 + $0xc8] sm:$0xf]  ;;  %v6350_v41 = vor.u32 %v8376_v30, %v6349_v27 }
  0x79   : > { %1584 = vmatpush.bf16.msra.mxu3 %v6266_v10  ;;  %1553 = vmatpush.bf16.msra.mxu2 %v6566_v17  ;;  %v8423_v35 = vld [vmem:[#allocation2 + $0x26c] sm:$0xf0]  ;;  %v9931_v36 = vld [vmem:[#allocation2 + $0x320] sm:$0xff]  ;;  %v8372_v42 = vld [vmem:[#allocation2 + $0xd4] sm:$0xf0]  ;;  %v6374_v43 = vor.u32 %v8383_v32, %v6373_v31  ;;  %s9645_s30 = smov 64  }
  0x7a   : > { %1527 = vmatpush.bf16.msra.mxu0 %v6278_v21  ;;  %v6245_v39 = vld [vmem:[#allocation2 + $0x20] sm:$0xf]  ;;  %v8351_v40 = vld [vmem:[#allocation2 + $0x2c] sm:$0xf0]  ;;  %v1299_v46 = vunpack.c.l.b16 %v9931_v36  ;;  %v6534_v47 = vor.u32 %v8423_v35, %v6533_v34  ;;  %v8437_v48 = vld [vmem:[#allocation2 + $0x2e4] sm:$0xf]  ;;  %v6334_v55 = vor.u32 %v8372_v42, %v6333_v38 }
  0x7b   : > { %v6357_v44 = vld [vmem:[#allocation2 + $0x100] sm:$0xf]  ;;  %v8379_v45 = vld [vmem:[#allocation2 + $0x10c] sm:$0xf0]  ;;  %v6246_v49 = vor.u32 %v8351_v40, %v6245_v39  ;;  %v6599_v50 = vld [vmem:[#allocation2 + $0x2f0] sm:$0xf0] }
  0x7c   : > { %1542 = vmatpush.bf16.msra.mxu1 %v6390_v28  ;;  %v6517_v51 = vld [vmem:[#allocation2 + $0x240] sm:$0xf]  ;;  %v8419_v52 = vld [vmem:[#allocation2 + $0x24c] sm:$0xf0]  ;;  %v6317_v56 = vld [vmem:[#allocation2 + $0xa8] sm:$0xf]  ;;  %v6358_v57 = vor.u32 %v8379_v45, %v6357_v44  ;;  %v1403_v58 = vpack.c.b16 %v1299_v46, %v1299_v46  ;;  %v6602_v60 = vor.u32 %v8437_v48, %v6599_v50  ;;  %v1300_v28 = vunpack.c.h.b16 %v9931_v36 }
  0x7d   : > { %1585 = vmatpush.bf16.msra.mxu3 %v6250_v22  ;;  %1554 = vmatpush.bf16.msra.mxu2 %v6550_v29  ;;  %v6229_v53 = vld [vmem:[#allocation2] sm:$0xf]  ;;  %v8347_v54 = vld [vmem:[#allocation2 + $0xc] sm:$0xf0]  ;;  %v8368_v59 = vld [vmem:[#allocation2 + $0xb4] sm:$0xf0]  ;;  %v6518_v61 = vor.u32 %v8419_v52, %v6517_v51 }
  0x7e   : > { %1528 = vmatpush.bf16.msra.mxu0 %v6262_v33  ;;  %v8433_v62 = vld [vmem:[#allocation2 + $0x2c4] sm:$0xf]  ;;  %v6230_v63 = vor.u32 %v8347_v54, %v6229_v53  ;;  %v6583_v0 = vld [vmem:[#allocation2 + $0x2d0] sm:$0xf0]  ;;  %v6501_v1 = vld [vmem:[#allocation2 + $0x220] sm:$0xf]  ;;  %v6318_v4 = vor.u32 %v8368_v59, %v6317_v56  ;;  %v1404_v35 = vpack.c.b16 %v1300_v28, %v1300_v28 }
  0x7f   : > { %v8415_v3 = vld [vmem:[#allocation2 + $0x22c] sm:$0xf0]  ;;  %v1512_v5 = vsel %vm1510_vm1, %v1403_v58, 0  ;;  %v6301_v6 = vld [vmem:[#allocation2 + $0x88] sm:$0xf]  ;;  %v6586_v8 = vor.u32 %v8433_v62, %v6583_v0  ;;  %vm1967_vm8 = vcmask 1040384  }
  0x80   : > { %1543 = vmatpush.bf16.msra.mxu1 %v6374_v43  ;;  %v8364_v7 = vld [vmem:[#allocation2 + $0x94] sm:$0xf0]  ;;  %v6502_v9 = vor.u32 %v8415_v3, %v6501_v1  ;;  %v6285_v11 = vld [vmem:[#allocation2 + $0x68] sm:$0xf]  ;;  %v6613_v20 = vld [vmem:[#allocation2 + $0x300] sm:$0xf] }
  0x81   : > { %1586 = vmatpush.bf16.msra.mxu3 %v6234_v37  ;;  %1555 = vmatpush.bf16.msra.mxu2 %v6534_v47  ;;  %v6302_v10 = vor.u32 %v8364_v7, %v6301_v6  ;;  %v8360_v12 = vld [vmem:[#allocation2 + $0x74] sm:$0xf0]  ;;  %v6269_v14 = vld [vmem:[#allocation2 + $0x48] sm:$0xf]  ;;  %v8443_v21 = vld [vmem:[#allocation2 + $0x30c] sm:$0xf0] }
  0x82   : > { %1529 = vmatpush.bf16.msra.mxu0 %v6246_v49  ;;  %v6286_v13 = vor.u32 %v8360_v12, %v6285_v11  ;;  %v8356_v15 = vld [vmem:[#allocation2 + $0x54] sm:$0xf0]  ;;  %v6253_v17 = vld [vmem:[#allocation2 + $0x28] sm:$0xf]  ;;  %v8429_v22 = vld [vmem:[#allocation2 + $0x2a4] sm:$0xf]  ;;  %v6614_v23 = vor.u32 %v8443_v21, %v6613_v20 }
  0x83   : > { %v6270_v16 = vor.u32 %v8356_v15, %v6269_v14  ;;  %v8352_v18 = vld [vmem:[#allocation2 + $0x34] sm:$0xf0]  ;;  %v6567_v24 = vld [vmem:[#allocation2 + $0x2b0] sm:$0xf0]  ;;  %v6237_v26 = vld [vmem:[#allocation2 + $0x8] sm:$0xf] }
  0x84   : > { %1544 = vmatpush.bf16.msra.mxu1 %v6358_v57  ;;  %v6254_v19 = vor.u32 %v8352_v18, %v6253_v17  ;;  %v6570_v25 = vor.u32 %v8429_v22, %v6567_v24  ;;  %v8348_v27 = vld [vmem:[#allocation2 + $0x14] sm:$0xf0]  ;;  %v6485_v30 = vld [vmem:[#allocation2 + $0x200] sm:$0xf]  ;;  %v8411_v31 = vld [vmem:[#allocation2 + $0x20c] sm:$0xf0] }
  0x85   : > { %1635 = vmatpush.bf16.msrb.mxu3 %v6350_v41  ;;  %1556 = vmatpush.bf16.msra.mxu2 %v6518_v61  ;;  %v6238_v29 = vor.u32 %v8348_v27, %v6237_v26  ;;  %v6486_v32 = vor.u32 %v8411_v31, %v6485_v30  ;;  %v8425_v33 = vld [vmem:[#allocation2 + $0x284] sm:$0xf]  ;;  %v6551_v34 = vld [vmem:[#allocation2 + $0x290] sm:$0xf0]  ;;  %v1515_v38 = vsel %vm1510_vm1, %v1404_v35, 0  ;;  %vm1998_vm11 = vcmask 523264  }
  0x86   : > { %1530 = vmatpush.bf16.msra.mxu0 %v6230_v63  ;;  %v6554_v37 = vor.u32 %v8425_v33, %v6551_v34  ;;  %v8421_v39 = vld [vmem:[#allocation2 + $0x264] sm:$0xf]  ;;  %v6535_v40 = vld [vmem:[#allocation2 + $0x270] sm:$0xf0]  ;;  %v6351_v56 = vld [vmem:[#allocation2 + $0xf8] sm:$0xf0] }
  0x87   : > { %v8441_v41 = vld [vmem:[#allocation2 + $0x304] sm:$0xf]  ;;  %v6538_v36 = vor.u32 %v8421_v39, %v6535_v40  ;;  %v6615_v42 = vld [vmem:[#allocation2 + $0x310] sm:$0xf0]  ;;  %v8370_v63 = vld [vmem:[#allocation2 + $0xcc] sm:$0xf] }
  0x88   : > { %1607 = vmatpush.bf16.msrb.mxu1 %v6602_v60  ;;  %v6618_v43 = vor.u32 %v8441_v41, %v6615_v42  ;;  %v8417_v44 = vld [vmem:[#allocation2 + $0x244] sm:$0xf]  ;;  %v6519_v45 = vld [vmem:[#allocation2 + $0x250] sm:$0xf0]  ;;  %v9937_v60 = vld [vmem:[#allocation2 + $0x328] sm:$0xff]  ;;  %vm4309_vm12 = vcmask 64512  }
  0x89   : > { %1636 = vmatpush.bf16.msrb.mxu3 %v6334_v55  ;;  %1557 = vmatpush.bf16.msra.mxu2 %v6502_v9  ;;  %v6522_v46 = vor.u32 %v8417_v44, %v6519_v45  ;;  %v8413_v47 = vld [vmem:[#allocation2 + $0x224] sm:$0xf]  ;;  %v6503_v48 = vld [vmem:[#allocation2 + $0x230] sm:$0xf0]  ;;  %v8374_v55 = vld [vmem:[#allocation2 + $0xec] sm:$0xf]  ;;  %v1301_v3 = vunpack.c.l.b16 %v9937_v60 }
  0x8a   : > { %1571 = vmatpush.bf16.msrb.mxu0 %v1512_v5  ;;  %v6506_v49 = vor.u32 %v8413_v47, %v6503_v48  ;;  %v8409_v50 = vld [vmem:[#allocation2 + $0x204] sm:$0xf]  ;;  %v6487_v51 = vld [vmem:[#allocation2 + $0x210] sm:$0xf0]  ;;  %v6354_v58 = vor.u32 %v8374_v55, %v6351_v56  ;;  %v6335_v0 = vld [vmem:[#allocation2 + $0xd8] sm:$0xf0] }
  0x8b   : > { %v6490_v52 = vor.u32 %v8409_v50, %v6487_v51  ;;  %v8405_v53 = vld [vmem:[#allocation2 + $0x1e4] sm:$0xf]  ;;  %v6471_v54 = vld [vmem:[#allocation2 + $0x1f0] sm:$0xf0]  ;;  %v6338_v5 = vor.u32 %v8370_v63, %v6335_v0  ;;  %v8408_v9 = vld [vmem:[#allocation2 + $0x1f4] sm:$0xf0]  ;;  %v1405_v12 = vpack.c.b16 %v1301_v3, %v1301_v3 }
  0x8c   : > { %1608 = vmatpush.bf16.msrb.mxu1 %v6586_v8  ;;  %v6474_v57 = vor.u32 %v8405_v53, %v6471_v54  ;;  %v8401_v59 = vld [vmem:[#allocation2 + $0x1c4] sm:$0xf]  ;;  %v6455_v62 = vld [vmem:[#allocation2 + $0x1d0] sm:$0xf0]  ;;  %v6477_v8 = vld [vmem:[#allocation2 + $0x1e8] sm:$0xf] }
  0x8d   : > { %1637 = vmatpush.bf16.msrb.mxu3 %v6318_v4  ;;  %1558 = vmatpush.bf16.msra.mxu2 %v6486_v32  ;;  %v6458_v4 = vor.u32 %v8401_v59, %v6455_v62  ;;  %v8397_v6 = vld [vmem:[#allocation2 + $0x1a4] sm:$0xf]  ;;  %v6439_v7 = vld [vmem:[#allocation2 + $0x1b0] sm:$0xf0]  ;;  %v6319_v11 = vld [vmem:[#allocation2 + $0xb8] sm:$0xf0]  ;;  %v6478_v14 = vor.u32 %v8408_v9, %v6477_v8 }
  0x8e   : > { %1572 = vmatpush.bf16.msrb.mxu0 %v6614_v23  ;;  %v8393_v15 = vld [vmem:[#allocation2 + $0x184] sm:$0xf]  ;;  %v6461_v17 = vld [vmem:[#allocation2 + $0x1c8] sm:$0xf]  ;;  %v8404_v20 = vld [vmem:[#allocation2 + $0x1d4] sm:$0xf0] }
  0x8f   : > { %v8362_v21 = vld [vmem:[#allocation2 + $0x8c] sm:$0xf]  ;;  %v6303_v22 = vld [vmem:[#allocation2 + $0x98] sm:$0xf0]  ;;  %v6621_v26 = vld [vmem:[#allocation2 + $0x308] sm:$0xf] }
  0x90   : > { %1609 = vmatpush.bf16.msrb.mxu1 %v6570_v25  ;;  %v1518_v25 = vsel %vm1510_vm1, %v1405_v12, 0  ;;  %v8444_v27 = vld [vmem:[#allocation2 + $0x314] sm:$0xf0]  ;;  %v8389_v30 = vld [vmem:[#allocation2 + $0x164] sm:$0xf]  ;;  %v6306_v31 = vor.u32 %v8362_v21, %v6303_v22  ;;  %vm4430_vm13 = vcmask 1041408  }
  0x91   : > { %1638 = vmatpush.bf16.msrb.mxu3 %v6302_v10  ;;  %1627 = vmatpush.bf16.msrb.mxu2 %v1515_v38  ;;  %v8366_v10 = vld [vmem:[#allocation2 + $0xac] sm:$0xf]  ;;  %v6407_v32 = vld [vmem:[#allocation2 + $0x170] sm:$0xf0]  ;;  %v6445_v33 = vld [vmem:[#allocation2 + $0x1a8] sm:$0xf]  ;;  %v6622_v35 = vor.u32 %v8444_v27, %v6621_v26 }
  0x92   : > { %v8400_v34 = vld [vmem:[#allocation2 + $0x1b4] sm:$0xf0]  ;;  %v6287_v38 = vld [vmem:[#allocation2 + $0x78] sm:$0xf0]  ;;  %v6410_v39 = vor.u32 %v8389_v30, %v6407_v32  ;;  %v8385_v41 = vld [vmem:[#allocation2 + $0x144] sm:$0xf] }
  0x93   : > { %v6446_v40 = vor.u32 %v8400_v34, %v6445_v33  ;;  %v6391_v42 = vld [vmem:[#allocation2 + $0x150] sm:$0xf0]  ;;  %v8396_v44 = vld [vmem:[#allocation2 + $0x194] sm:$0xf0]  ;;  %v8354_v45 = vld [vmem:[#allocation2 + $0x4c] sm:$0xf] }
  0x94   : > { %1610 = vmatpush.bf16.msrb.mxu1 %v6554_v37  ;;  %v8358_v37 = vld [vmem:[#allocation2 + $0x6c] sm:$0xf]  ;;  %v6394_v47 = vor.u32 %v8385_v41, %v6391_v42  ;;  %v6375_v50 = vld [vmem:[#allocation2 + $0x130] sm:$0xf0]  ;;  %v8392_v53 = vld [vmem:[#allocation2 + $0x174] sm:$0xf0] }
  0x95   : > { %1639 = vmatpush.bf16.msrb.mxu3 %v6286_v13  ;;  %1628 = vmatpush.bf16.msrb.mxu2 %v6618_v43  ;;  %v6442_v13 = vor.u32 %v8397_v6, %v6439_v7  ;;  %v6429_v43 = vld [vmem:[#allocation2 + $0x188] sm:$0xf]  ;;  %v8350_v54 = vld [vmem:[#allocation2 + $0x2c] sm:$0xf]  ;;  %v6255_v55 = vld [vmem:[#allocation2 + $0x38] sm:$0xf0] }
  0x96   : > { %v6430_v48 = vor.u32 %v8396_v44, %v6429_v43  ;;  %v8406_v56 = vld [vmem:[#allocation2 + $0x1ec] sm:$0xf]  ;;  %v6359_v62 = vld [vmem:[#allocation2 + $0x110] sm:$0xf0]  ;;  %v6258_v63 = vor.u32 %v8350_v54, %v6255_v55  ;;  %v6397_v3 = vld [vmem:[#allocation2 + $0x148] sm:$0xf] }
  0x97   : > { %v8440_v6 = vld [vmem:[#allocation2 + $0x2f4] sm:$0xf0]  ;;  %v8346_v7 = vld [vmem:[#allocation2 + $0xc] sm:$0xf]  ;;  %v6239_v8 = vld [vmem:[#allocation2 + $0x18] sm:$0xf0] }
  0x98   : > { %1611 = vmatpush.bf16.msrb.mxu1 %v6538_v36  ;;  %v6290_v36 = vor.u32 %v8358_v37, %v6287_v38  ;;  %v8402_v9 = vld [vmem:[#allocation2 + $0x1cc] sm:$0xf]  ;;  %v6447_v21 = vld [vmem:[#allocation2 + $0x1b8] sm:$0xf0]  ;;  %v6365_v26 = vld [vmem:[#allocation2 + $0x108] sm:$0xf] }
  0x99   : > { %1640 = vmatpush.bf16.msrb.mxu3 %v6270_v16  ;;  %v6423_v16 = vld [vmem:[#allocation2 + $0x190] sm:$0xf0]  ;;  %v8380_v27 = vld [vmem:[#allocation2 + $0x114] sm:$0xf0]  ;;  %v6607_v32 = vld [vmem:[#allocation2 + $0x2f8] sm:$0xf0] }
  0x9a   : > { %v6426_v28 = vor.u32 %v8393_v15, %v6423_v16  ;;  %v6381_v15 = vld [vmem:[#allocation2 + $0x128] sm:$0xf]  ;;  %v8384_v16 = vld [vmem:[#allocation2 + $0x134] sm:$0xf0]  ;;  %v8394_v33 = vld [vmem:[#allocation2 + $0x18c] sm:$0xf] }
  0x9b   : > { %v6382_v22 = vor.u32 %v8384_v16, %v6381_v15  ;;  %v8432_v30 = vld [vmem:[#allocation2 + $0x2b4] sm:$0xf0]  ;;  %v6431_v34 = vld [vmem:[#allocation2 + $0x198] sm:$0xf0]  ;;  %v8390_v43 = vld [vmem:[#allocation2 + $0x16c] sm:$0xf] }
  0x9c   : > { %1612 = vmatpush.bf16.msrb.mxu1 %v6522_v46  ;;  %v6271_v46 = vld [vmem:[#allocation2 + $0x58] sm:$0xf0]  ;;  %v8428_v41 = vld [vmem:[#allocation2 + $0x294] sm:$0xf0]  ;;  %v6525_v55 = vld [vmem:[#allocation2 + $0x248] sm:$0xf] }
  0x9d   : > { %1641 = vmatpush.bf16.msrb.mxu3 %v6254_v19  ;;  %v6322_v19 = vor.u32 %v8366_v10, %v6319_v11  ;;  %v6274_v51 = vor.u32 %v8354_v45, %v6271_v46  ;;  %v6463_v10 = vld [vmem:[#allocation2 + $0x1d8] sm:$0xf0]  ;;  %v8412_v15 = vld [vmem:[#allocation2 + $0x214] sm:$0xf0]  ;;  %v8418_v16 = vld [vmem:[#allocation2 + $0x24c] sm:$0xf] }
  0x9e   : > { %v6591_v42 = vld [vmem:[#allocation2 + $0x2d8] sm:$0xf0]  ;;  %vm1968_vm9 = vsmask.f32 256  ;;  %vm5283_vm14 = vcmask 31744   ;;  %s807_s2 = sand.u32 1, %s9610_s28  }
  0x9f   : > { %v6415_v44 = vld [vmem:[#allocation2 + $0x178] sm:$0xf0]  ;;  %vm10045_vm10 = vmand %vm1967_vm8, %vm1968_vm9  ;;  %s5971_s9 = sshll.u32 %s5967_s1, 4  ;;  %s9544_s0 = scalar_lea.hbm %s10488_s18, 2  ;;  %s5972_s9 = int_to_ptr.hbm [resolvable:$true] %s5971_s9 }
  0xa0   : > { %1613 = vmatpush.bf16.msrb.mxu1 %v6506_v49  ;;  %v8381_v49 = vld [vmem:[#allocation2 + $0x124] sm:$0xf]  ;;  %s9538_s21 = sshra.s32 %s5972_s9, 4  ;;  %s9539_s21 = int_to_ptr.hbm [resolvable:$true] %s9538_s21 }
  0xa1   : > { %1642 = vmatpush.bf16.msrb.mxu3 %v6238_v29  ;;  %v6462_v29 = vor.u32 %v8404_v20, %v6461_v17  ;;  %v6466_v17 = vor.u32 %v8402_v9, %v6463_v10  ;;  %v8398_v20 = vld [vmem:[#allocation2 + $0x1ac] sm:$0xf]  ;;  %v6367_v9 = vld [vmem:[#allocation2 + $0x118] sm:$0xf0]  ;;  %v1302_v10 = vunpack.c.h.b16 %v9937_v60  ;;  %s9540_s23 = scalar_lea.hbm %s9539_s21, 1  ;;  %p9545_p3 = scmp.lt.s32.totalorder %s9539_s21, %s10488_s18 }
  0xa2   : > { %p9541_p0 = scmp.ne.s32.totalorder %s9539_s21, %s9540_s23  ;;  %p9546_p4 = scmp.lt.s32.totalorder %s9544_s0, %s9540_s23 }
  0xa4   : > { %1614 = vmatpush.bf16.msrb.mxu1 %v6490_v52  ;;  %v6413_v52 = vld [vmem:[#allocation2 + $0x168] sm:$0xf]  ;;  %p9542_p1 = pnand %p9541_p0, %p9779_p5  ;;  %p9547_p7 = por %p9546_p4, %p9545_p3 }
  0xa5   : > { %v6414_v59 = vor.u32 %v8392_v53, %v6413_v52  ;;  %v6399_v52 = vld [vmem:[#allocation2 + $0x158] sm:$0xf0] }
  0xa6   : > { %p9543_p2 = pneg %p9542_p1 }
  0xa8   : > { %p9548_p8 = pnand %p9547_p7, %p9543_p2 }
  0xdb   : > { %v837_v61 = vpop.permute.xlu0 %836 }
  0xdc   : > { %v9940_v1 = vsel %vm873_vm2, %v9925_v2, %v837_v61 }
  0xdd   : > { %1531 = vmatmul.bf16.vlgmr.msra.gmra.mxu0 %v9940_v1  ;;  %1587 = vmatmul.bf16.vlgmr.msra.gmra.mxu3 %v9940_v1 }
  0xde   : > { %1593 = vmatpush.bf16.msra.mxu0 %v6474_v57  ;;  %1691 = vmatpush.bf16.msra.mxu3 %v6354_v58  ;;  %v6479_v57 = vld [vmem:[#allocation2 + $0x1f8] sm:$0xf0]  ;;  %v6378_v58 = vor.u32 %v8381_v49, %v6375_v50  ;;  %v8430_v49 = vld [vmem:[#allocation2 + $0x2ac] sm:$0xf] }
  0xdf   : > { %v6482_v0 = vor.u32 %v8406_v56, %v6479_v57  ;;  %v6575_v50 = vld [vmem:[#allocation2 + $0x2b8] sm:$0xf0]  ;;  %v8420_v57 = vld [vmem:[#allocation2 + $0x254] sm:$0xf0] }
  0xe0   : > { %v6578_v54 = vor.u32 %v8430_v49, %v6575_v50 }
  0xe2   : > { %1594 = vmatpush.bf16.msra.mxu0 %v6458_v4  ;;  %1692 = vmatpush.bf16.msra.mxu3 %v6338_v5  ;;  %v8388_v4 = vld [vmem:[#allocation2 + $0x154] sm:$0xf0]  ;;  %v6605_v5 = vld [vmem:[#allocation2 + $0x2e8] sm:$0xf] }
  0xe3   : > { %v6398_v12 = vor.u32 %v8388_v4, %v6397_v3  ;;  %v6509_v3 = vld [vmem:[#allocation2 + $0x228] sm:$0xf] }
  0xe4   : > { %v9945_v2 = vpop.permute.xlu1 %871 }
  0xe5   : > { %v855_v18 = vpop.permute.xlu0 %854 }
  0xe6   : > { %v9947_v23 = vsel %vm877_vm3, %v837_v61, %v855_v18  ;;  %v9950_v24 = vsel %vm881_vm4, %v855_v18, %v9945_v2  ;;  %1595 = vmatpush.bf16.msra.mxu0 %v6442_v13  ;;  %1693 = vmatpush.bf16.msra.mxu3 %v6322_v19  ;;  %v8377_v61 = vld [vmem:[#allocation2 + $0x104] sm:$0xf]  ;;  %v6606_v13 = vor.u32 %v8440_v6, %v6605_v5  ;;  %v6589_v18 = vld [vmem:[#allocation2 + $0x2c8] sm:$0xf]  ;;  %v8436_v19 = vld [vmem:[#allocation2 + $0x2d4] sm:$0xf0] }
  0xe7   : > { %1545 = vmatmul.bf16.vlgmr.msra.gmra.mxu1 %v9947_v23  ;;  %1559 = vmatmul.bf16.vlgmr.msra.gmra.mxu2 %v9950_v24  ;;  %v6362_v11 = vor.u32 %v8377_v61, %v6359_v62  ;;  %v8382_v61 = vld [vmem:[#allocation2 + $0x12c] sm:$0xf]  ;;  %v6383_v62 = vld [vmem:[#allocation2 + $0x138] sm:$0xf0]  ;;  %v8416_v5 = vld [vmem:[#allocation2 + $0x234] sm:$0xf0] }
  0xe8   : > { %1649 = vmatpush.bf16.msra.mxu2 %v6478_v14  ;;  %1683 = vmatpush.bf16.msra.mxu1 %v1518_v25  ;;  %v6242_v14 = vor.u32 %v8346_v7, %v6239_v8  ;;  %v6590_v25 = vor.u32 %v8436_v19, %v6589_v18  ;;  %v6386_v4 = vor.u32 %v8382_v61, %v6383_v62  ;;  %v8422_v6 = vld [vmem:[#allocation2 + $0x26c] sm:$0xf]  ;;  %v6543_v7 = vld [vmem:[#allocation2 + $0x278] sm:$0xf0] }
  0xe9   : > { %v8378_v8 = vld [vmem:[#allocation2 + $0x10c] sm:$0xf]  ;;  %v1406_v18 = vpack.c.b16 %v1302_v10, %v1302_v10 }
  0xea   : > { %1596 = vmatpush.bf16.msra.mxu0 %v6426_v28  ;;  %1694 = vmatpush.bf16.msra.mxu3 %v6306_v31  ;;  %v6573_v28 = vld [vmem:[#allocation2 + $0x2a8] sm:$0xf]  ;;  %v8438_v31 = vld [vmem:[#allocation2 + $0x2ec] sm:$0xf] }
  0xeb   : > { %v6574_v37 = vor.u32 %v8432_v30, %v6573_v28  ;;  %v6610_v38 = vor.u32 %v8438_v31, %v6607_v32  ;;  %v1521_v60 = vsel %vm1510_vm1, %v1406_v18, 0  ;;  %v6495_v30 = vld [vmem:[#allocation2 + $0x218] sm:$0xf0]  ;;  %v1818_v18 = vld [vmem:[#allocation8] sm:$0xf] }
  0xec   : > { %1650 = vmatpush.bf16.msra.mxu2 %v6462_v29  ;;  %1684 = vmatpush.bf16.msra.mxu1 %v6622_v35  ;;  %v6450_v29 = vor.u32 %v8398_v20, %v6447_v21  ;;  %v6366_v35 = vor.u32 %v8380_v27, %v6365_v26  ;;  %v8414_v21 = vld [vmem:[#allocation2 + $0x22c] sm:$0xf]  ;;  %v6623_v26 = vld [vmem:[#allocation2 + $0x318] sm:$0xf0] }
  0xed   : > { %6627 = vmatmul.msk.bf16.vlgmr.msrb.gmra.mxu0 %vm1507_vm5, %v9945_v2  ;;  %1643 = vmatmul.bf16.vlgmr.msrb.gmra.mxu3 %v9940_v1 }
  0xee   : > { %1597 = vmatpush.bf16.msra.mxu0 %v6410_v39  ;;  %1695 = vmatpush.bf16.msra.mxu3 %v6290_v36  ;;  %v6557_v39 = vld [vmem:[#allocation2 + $0x288] sm:$0xf]  ;;  %v8434_v36 = vld [vmem:[#allocation2 + $0x2cc] sm:$0xf] }
  0xef   : > { %v6558_v45 = vor.u32 %v8428_v41, %v6557_v39  ;;  %v6594_v46 = vor.u32 %v8434_v36, %v6591_v42 }
  0xf0   : > { %1651 = vmatpush.bf16.msra.mxu2 %v6446_v40  ;;  %v6434_v40 = vor.u32 %v8394_v33, %v6431_v34  ;;  %v9973_v33 = vld [vmem:[#allocation5] sm:$0xf] }
  0xf1   : > { %v990_v49 = vperm.slane %v9973_v33, 1 }
  0xf2   : > { %1598 = vmatpush.bf16.msra.mxu0 %v6394_v47  ;;  %1696 = vmatpush.bf16.msra.mxu3 %v6274_v51  ;;  %v6541_v47 = vld [vmem:[#allocation2 + $0x268] sm:$0xf]  ;;  %v8386_v51 = vld [vmem:[#allocation2 + $0x14c] sm:$0xf] }
  0xf3   : > { %v6402_v56 = vor.u32 %v8386_v51, %v6399_v52  ;;  %v9977_v52 = vld [vmem:[#allocation7] sm:$0xf] }
  0xf4   : > { %1652 = vmatpush.bf16.msra.mxu2 %v6430_v48  ;;  %v8424_v48 = vld [vmem:[#allocation2 + $0x274] sm:$0xf0] }
  0xf5   : > { %v6542_v53 = vor.u32 %v8424_v48, %v6541_v47 }
  0xf6   : > { %1599 = vmatpush.bf16.msra.mxu0 %v6378_v58  ;;  %1697 = vmatpush.bf16.msra.mxu3 %v6258_v63  ;;  %v8426_v58 = vld [vmem:[#allocation2 + $0x28c] sm:$0xf]  ;;  %v6526_v63 = vor.u32 %v8420_v57, %v6525_v55 }
  0xf7   : > { %1615 = vmatmul.bf16.vlgmr.msrb.gmra.mxu1 %v9950_v24  ;;  %6628 = vmatmul.msk.bf16.vlgmr.msrb.gmra.mxu2 %vm1507_vm5, %v9945_v2 }
  0xf8   : > { %1653 = vmatpush.bf16.msra.mxu2 %v6414_v59  ;;  %1705 = vmatpush.bf16.msrb.mxu1 %v6482_v0  ;;  %v6559_v59 = vld [vmem:[#allocation2 + $0x298] sm:$0xf0] }
  0xf9   : > { %v6562_v0 = vor.u32 %v8426_v58, %v6559_v59 }
  0xfa   : > { %1600 = vmatpush.bf16.msra.mxu0 %v6362_v11  ;;  %1698 = vmatpush.bf16.msra.mxu3 %v6242_v14  ;;  %v6510_v11 = vor.u32 %v8416_v5, %v6509_v3  ;;  %v6493_v14 = vld [vmem:[#allocation2 + $0x208] sm:$0xf] }
  0xfb   : > { %v6494_v19 = vor.u32 %v8412_v15, %v6493_v14 }
  0xfc   : > { %1654 = vmatpush.bf16.msra.mxu2 %v6398_v12  ;;  %1706 = vmatpush.bf16.msrb.mxu1 %v6466_v17  ;;  %v6546_v12 = vor.u32 %v8422_v6, %v6543_v7  ;;  %v6527_v17 = vld [vmem:[#allocation2 + $0x258] sm:$0xf0] }
  0xfd   : > { %1601 = vmatmul.bf16.vlgmr.msra.gmra.mxu0 %v9947_v23  ;;  %1699 = vmatmul.bf16.vlgmr.msra.gmra.mxu3 %v9940_v1  ;;  %v6418_v1 = vor.u32 %v8390_v43, %v6415_v44  ;;  %v6530_v20 = vor.u32 %v8418_v16, %v6527_v17 }
  0xfe   : > { %1663 = vmatpush.bf16.msrb.mxu0 %v6606_v13  ;;  %v6370_v13 = vor.u32 %v8378_v8, %v6367_v9 }
 0x100   : > { %1655 = vmatpush.bf16.msra.mxu2 %v6382_v22  ;;  %1707 = vmatpush.bf16.msrb.mxu1 %v6450_v29  ;;  %v6511_v22 = vld [vmem:[#allocation2 + $0x238] sm:$0xf0]  ;;  %v8410_v29 = vld [vmem:[#allocation2 + $0x20c] sm:$0xf] }
 0x101   : > { %v6514_v27 = vor.u32 %v8414_v21, %v6511_v22  ;;  %v6498_v31 = vor.u32 %v8410_v29, %v6495_v30  ;;  %v992_v30 = vperm.slane %v9973_v33, 3 }
 0x102   : > { %1664 = vmatpush.bf16.msrb.mxu0 %v6590_v25  ;;  %v8442_v25 = vld [vmem:[#allocation2 + $0x30c] sm:$0xf] }
 0x103   : > { %v6626_v28 = vor.u32 %v8442_v25, %v6623_v26 }
 0x104   : > { %1656 = vmatpush.bf16.msra.mxu2 %v6366_v35  ;;  %1708 = vmatpush.bf16.msrb.mxu1 %v6434_v40  ;;  %v989_v35 = vperm.slane %v9973_v33, 0 }
 0x106   : > { %1665 = vmatpush.bf16.msrb.mxu0 %v6574_v37 }
 0x107   : > { %1657 = vmatmul.bf16.vlgmr.msra.gmra.mxu2 %v9947_v23  ;;  %6629 = vmatmul.msk.bf16.vlgmr.msra.gmra.mxu1 %vm1507_vm5, %v9945_v2 }
 0x108   : > { %1719 = vmatpush.bf16.msrb.mxu2 %v6610_v38  ;;  %1709 = vmatpush.bf16.msrb.mxu1 %v6418_v1 }
 0x10a   : > { %1666 = vmatpush.bf16.msrb.mxu0 %v6558_v45 }
 0x10c   : > { %1720 = vmatpush.bf16.msrb.mxu2 %v6594_v46  ;;  %1710 = vmatpush.bf16.msrb.mxu1 %v6402_v56 }
 0x10e   : > { %1667 = vmatpush.bf16.msrb.mxu0 %v6542_v53 }
 0x110   : > { %1721 = vmatpush.bf16.msrb.mxu2 %v6578_v54  ;;  %1711 = vmatpush.bf16.msrb.mxu1 %v6386_v4 }
 0x112   : > { %1668 = vmatpush.bf16.msrb.mxu0 %v6526_v63 }
 0x114   : > { %1722 = vmatpush.bf16.msrb.mxu2 %v6562_v0  ;;  %1712 = vmatpush.bf16.msrb.mxu1 %v6370_v13 }
 0x116   : > { %1669 = vmatpush.bf16.msrb.mxu0 %v6510_v11 }
 0x117   : > { %1713 = vmatmul.bf16.vlgmr.msrb.gmra.mxu1 %v9947_v23 }
 0x118   : > { %1723 = vmatpush.bf16.msrb.mxu2 %v6546_v12  ;;  %v991_v12 = vperm.slane %v9973_v33, 2 }
 0x11a   : > { %1670 = vmatpush.bf16.msrb.mxu0 %v6494_v19 }
 0x11c   : > { %1724 = vmatpush.bf16.msrb.mxu2 %v6530_v20 }
 0x11d   : > { %1671 = vmatmul.bf16.vlgmr.msrb.gmra.mxu0 %v9950_v24 }
 0x11e   : > { %1739 = vmatpush.bf16.msra.mxu0 %v1521_v60 }
 0x120   : > { %1725 = vmatpush.bf16.msrb.mxu2 %v6514_v27 }
 0x122   : > { %1740 = vmatpush.bf16.msra.mxu0 %v6626_v28 }
 0x124   : > { %1726 = vmatpush.bf16.msrb.mxu2 %v6498_v31 }
 0x127   : > { %1727 = vmatmul.bf16.vlgmr.msrb.gmra.mxu2 %v9950_v24 }
 0x12d   : > { %6630 = vmatmul.msk.bf16.vlgmr.msra.gmra.mxu0 %vm1507_vm5, %v9945_v2 }
 0x15a   : > { %v1532_v32 = vpop.f32.mrf.mxu0 }
 0x15b   : > { %v1533_v38 = vadd.f32 %v1532_v32, %v989_v35 }
 0x160   : > { %v1588_v47 = vpop.f32.mrf.mxu3 }
 0x161   : > { %v1589_v54 = vadd.f32 %v1588_v47, %v990_v49 }
 0x162   : > { %v1534_v23 = vpop.f32.mrf.mxu0 }
 0x163   : > { %v1535_v36 = vadd.f32 %v1534_v23, %v989_v35 }
 0x164   : > { %v1546_v34 = vpop.f32.mrf.mxu1 }
 0x165   : > { %v1547_v40 = vadd.f32 %v1546_v34, %v1533_v38 }
 0x168   : > { %v1590_v57 = vpop.f32.mrf.mxu3 }
 0x169   : > { %v1591_v58 = vadd.f32 %v1590_v57, %v990_v49 }
 0x16a   : > { %v1560_v37 = vpop.f32.mrf.mxu2  ;;  %v1574_v39 = vpop.f32.mrf.mxu0 }
 0x16b   : > { %v1561_v42 = vadd.f32 %v1560_v37, %v1547_v40 }
 0x16c   : > { %v1548_v41 = vpop.f32.mrf.mxu1 }
 0x16d   : > { %v1549_v43 = vadd.f32 %v1548_v41, %v1535_v36  ;;  %v1575_v24 = vadd.f32 %v1574_v39, %v1561_v42 }
 0x16f   : > { %v1747_v1 = vmax.f32 %v1575_v24, 0.0 }
 0x170   : > { %v1644_v8 = vpop.f32.mrf.mxu3 }
 0x171   : > { %v1645_v16 = vadd.f32 %v1644_v8, %v991_v12 }
 0x172   : > { %v1562_v44 = vpop.f32.mrf.mxu2  ;;  %v1576_v46 = vpop.f32.mrf.mxu0 }
 0x173   : > { %v1563_v45 = vadd.f32 %v1562_v44, %v1549_v43 }
 0x174   : > { %v1616_v51 = vpop.f32.mrf.mxu1 }
 0x175   : > { %v1577_v2 = vadd.f32 %v1576_v46, %v1563_v45 }
 0x177   : > { %v1751_v48 = vmax.f32 %v1577_v2, 0.0 }
 0x178   : > { %v1646_v13 = vpop.f32.mrf.mxu3 }
 0x179   : > { %v1755_v50 = vpack.c.bf16 %v1751_v48, %v1747_v1  ;;  %v1647_v20 = vadd.f32 %v1646_v13, %v991_v12 }
 0x17a   : > { %v1602_v53 = vpop.f32.mrf.mxu0  ;;  %v1630_v55 = vpop.f32.mrf.mxu2 }
 0x17b   : > { %1771 = vmatpush.bf16.msrb.mxu3 %v1755_v50  ;;  %v1603_v56 = vadd.f32 %v1602_v53, %v1589_v54 }
 0x17c   : > { %v1618_v61 = vpop.f32.mrf.mxu1 }
 0x17d   : > { %v1617_v59 = vadd.f32 %v1616_v51, %v1603_v56 }
 0x17e   : > { %6631 = vmatmul.msk.bf16.vlgmr.msrb.gmra.mxu3 %vm1760_vm6, %v9977_v52 }
 0x17f   : > { %1829 = vmatpush.bf16.msra.mxu3 %v1755_v50  ;;  %v1631_v0 = vadd.f32 %v1630_v55, %v1617_v59 }
 0x180   : > { %v1700_v22 = vpop.f32.mrf.mxu3 }
 0x181   : > { %v1748_v6 = vmax.f32 %v1631_v0, 0.0  ;;  %v1701_v35 = vadd.f32 %v1700_v22, %v992_v30  ;;  %v6761_v22 = vld [vmem:[#allocation10 + $0xf0] sm:$0xf] }
 0x182   : > { %v1604_v62 = vpop.f32.mrf.mxu0  ;;  %v1632_v4 = vpop.f32.mrf.mxu2 }
 0x183   : > { %v1605_v63 = vadd.f32 %v1604_v62, %v1591_v58 }
 0x184   : > { %v1686_v10 = vpop.f32.mrf.mxu1 }
 0x185   : > { %v1619_v3 = vadd.f32 %v1618_v61, %v1605_v63 }
 0x187   : > { %v1633_v5 = vadd.f32 %v1632_v4, %v1619_v3 }
 0x188   : > { %v1702_v38 = vpop.f32.mrf.mxu3 }
 0x189   : > { %v1752_v7 = vmax.f32 %v1633_v5, 0.0  ;;  %v1703_v41 = vadd.f32 %v1702_v38, %v992_v30  ;;  %v8470_v38 = vld [vmem:[#allocation10 + $0xc4] sm:$0xf0] }
 0x18a   : > { %v1658_v11 = vpop.f32.mrf.mxu2 }
 0x18b   : > { %v1756_v9 = vpack.c.bf16 %v1752_v7, %v1748_v6  ;;  %v1659_v17 = vadd.f32 %v1658_v11, %v1645_v16 }
 0x18c   : > { %v1688_v14 = vpop.f32.mrf.mxu1 }
 0x18d   : > { %1784 = vmatpush.bf16.msrb.mxu0 %v1756_v9 }
 0x18e   : > { %6635 = vmatmul.msk.bf16.vlgmr.msra.gmra.mxu3 %vm1760_vm6, %v1818_v18 }
 0x190   : > { %6632 = vmatmul.msk.bf16.vlgmr.msrb.gmra.mxu0 %vm1760_vm6, %v9977_v52 }
 0x191   : > { %1842 = vmatpush.bf16.msra.mxu0 %v1756_v9 }
 0x192   : > { %v1660_v19 = vpop.f32.mrf.mxu2 }
 0x193   : > { %v1661_v60 = vadd.f32 %v1660_v19, %v1647_v20 }
 0x194   : > { %v1714_v26 = vpop.f32.mrf.mxu1 }
 0x195   : > { %v1715_v39 = vadd.f32 %v1714_v26, %v1701_v35  ;;  %v6753_v26 = vld [vmem:[#allocation10 + $0xe0] sm:$0xf] }
 0x19a   : > { %v1672_v15 = vpop.f32.mrf.mxu0 }
 0x19b   : > { %v1673_v21 = vadd.f32 %v1672_v15, %v1659_v17 }
 0x19c   : > { %v1716_v40 = vpop.f32.mrf.mxu1 }
 0x19d   : > { %v1687_v27 = vadd.f32 %v1686_v10, %v1673_v21  ;;  %v1717_v42 = vadd.f32 %v1716_v40, %v1703_v41  ;;  %v6729_v41 = vld [vmem:[#allocation10 + $0xb0] sm:$0xf] }
 0x19f   : > { %v1749_v31 = vmax.f32 %v1687_v27, 0.0  ;;  %v8474_v27 = vld [vmem:[#allocation10 + $0xe4] sm:$0xf0] }
 0x1a0   : > { %6636 = vmatmul.msk.bf16.vlgmr.msra.gmra.mxu0 %vm1760_vm6, %v1818_v18 }
 0x1a2   : > { %v1674_v25 = vpop.f32.mrf.mxu0 }
 0x1a3   : > { %v1675_v28 = vadd.f32 %v1674_v25, %v1661_v60  ;;  %v8476_v60 = vld [vmem:[#allocation10 + $0xf4] sm:$0xf0] }
 0x1a4   : > { %v6762_v25 = vor.u32 %v8476_v60, %v6761_v22  ;;  %v8452_v22 = vld [vmem:[#allocation10 + $0x34] sm:$0xf0]  ;;  %v7001_v60 = vld [vmem:[#allocation10 + $0x2d0] sm:$0xf] }
 0x1a5   : > { %v1689_v29 = vadd.f32 %v1688_v14, %v1675_v28 }
 0x1a6   : > { %3849 = vmatpush.bf16.msrb.mxu0 %v6762_v25  ;;  %v8536_v25 = vld [vmem:[#allocation10 + $0x2d4] sm:$0xf0] }
 0x1a7   : > { %v1753_v32 = vmax.f32 %v1689_v29, 0.0  ;;  %v6754_v29 = vor.u32 %v8474_v27, %v6753_v26 }
 0x1a9   : > { %v1757_v23 = vpack.c.bf16 %v1753_v32, %v1749_v31  ;;  %v6745_v31 = vld [vmem:[#allocation10 + $0xd0] sm:$0xf]  ;;  %v8472_v32 = vld [vmem:[#allocation10 + $0xd4] sm:$0xf0] }
 0x1aa   : > { %v1728_v34 = vpop.f32.mrf.mxu2  ;;  %v1742_v37 = vpop.f32.mrf.mxu0  ;;  %3850 = vmatpush.bf16.msrb.mxu0 %v6754_v29  ;;  %v6746_v35 = vor.u32 %v8472_v32, %v6745_v31  ;;  %v6801_v29 = vld [vmem:[#allocation10 + $0x140] sm:$0xf] }
 0x1ab   : > { %1797 = vmatpush.bf16.msra.mxu1 %v1757_v23  ;;  %v1729_v36 = vadd.f32 %v1728_v34, %v1715_v39  ;;  %v6657_v32 = vld [vmem:[#allocation10 + $0x20] sm:$0xf] }
 0x1ad   : > { %v1743_v44 = vadd.f32 %v1742_v37, %v1729_v36  ;;  %v6737_v37 = vld [vmem:[#allocation10 + $0xc0] sm:$0xf]  ;;  %v8468_v36 = vld [vmem:[#allocation10 + $0xb4] sm:$0xf0] }
 0x1ae   : > { %6633 = vmatmul.msk.bf16.vlgmr.msra.gmra.mxu1 %vm1760_vm6, %v9977_v52  ;;  %3851 = vmatpush.bf16.msrb.mxu0 %v6746_v35  ;;  %v6738_v40 = vor.u32 %v8470_v38, %v6737_v37  ;;  %v6993_v35 = vld [vmem:[#allocation10 + $0x2c0] sm:$0xf] }
 0x1af   : > { %1855 = vmatpush.bf16.msrb.mxu1 %v1757_v23  ;;  %v1750_v46 = vmax.f32 %v1743_v44, 0.0  ;;  %v6697_v44 = vld [vmem:[#allocation10 + $0x70] sm:$0xf] }
 0x1b2   : > { %v1730_v43 = vpop.f32.mrf.mxu2  ;;  %v1744_v24 = vpop.f32.mrf.mxu0  ;;  %3852 = vmatpush.bf16.msrb.mxu0 %v6738_v40 }
 0x1b3   : > { %v1731_v33 = vadd.f32 %v1730_v43, %v1717_v42  ;;  %v6730_v43 = vor.u32 %v8468_v36, %v6729_v41  ;;  %v6793_v41 = vld [vmem:[#allocation10 + $0x130] sm:$0xf] }
 0x1b5   : > { %v1745_v45 = vadd.f32 %v1744_v24, %v1731_v33  ;;  %v8460_v33 = vld [vmem:[#allocation10 + $0x74] sm:$0xf0]  ;;  %v6721_v24 = vld [vmem:[#allocation10 + $0xa0] sm:$0xf] }
 0x1b6   : > { %3853 = vmatpush.bf16.msrb.mxu0 %v6730_v43 }
 0x1b7   : > { %v1754_v2 = vmax.f32 %v1745_v45, 0.0  ;;  %v6698_v45 = vor.u32 %v8460_v33, %v6697_v44  ;;  %v8484_v33 = vld [vmem:[#allocation10 + $0x134] sm:$0xf0] }
 0x1b9   : > { %v1758_v47 = vpack.c.bf16 %v1754_v2, %v1750_v46  ;;  %v8466_v46 = vld [vmem:[#allocation10 + $0xa4] sm:$0xf0]  ;;  %3836 = vmatpush.bf16.msrb.mxu3 %v6698_v45  ;;  %v6794_v45 = vor.u32 %v8484_v33, %v6793_v41 }
 0x1ba   : > { %v6722_v2 = vor.u32 %v8466_v46, %v6721_v24  ;;  %v6889_v24 = vld [vmem:[#allocation10 + $0x1f0] sm:$0xf]  ;;  %v8508_v46 = vld [vmem:[#allocation10 + $0x1f4] sm:$0xf0] }
 0x1bb   : > { %1810 = vmatpush.bf16.msra.mxu2 %v1758_v47 }
 0x1bc   : > { %3854 = vmatpush.bf16.msrb.mxu0 %v6722_v2  ;;  %v6649_v2 = vld [vmem:[#allocation10 + $0x10] sm:$0xf] }
 0x1be   : > { %6634 = vmatmul.msk.bf16.vlgmr.msra.gmra.mxu2 %vm1760_vm6, %v9977_v52  ;;  %6637 = vmatmul.msk.bf16.vlgmr.msrb.gmra.mxu1 %vm1760_vm6, %v1818_v18 }
 0x1bf   : > { %1868 = vmatpush.bf16.msrb.mxu2 %v1758_v47  ;;  %v6689_v47 = vld [vmem:[#allocation10 + $0x60] sm:$0xf] }
 0x1ce   : > { %6638 = vmatmul.msk.bf16.vlgmr.msrb.gmra.mxu2 %vm1760_vm6, %v1818_v18 }
 0x201   : > { %v1773_v1 = vpop.f32.mrf.mxu3 }
 0x209   : > { %v1775_v48 = vpop.f32.mrf.mxu3 }
 0x20a   : > { %v6713_v48 = vld [vmem:[#allocation10 + $0x90] sm:$0xf] }
 0x20d   : > { %v1786_v49 = vpop.f32.mrf.mxu0 }
 0x20e   : > { %v1816_v50 = vpack.c.bf16 %v1786_v49, %v1773_v1  ;;  %v8458_v1 = vld [vmem:[#allocation10 + $0x64] sm:$0xf0] }
 0x20f   : > { %v6690_v49 = vor.u32 %v8458_v1, %v6689_v47  ;;  %v8448_v47 = vld [vmem:[#allocation10 + $0x14] sm:$0xf0] }
 0x210   : > { %v1878_v51 = vunpack.c.l.b16 %v1816_v50  ;;  %v1879_v53 = vunpack.c.h.b16 %v1816_v50  ;;  %v8464_v50 = vld [vmem:[#allocation10 + $0x94] sm:$0xf0] }
 0x211   : > { %v1831_v57 = vpop.f32.mrf.mxu3  ;;  %3837 = vmatpush.bf16.msrb.mxu3 %v6690_v49  ;;  %v6890_v49 = vor.u32 %v8508_v46, %v6889_v24  ;;  %v8520_v24 = vld [vmem:[#allocation10 + $0x254] sm:$0xf0] }
 0x212   : > { %v1882_v54 = vpack.c.b16 %v1878_v51, %v1878_v51  ;;  %v1883_v55 = vpack.c.b16 %v1879_v53, %v1879_v53  ;;  %v6714_v51 = vor.u32 %v8464_v50, %v6713_v48  ;;  %v6825_v53 = vld [vmem:[#allocation10 + $0x170] sm:$0xf]  ;;  %v6650_v50 = vor.u32 %v8448_v47, %v6649_v2 }
 0x213   : > { %3875 = vmatpush.bf16.msra.mxu2 %v6890_v49 }
 0x214   : > { %1886 = vrot.lane.b32.xlu1 %v1882_v54, %s9644_s25  ;;  %1888 = vrot.lane.b32.xlu2 %v1883_v55, %s9644_s25  ;;  %v8492_v54 = vld [vmem:[#allocation10 + $0x174] sm:$0xf0] }
 0x215   : > { %v1788_v56 = vpop.f32.mrf.mxu0  ;;  %v6826_v55 = vor.u32 %v8492_v54, %v6825_v53  ;;  %3855 = vmatpush.bf16.msrb.mxu0 %v6714_v51  ;;  %v6985_v51 = vld [vmem:[#allocation10 + $0x2b0] sm:$0xf]  ;;  %v8532_v53 = vld [vmem:[#allocation10 + $0x2b4] sm:$0xf0] }
 0x216   : > { %v6681_v56 = vld [vmem:[#allocation10 + $0x50] sm:$0xf]  ;;  %v6986_v54 = vor.u32 %v8532_v53, %v6985_v51 }
 0x217   : > { %3862 = vmatpush.bf16.msra.mxu1 %v6826_v55  ;;  %v6785_v55 = vld [vmem:[#allocation10 + $0x120] sm:$0xf]  ;;  %v7273_v53 = vld [vmem:[#allocation10 + $0x4f0] sm:$0xf] }
 0x219   : > { %v1833_v3 = vpop.f32.mrf.mxu3 }
 0x21d   : > { %v1844_v52 = vpop.f32.mrf.mxu0 }
 0x21e   : > { %v1874_v58 = vpack.c.bf16 %v1844_v52, %v1831_v57  ;;  %v8456_v57 = vld [vmem:[#allocation10 + $0x54] sm:$0xf0]  ;;  %v6705_v52 = vld [vmem:[#allocation10 + $0x80] sm:$0xf] }
 0x220   : > { %v1906_v61 = vunpack.c.l.b16 %v1874_v58  ;;  %v1907_v63 = vunpack.c.h.b16 %v1874_v58 }
 0x222   : > { %v1910_v62 = vpack.c.b16 %v1906_v61, %v1906_v61  ;;  %v1911_v5 = vpack.c.b16 %v1907_v63, %v1907_v63  ;;  %v8462_v61 = vld [vmem:[#allocation10 + $0x84] sm:$0xf0]  ;;  %v8540_v63 = vld [vmem:[#allocation10 + $0x2f4] sm:$0xf0] }
 0x223   : > { %v6706_v3 = vor.u32 %v8462_v61, %v6705_v52  ;;  %v6641_v61 = vld [vmem:[#allocation10] sm:$0xf] }
 0x224   : > { %1914 = vrot.lane.b32.xlu1 %v1910_v62, %s9644_s25  ;;  %v7017_v62 = vld [vmem:[#allocation10 + $0x2f0] sm:$0xf] }
 0x225   : > { %v1846_v0 = vpop.f32.mrf.mxu0  ;;  %3856 = vmatpush.bf16.msrb.mxu0 %v6706_v3  ;;  %v6953_v3 = vld [vmem:[#allocation10 + $0x270] sm:$0xf] }
 0x22b   : > { %v1799_v59 = vpop.f32.mrf.mxu1 }
 0x22c   : > { %1916 = vrot.lane.b32.xlu1 %v1911_v5, %s9644_s25  ;;  %v6817_v5 = vld [vmem:[#allocation10 + $0x160] sm:$0xf] }
 0x233   : > { %v1801_v4 = vpop.f32.mrf.mxu1 }
 0x234   : > { %v7018_v4 = vor.u32 %v8540_v63, %v7017_v62  ;;  %v8446_v62 = vld [vmem:[#allocation10 + $0x4] sm:$0xf0] }
 0x236   : > { %3901 = vmatpush.bf16.msra.mxu0 %v7018_v4  ;;  %v8524_v4 = vld [vmem:[#allocation10 + $0x274] sm:$0xf0] }
 0x23b   : > { %v1857_v6 = vpop.f32.mrf.mxu1 }
 0x241   : > { %v1812_v7 = vpop.f32.mrf.mxu2 }
 0x242   : > { %v1817_v8 = vpack.c.bf16 %v1812_v7, %v1799_v59  ;;  %v6682_v59 = vor.u32 %v8456_v57, %v6681_v56  ;;  %v8482_v56 = vld [vmem:[#allocation10 + $0x124] sm:$0xf0]  ;;  %v6881_v57 = vld [vmem:[#allocation10 + $0x1e0] sm:$0xf] }
 0x243   : > { %v1859_v11 = vpop.f32.mrf.mxu1  ;;  %v6786_v52 = vor.u32 %v8482_v56, %v6785_v55 }
 0x244   : > { %v1880_v9 = vunpack.c.l.b16 %v1817_v8  ;;  %v1881_v10 = vunpack.c.h.b16 %v1817_v8  ;;  %3838 = vmatpush.bf16.msrb.mxu3 %v6682_v59  ;;  %v8454_v11 = vld [vmem:[#allocation10 + $0x44] sm:$0xf0] }
 0x245   : > { %v8506_v59 = vld [vmem:[#allocation10 + $0x1e4] sm:$0xf0] }
 0x246   : > { %v1884_v12 = vpack.c.b16 %v1880_v9, %v1880_v9  ;;  %v1885_v13 = vpack.c.b16 %v1881_v10, %v1881_v10  ;;  %v6673_v10 = vld [vmem:[#allocation10 + $0x40] sm:$0xf]  ;;  %v6882_v63 = vor.u32 %v8506_v59, %v6881_v57  ;;  %v6857_v57 = vld [vmem:[#allocation10 + $0x1b0] sm:$0xf] }
 0x248   : > { %1892 = vrot.lane.b32.xlu0 %v1885_v13, %s9644_s25  ;;  %1890 = vrot.lane.b32.xlu2 %v1884_v12, %s9644_s25  ;;  %v6674_v12 = vor.u32 %v8454_v11, %v6673_v10  ;;  %v7009_v13 = vld [vmem:[#allocation10 + $0x2e0] sm:$0xf]  ;;  %v8480_v10 = vld [vmem:[#allocation10 + $0x114] sm:$0xf0] }
 0x249   : > { %v1814_v14 = vpop.f32.mrf.mxu2  ;;  %3876 = vmatpush.bf16.msra.mxu2 %v6882_v63 }
 0x24a   : > { %v8538_v14 = vld [vmem:[#allocation10 + $0x2e4] sm:$0xf0]  ;;  %3839 = vmatpush.bf16.msrb.mxu3 %v6674_v12 }
 0x251   : > { %v1870_v15 = vpop.f32.mrf.mxu2 }
 0x252   : > { %v1875_v16 = vpack.c.bf16 %v1870_v15, %v1857_v6  ;;  %v8490_v6 = vld [vmem:[#allocation10 + $0x164] sm:$0xf0]  ;;  %v6809_v15 = vld [vmem:[#allocation10 + $0x150] sm:$0xf] }
 0x253   : > { %v6818_v8 = vor.u32 %v8490_v6, %v6817_v5  ;;  %v6977_v5 = vld [vmem:[#allocation10 + $0x2a0] sm:$0xf]  ;;  %v6954_v6 = vor.u32 %v8524_v4, %v6953_v3 }
 0x254   : > { %v1908_v17 = vunpack.c.l.b16 %v1875_v16  ;;  %v1909_v18 = vunpack.c.h.b16 %v1875_v16 }
 0x255   : > { %3863 = vmatpush.bf16.msra.mxu1 %v6818_v8 }
 0x256   : > { %v1912_v19 = vpack.c.b16 %v1908_v17, %v1908_v17  ;;  %v1913_v20 = vpack.c.b16 %v1909_v18, %v1909_v18  ;;  %v7010_v18 = vor.u32 %v8538_v14, %v7009_v13  ;;  %v6873_v14 = vld [vmem:[#allocation10 + $0x1d0] sm:$0xf] }
 0x258   : > { %1920 = vrot.lane.b32.xlu0 %v1913_v20, %s9644_s25  ;;  %1918 = vrot.lane.b32.xlu2 %v1912_v19, %s9644_s25  ;;  %v8488_v19 = vld [vmem:[#allocation10 + $0x154] sm:$0xf0]  ;;  %v6665_v20 = vld [vmem:[#allocation10 + $0x30] sm:$0xf] }
 0x259   : > { %v1872_v21 = vpop.f32.mrf.mxu2  ;;  %v6666_v27 = vor.u32 %v8452_v22, %v6665_v20  ;;  %3902 = vmatpush.bf16.msra.mxu0 %v7010_v18  ;;  %v8522_v20 = vld [vmem:[#allocation10 + $0x264] sm:$0xf0]  ;;  %v8528_v22 = vld [vmem:[#allocation10 + $0x294] sm:$0xf0] }
 0x25a   : > { %v6810_v21 = vor.u32 %v8488_v19, %v6809_v15  ;;  %v8504_v15 = vld [vmem:[#allocation10 + $0x1d4] sm:$0xf0] }
 0x25b   : > { %3840 = vmatpush.bf16.msrb.mxu3 %v6666_v27  ;;  %v6874_v19 = vor.u32 %v8504_v15, %v6873_v14  ;;  %v6849_v14 = vld [vmem:[#allocation10 + $0x1a0] sm:$0xf] }
 0x25c   : > { %3864 = vmatpush.bf16.msra.mxu1 %v6810_v21  ;;  %v6969_v21 = vld [vmem:[#allocation10 + $0x290] sm:$0xf] }
 0x25d   : > { %3877 = vmatpush.bf16.msra.mxu2 %v6874_v19  ;;  %v8552_v19 = vld [vmem:[#allocation10 + $0x354] sm:$0xf0] }
 0x26e   : > { %v1889_v34 = vpop.permute.xlu2 %1888 }
 0x286   : > { %v1887_v28 = vpop.permute.xlu1 %1886 }
 0x287   : > { %v1901_v30 = vsel %vm1894_vm7, 0, %v1887_v28  ;;  %v1895_v39 = vsel %vm1894_vm7, %v1887_v28, %v1889_v34  ;;  %v7002_v28 = vor.u32 %v8536_v25, %v7001_v60  ;;  %v6769_v60 = vld [vmem:[#allocation10 + $0x100] sm:$0xf]  ;;  %v8478_v25 = vld [vmem:[#allocation10 + $0x104] sm:$0xf0] }
 0x288   : > { %v10003_v23 = vsel %vm1510_vm1, %v1901_v30, 0  ;;  %v10009_v42 = vsel %vm1510_vm1, %v1895_v39, 0  ;;  %v8486_v30 = vld [vmem:[#allocation10 + $0x144] sm:$0xf0] }
 0x289   : > { %1988 = vrot.lane.b32.xlu2 %v10003_v23, %s9645_s30  ;;  %v6802_v31 = vor.u32 %v8486_v30, %v6801_v29  ;;  %3903 = vmatpush.bf16.msra.mxu0 %v7002_v28  ;;  %v8534_v39 = vld [vmem:[#allocation10 + $0x2c4] sm:$0xf0]  ;;  %v2048_v36 = vshll.u32 %v10003_v23, 16  ;;  %v2054_v43 = vshll.u32 %v10009_v42, 16  ;;  %v6865_v28 = vld [vmem:[#allocation10 + $0x1c0] sm:$0xf] }
 0x28a   : > { %v6994_v44 = vor.u32 %v8534_v39, %v6993_v35  ;;  %v8502_v29 = vld [vmem:[#allocation10 + $0x1c4] sm:$0xf0]  ;;  %v7081_v35 = vld [vmem:[#allocation10 + $0x370] sm:$0xf]  ;;  %v2046_v49 = vshrl.u32 %v10003_v23, 16  ;;  %v2052_v59 = vshrl.u32 %v10009_v42, 16 }
 0x28b   : > { %3865 = vmatpush.bf16.msra.mxu1 %v6802_v31  ;;  %v6866_v33 = vor.u32 %v8502_v29, %v6865_v28  ;;  %v7257_v28 = vld [vmem:[#allocation10 + $0x4d0] sm:$0xf]  ;;  %v8600_v29 = vld [vmem:[#allocation10 + $0x4d4] sm:$0xf0] }
 0x28d   : > { %3904 = vmatpush.bf16.msra.mxu0 %v6994_v44  ;;  %3878 = vmatpush.bf16.msra.mxu2 %v6866_v33 }
 0x28f   : > { %3866 = vmatpush.bf16.msra.mxu1 %v6794_v45  ;;  %v6961_v45 = vld [vmem:[#allocation10 + $0x280] sm:$0xf] }
 0x291   : > { %1990 = vrot.lane.b32.xlu2 %v10009_v42, %s9645_s30  ;;  %3905 = vmatpush.bf16.msra.mxu0 %v6986_v54 }
 0x293   : > { %3867 = vmatpush.bf16.msra.mxu1 %v6786_v52 }
 0x296   : > { %v1915_v37 = vpop.permute.xlu1 %1914 }
 0x297   : > { %v10021_v40 = vsel %vm1894_vm7, 0, %v1915_v37 }
 0x298   : > { %v1929_v1 = vshrl.u32 %v10021_v40, 16  ;;  %v1932_v48 = vshll.u32 %v10021_v40, 16 }
 0x29e   : > { %v10027_v8 = vpop.permute.xlu1 %1916 }
 0x29f   : > { %v1922_v12 = vsel %vm1894_vm7, %v1915_v37, %v10027_v8  ;;  %v8556_v37 = vld [vmem:[#allocation10 + $0x374] sm:$0xf0] }
 0x2a0   : > { %v1939_v18 = vshll.u32 %v1922_v12, 16  ;;  %v7082_v47 = vor.u32 %v8556_v37, %v7081_v35 }
 0x2a2   : > { %v10013_v58 = vpop.permute.xlu2 %1890 }
 0x2a3   : > { %v1896_v0 = vsel %vm1894_vm7, %v1889_v34, %v10013_v58  ;;  %v8450_v34 = vld [vmem:[#allocation10 + $0x24] sm:$0xf0] }
 0x2a4   : > { %v1979_v7 = vsel %vm1510_vm1, %v1896_v0, 0  ;;  %v6658_v38 = vor.u32 %v8450_v34, %v6657_v32  ;;  %v6642_v0 = vor.u32 %v8446_v62, %v6641_v61  ;;  %v6970_v32 = vor.u32 %v8528_v22, %v6969_v21 }
 0x2a5   : > { %1992 = vrot.lane.b32.xlu0 %v1979_v7, %s9645_s30  ;;  %v2060_v9 = vshll.u32 %v1979_v7, 16  ;;  %v2058_v16 = vshrl.u32 %v1979_v7, 16  ;;  %v8530_v7 = vld [vmem:[#allocation10 + $0x2a4] sm:$0xf0]  ;;  %v6770_v34 = vor.u32 %v8478_v25, %v6769_v60  ;;  %v2056_v61 = vrot.slane %v2054_v43, 1 }
 0x2a6   : > { %3841 = vmatpush.bf16.msrb.mxu3 %v6658_v38  ;;  %v6978_v11 = vor.u32 %v8530_v7, %v6977_v5  ;;  %v6937_v38 = vld [vmem:[#allocation10 + $0x250] sm:$0xf]  ;;  %v8554_v7 = vld [vmem:[#allocation10 + $0x364] sm:$0xf0]  ;;  %v8516_v25 = vld [vmem:[#allocation10 + $0x234] sm:$0xf0] }
 0x2a7   : > { %v2062_v17 = vrot.slane %v2060_v9, 1  ;;  %v6777_v9 = vld [vmem:[#allocation10 + $0x110] sm:$0xf]  ;;  %v6938_v55 = vor.u32 %v8520_v24, %v6937_v38  ;;  %v8518_v43 = vld [vmem:[#allocation10 + $0x244] sm:$0xf0]  ;;  %v2057_v15 = vor.u32 %v2056_v61, %v2052_v59  ;;  %v7258_v38 = vor.u32 %v8600_v29, %v7257_v28 }
 0x2a8   : > { %v6778_v13 = vor.u32 %v8480_v10, %v6777_v9  ;;  %3906 = vmatpush.bf16.msra.mxu0 %v6978_v11  ;;  %v6921_v60 = vld [vmem:[#allocation10 + $0x230] sm:$0xf]  ;;  %v8514_v24 = vld [vmem:[#allocation10 + $0x224] sm:$0xf0]  ;;  %v7025_v28 = vld [vmem:[#allocation10 + $0x300] sm:$0xf] }
 0x2a9   : > { %v2063_v26 = vor.u32 %v2062_v17, %v2058_v16  ;;  %v6945_v16 = vld [vmem:[#allocation10 + $0x260] sm:$0xf]  ;;  %v1936_v17 = vshrl.u32 %v1922_v12, 16  ;;  %v8542_v29 = vld [vmem:[#allocation10 + $0x304] sm:$0xf0] }
 0x2aa   : > { %3842 = vmatpush.bf16.msrb.mxu3 %v6650_v50  ;;  %3868 = vmatpush.bf16.msra.mxu1 %v6778_v13  ;;  %v6946_v31 = vor.u32 %v8522_v20, %v6945_v16  ;;  %v7265_v12 = vld [vmem:[#allocation10 + $0x4e0] sm:$0xf] }
 0x2ab   : > { %2080 = vrot.lane.b32.xlu2 %v2063_v26, %s9645_s30  ;;  %v1931_v26 = vrot.slane %v1929_v1, 7  ;;  %v1938_v27 = vrot.slane %v1936_v17, 7  ;;  %v8526_v1 = vld [vmem:[#allocation10 + $0x284] sm:$0xf0] }
 0x2ac   : > { %3907 = vmatpush.bf16.msra.mxu0 %v6970_v32  ;;  %v6962_v56 = vor.u32 %v8526_v1, %v6961_v45  ;;  %v8498_v17 = vld [vmem:[#allocation10 + $0x1a4] sm:$0xf0]  ;;  %v8496_v32 = vld [vmem:[#allocation10 + $0x194] sm:$0xf0]  ;;  %v7249_v45 = vld [vmem:[#allocation10 + $0x4c0] sm:$0xf] }
 0x2ad   : > { %v1941_v44 = vor.u32 %v1939_v18, %v1938_v27  ;;  %v1934_v3 = vor.u32 %v1932_v48, %v1931_v26  ;;  %v8602_v48 = vld [vmem:[#allocation10 + $0x4e4] sm:$0xf0]  ;;  %v7065_v18 = vld [vmem:[#allocation10 + $0x350] sm:$0xf]  ;;  %v6850_v20 = vor.u32 %v8498_v17, %v6849_v14  ;;  %v6833_v1 = vld [vmem:[#allocation10 + $0x180] sm:$0xf] }
 0x2ae   : > { %3843 = vmatpush.bf16.msrb.mxu3 %v6642_v0  ;;  %3869 = vmatpush.bf16.msra.mxu1 %v6770_v34  ;;  %v8500_v0 = vld [vmem:[#allocation10 + $0x1b4] sm:$0xf0]  ;;  %v7266_v16 = vor.u32 %v8602_v48, %v7265_v12  ;;  %v7066_v21 = vor.u32 %v8552_v19, %v7065_v18  ;;  %v7057_v34 = vld [vmem:[#allocation10 + $0x340] sm:$0xf]  ;;  %v8594_v12 = vld [vmem:[#allocation10 + $0x4a4] sm:$0xf0] }
 0x2af   : > { %v10053_v23 = vsel %vm10045_vm10, 0, %v1941_v44  ;;  %v6858_v5 = vor.u32 %v8500_v0, %v6857_v57  ;;  %v10071_v22 = vsel %vm10045_vm10, 0, %v1934_v3  ;;  %v6905_v57 = vld [vmem:[#allocation10 + $0x210] sm:$0xf]  ;;  %v8596_v3 = vld [vmem:[#allocation10 + $0x4b4] sm:$0xf0] }
 0x2b0   : > { %3857 = vmatmul.bf16.vlgmr.msrb.gmra.mxu0 %v10053_v23  ;;  %v7241_v0 = vld [vmem:[#allocation10 + $0x4b0] sm:$0xf]  ;;  %v8588_v19 = vld [vmem:[#allocation10 + $0x474] sm:$0xf0] }
 0x2b1   : > { %3908 = vmatpush.bf16.msra.mxu0 %v6962_v56  ;;  %3879 = vmatpush.bf16.msra.mxu2 %v6858_v5  ;;  %v7041_v5 = vld [vmem:[#allocation10 + $0x320] sm:$0xf]  ;;  %v7145_v48 = vld [vmem:[#allocation10 + $0x3f0] sm:$0xf] }
 0x2b2   : > { %3888 = vmatpush.bf16.msra.mxu3 %v6954_v6  ;;  %v10049_v54 = vpop.permute.xlu2 %1918  ;;  %3914 = vmatpush.bf16.msrb.mxu1 %v7082_v47  ;;  %v7073_v6 = vld [vmem:[#allocation10 + $0x360] sm:$0xf]  ;;  %v7209_v17 = vld [vmem:[#allocation10 + $0x470] sm:$0xf] }
 0x2b3   : > { %v10058_v52 = vsel %vm1894_vm7, %v10027_v8, %v10049_v54  ;;  %v6929_v8 = vld [vmem:[#allocation10 + $0x240] sm:$0xf]  ;;  %v7074_v42 = vor.u32 %v8554_v7, %v7073_v6  ;;  %3844 = vmatmul.bf16.vlgmr.msrb.gmra.mxu3 %v10071_v22 }
 0x2b4   : > { %v1943_v11 = vshrl.u32 %v10058_v52, 16  ;;  %v6930_v40 = vor.u32 %v8518_v43, %v6929_v8  ;;  %v1946_v27 = vshll.u32 %v10058_v52, 16  ;;  %v8512_v52 = vld [vmem:[#allocation10 + $0x214] sm:$0xf0]  ;;  %v7242_v8 = vor.u32 %v8596_v3, %v7241_v0  ;;  %v7321_v3 = vld [vmem:[#allocation10 + $0x550] sm:$0xf] }
 0x2b5   : > { %3880 = vmatpush.bf16.msra.mxu2 %v6850_v20  ;;  %v6906_v7 = vor.u32 %v8512_v52, %v6905_v57  ;;  %v8566_v57 = vld [vmem:[#allocation10 + $0x3c4] sm:$0xf0]  ;;  %v7185_v52 = vld [vmem:[#allocation10 + $0x440] sm:$0xf] }
 0x2b6   : > { %3889 = vmatpush.bf16.msra.mxu3 %v6946_v31  ;;  %3915 = vmatpush.bf16.msrb.mxu1 %v7074_v42  ;;  %v1945_v26 = vrot.slane %v1943_v11, 7  ;;  %v6841_v31 = vld [vmem:[#allocation10 + $0x190] sm:$0xf]  ;;  %v7233_v11 = vld [vmem:[#allocation10 + $0x4a0] sm:$0xf] }
 0x2b7   : > { %v6842_v44 = vor.u32 %v8496_v32, %v6841_v31  ;;  %v7234_v18 = vor.u32 %v8594_v12, %v7233_v11  ;;  %v8570_v31 = vld [vmem:[#allocation10 + $0x3e4] sm:$0xf0]  ;;  %v7201_v32 = vld [vmem:[#allocation10 + $0x460] sm:$0xf]  ;;  %v8580_v11 = vld [vmem:[#allocation10 + $0x434] sm:$0xf0] }
 0x2b8   : > { %v1948_v47 = vor.u32 %v1946_v27, %v1945_v26  ;;  %v7225_v26 = vld [vmem:[#allocation10 + $0x490] sm:$0xf]  ;;  %v8592_v27 = vld [vmem:[#allocation10 + $0x494] sm:$0xf0] }
 0x2b9   : > { %3881 = vmatpush.bf16.msra.mxu2 %v6842_v44  ;;  %v7217_v44 = vld [vmem:[#allocation10 + $0x480] sm:$0xf] }
 0x2ba   : > { %v1893_v30 = vpop.permute.xlu0 %1892  ;;  %3890 = vmatpush.bf16.msra.mxu3 %v6938_v55  ;;  %3916 = vmatpush.bf16.msrb.mxu1 %v7066_v21 }
 0x2bb   : > { %v1897_v39 = vsel %vm1894_vm7, %v10013_v58, %v1893_v30  ;;  %v1903_v41 = vsel %vm1894_vm7, %v1893_v30, 0  ;;  %v2050_v58 = vrot.slane %v2048_v36, 1  ;;  %v8604_v36 = vld [vmem:[#allocation10 + $0x4f4] sm:$0xf0]  ;;  %v6922_v30 = vor.u32 %v8516_v25, %v6921_v60 }
 0x2bc   : > { %v1982_v46 = vsel %vm1510_vm1, %v1903_v41, 0  ;;  %v10036_v2 = vsel %vm1510_vm1, %v1897_v39, 0  ;;  %v7274_v4 = vor.u32 %v8604_v36, %v7273_v53  ;;  %v8550_v39 = vld [vmem:[#allocation10 + $0x344] sm:$0xf0]  ;;  %v6913_v41 = vld [vmem:[#allocation10 + $0x220] sm:$0xf]  ;;  %v7210_v25 = vor.u32 %v8588_v19, %v7209_v17 }
 0x2bd   : > { %v2072_v50 = vshll.u32 %v1982_v46, 16  ;;  %1996 = vrot.lane.b32.xlu0 %v1982_v46, %s9645_s30  ;;  %1994 = vrot.lane.b32.xlu1 %v10036_v2, %s9645_s30  ;;  %v2070_v62 = vshrl.u32 %v1982_v46, 16  ;;  %v2051_v10 = vor.u32 %v2050_v58, %v2046_v49  ;;  %v2066_v13 = vshll.u32 %v10036_v2, 16  ;;  %v8598_v46 = vld [vmem:[#allocation10 + $0x4c4] sm:$0xf0] }
 0x2be   : > { %3953 = vmatpush.bf16.msrb.mxu0 %v7274_v4  ;;  %3891 = vmatpush.bf16.msra.mxu3 %v6930_v40  ;;  %v2064_v35 = vshrl.u32 %v10036_v2, 16  ;;  %v7058_v33 = vor.u32 %v8550_v39, %v7057_v34  ;;  %v8494_v49 = vld [vmem:[#allocation10 + $0x184] sm:$0xf0]  ;;  %v7049_v58 = vld [vmem:[#allocation10 + $0x330] sm:$0xf]  ;;  %v6914_v2 = vor.u32 %v8514_v24, %v6913_v41  ;;  %v7250_v36 = vor.u32 %v8598_v46, %v7249_v45 }
 0x2bf   : > { %v2074_v63 = vrot.slane %v2072_v50, 1  ;;  %v2068_v37 = vrot.slane %v2066_v13, 1  ;;  %v8548_v53 = vld [vmem:[#allocation10 + $0x334] sm:$0xf0]  ;;  %v10083_v4 = vsel %vm10045_vm10, 0, %v1948_v47 }
 0x2c0   : > { %3917 = vmatpush.bf16.msrb.mxu1 %v7058_v33  ;;  %v7033_v13 = vld [vmem:[#allocation10 + $0x310] sm:$0xf]  ;;  %v8544_v40 = vld [vmem:[#allocation10 + $0x314] sm:$0xf0]  ;;  %v8586_v34 = vld [vmem:[#allocation10 + $0x464] sm:$0xf0]  ;;  %v7026_v33 = vor.u32 %v8542_v29, %v7025_v28 }
 0x2c1   : > { %v2075_v9 = vor.u32 %v2074_v63, %v2070_v62  ;;  %v2069_v55 = vor.u32 %v2068_v37, %v2064_v35  ;;  %v6834_v62 = vor.u32 %v8494_v49, %v6833_v1  ;;  %v7050_v63 = vor.u32 %v8548_v53, %v7049_v58  ;;  %3870 = vmatmul.bf16.vlgmr.msra.gmra.mxu1 %v10083_v4  ;;  %v7337_v39 = vld [vmem:[#allocation10 + $0x570] sm:$0xf]  ;;  %v8620_v41 = vld [vmem:[#allocation10 + $0x574] sm:$0xf0]  ;;  %v8590_v24 = vld [vmem:[#allocation10 + $0x484] sm:$0xf0] }
 0x2c2   : > { %3954 = vmatpush.bf16.msrb.mxu0 %v7266_v16  ;;  %3892 = vmatpush.bf16.msra.mxu3 %v6922_v30  ;;  %v8572_v16 = vld [vmem:[#allocation10 + $0x3f4] sm:$0xf0]  ;;  %v7034_v21 = vor.u32 %v8544_v40, %v7033_v13  ;;  %v7137_v30 = vld [vmem:[#allocation10 + $0x3e0] sm:$0xf]  ;;  %v7226_v35 = vor.u32 %v8592_v27, %v7225_v26  ;;  %v7129_v45 = vld [vmem:[#allocation10 + $0x3d0] sm:$0xf]  ;;  %v7338_v1 = vor.u32 %v8620_v41, %v7337_v39 }
 0x2c3   : > { %2084 = vrot.lane.b32.xlu2 %v2075_v9, %s9645_s30  ;;  %v6897_v9 = vld [vmem:[#allocation10 + $0x200] sm:$0xf]  ;;  %3882 = vmatpush.bf16.msra.mxu2 %v6834_v62  ;;  %v7146_v60 = vor.u32 %v8572_v16, %v7145_v48  ;;  %v7138_v37 = vor.u32 %v8570_v31, %v7137_v30  ;;  %v8568_v46 = vld [vmem:[#allocation10 + $0x3d4] sm:$0xf0]  ;;  %v7193_v49 = vld [vmem:[#allocation10 + $0x450] sm:$0xf] }
 0x2c4   : > { %3918 = vmatpush.bf16.msrb.mxu1 %v7050_v63  ;;  %v8584_v58 = vld [vmem:[#allocation10 + $0x454] sm:$0xf0]  ;;  %v8618_v53 = vld [vmem:[#allocation10 + $0x564] sm:$0xf0]  ;;  %v7313_v13 = vld [vmem:[#allocation10 + $0x540] sm:$0xf] }
 0x2c5   : > { %2076 = vrot.lane.b32.xlu0 %v2051_v10, %s9645_s30  ;;  %2078 = vrot.lane.b32.xlu1 %v2057_v15, %s9645_s30  ;;  %v8510_v10 = vld [vmem:[#allocation10 + $0x204] sm:$0xf0]  ;;  %v7105_v48 = vld [vmem:[#allocation10 + $0x3a0] sm:$0xf]  ;;  %v8612_v26 = vld [vmem:[#allocation10 + $0x534] sm:$0xf0] }
 0x2c6   : > { %3955 = vmatpush.bf16.msrb.mxu0 %v7258_v38  ;;  %3893 = vmatpush.bf16.msra.mxu3 %v6914_v2  ;;  %v6898_v15 = vor.u32 %v8510_v10, %v6897_v9  ;;  %v7202_v38 = vor.u32 %v8586_v34, %v7201_v32  ;;  %v7329_v2 = vld [vmem:[#allocation10 + $0x560] sm:$0xf]  ;;  %v8564_v9 = vld [vmem:[#allocation10 + $0x3b4] sm:$0xf0]  ;;  %v7177_v10 = vld [vmem:[#allocation10 + $0x430] sm:$0xf] }
 0x2c7   : > { %3927 = vmatpush.bf16.msrb.mxu2 %v7146_v60  ;;  %v7330_v63 = vor.u32 %v8618_v53, %v7329_v2  ;;  %v7178_v12 = vor.u32 %v8580_v11, %v7177_v10  ;;  %v8614_v40 = vld [vmem:[#allocation10 + $0x544] sm:$0xf0]  ;;  %v7097_v27 = vld [vmem:[#allocation10 + $0x390] sm:$0xf]  ;;  %v8560_v28 = vld [vmem:[#allocation10 + $0x394] sm:$0xf0] }
 0x2c8   : > { %v7314_v16 = vor.u32 %v8614_v40, %v7313_v13  ;;  %v8562_v17 = vld [vmem:[#allocation10 + $0x3a4] sm:$0xf0]  ;;  %v7529_v29 = vld [vmem:[#allocation10 + $0x6f0] sm:$0xf]  ;;  %v8576_v32 = vld [vmem:[#allocation10 + $0x414] sm:$0xf0] }
 0x2c9   : > { %v8578_v19 = vld [vmem:[#allocation10 + $0x424] sm:$0xf0]  ;;  %v7161_v31 = vld [vmem:[#allocation10 + $0x410] sm:$0xf]  ;;  %v8668_v34 = vld [vmem:[#allocation10 + $0x6f4] sm:$0xf0] }
 0x2ca   : > { %v1921_v50 = vpop.permute.xlu0 %1920  ;;  %3956 = vmatpush.bf16.msrb.mxu0 %v7250_v36  ;;  %3894 = vmatpush.bf16.msra.mxu3 %v6906_v7  ;;  %v7121_v36 = vld [vmem:[#allocation10 + $0x3c0] sm:$0xf]  ;;  %v7162_v39 = vor.u32 %v8576_v32, %v7161_v31  ;;  %v8634_v10 = vld [vmem:[#allocation10 + $0x5e4] sm:$0xf0] }
 0x2cb   : > { %v1924_v56 = vsel %vm1894_vm7, %v10049_v54, %v1921_v50  ;;  %v8546_v54 = vld [vmem:[#allocation10 + $0x324] sm:$0xf0]  ;;  %v1928_v20 = vsel %vm1894_vm7, %v1921_v50, 0  ;;  %3928 = vmatpush.bf16.msrb.mxu2 %v7138_v37  ;;  %v7130_v50 = vor.u32 %v8568_v46, %v7129_v45  ;;  %v7122_v0 = vor.u32 %v8566_v57, %v7121_v36  ;;  %v7297_v37 = vld [vmem:[#allocation10 + $0x520] sm:$0xf] }
 0x2cc   : > { %v1950_v59 = vshrl.u32 %v1924_v56, 16  ;;  %v1953_v61 = vshll.u32 %v1924_v56, 16  ;;  %v7042_v43 = vor.u32 %v8546_v54, %v7041_v5  ;;  %v1956_v47 = vshrl.u32 %v1928_v20, 16  ;;  %v8616_v5 = vld [vmem:[#allocation10 + $0x554] sm:$0xf0] }
 0x2cd   : > { %2082 = vrot.lane.b32.xlu1 %v2069_v55, %s9645_s30  ;;  %v7218_v55 = vor.u32 %v8590_v24, %v7217_v44  ;;  %v7194_v56 = vor.u32 %v8584_v58, %v7193_v49  ;;  %v1959_v62 = vshll.u32 %v1928_v20, 16  ;;  %v7322_v7 = vor.u32 %v8616_v5, %v7321_v3  ;;  %v7089_v41 = vld [vmem:[#allocation10 + $0x380] sm:$0xf]  ;;  %v8558_v44 = vld [vmem:[#allocation10 + $0x384] sm:$0xf0] }
 0x2ce   : > { %v1952_v6 = vrot.slane %v1950_v59, 7  ;;  %3957 = vmatpush.bf16.msrb.mxu0 %v7242_v8  ;;  %3919 = vmatpush.bf16.msrb.mxu1 %v7042_v43  ;;  %v8582_v59 = vld [vmem:[#allocation10 + $0x444] sm:$0xf0]  ;;  %v7113_v8 = vld [vmem:[#allocation10 + $0x3b0] sm:$0xf]  ;;  %v7090_v53 = vor.u32 %v8558_v44, %v7089_v41  ;;  %v2010_v5 = vshll.u32 %v10071_v22, 16 }
 0x2cf   : > { %3895 = vmatpush.bf16.msra.mxu3 %v6898_v15  ;;  %3929 = vmatpush.bf16.msrb.mxu2 %v7130_v50  ;;  %v7186_v54 = vor.u32 %v8582_v59, %v7185_v52  ;;  %v7114_v43 = vor.u32 %v8564_v9, %v7113_v8  ;;  %v8666_v24 = vld [vmem:[#allocation10 + $0x6e4] sm:$0xf0]  ;;  %v7153_v46 = vld [vmem:[#allocation10 + $0x400] sm:$0xf]  ;;  %v7289_v49 = vld [vmem:[#allocation10 + $0x510] sm:$0xf] }
 0x2d0   : > { %v1955_v42 = vor.u32 %v1953_v61, %v1952_v6  ;;  %v1958_v61 = vrot.slane %v1956_v47, 7  ;;  %v8574_v47 = vld [vmem:[#allocation10 + $0x404] sm:$0xf0]  ;;  %v8608_v58 = vld [vmem:[#allocation10 + $0x514] sm:$0xf0] }
 0x2d1   : > { %v7401_v50 = vld [vmem:[#allocation10 + $0x5f0] sm:$0xf]  ;;  %v8652_v36 = vld [vmem:[#allocation10 + $0x674] sm:$0xf0]  ;;  %v7154_v52 = vor.u32 %v8574_v47, %v7153_v46  ;;  %v8650_v11 = vld [vmem:[#allocation10 + $0x664] sm:$0xf0] }
 0x2d2   : > { %v10088_v14 = vsel %vm10045_vm10, 0, %v1955_v42  ;;  %3958 = vmatpush.bf16.msrb.mxu0 %v7234_v18  ;;  %3920 = vmatpush.bf16.msrb.mxu1 %v7034_v21  ;;  %v1961_v6 = vor.u32 %v1959_v62, %v1958_v61  ;;  %v7169_v18 = vld [vmem:[#allocation10 + $0x420] sm:$0xf]  ;;  %v7106_v21 = vor.u32 %v8562_v17, %v7105_v48  ;;  %v7290_v61 = vor.u32 %v8608_v58, %v7289_v49  ;;  %v8664_v3 = vld [vmem:[#allocation10 + $0x6d4] sm:$0xf0] }
 0x2d3   : > { %3883 = vmatmul.bf16.vlgmr.msra.gmra.mxu2 %v10088_v14  ;;  %3940 = vmatpush.bf16.msrb.mxu3 %v7210_v25  ;;  %v7170_v60 = vor.u32 %v8578_v19, %v7169_v18  ;;  %v7305_v25 = vld [vmem:[#allocation10 + $0x530] sm:$0xf]  ;;  %v8662_v13 = vld [vmem:[#allocation10 + $0x6c4] sm:$0xf0]  ;;  %v8632_v19 = vld [vmem:[#allocation10 + $0x5d4] sm:$0xf0] }
 0x2d4   : > { %3930 = vmatpush.bf16.msrb.mxu2 %v7122_v0  ;;  %v10094_v42 = vsel %vm10045_vm10, 0, %v1961_v6  ;;  %v7306_v30 = vor.u32 %v8612_v26, %v7305_v25  ;;  %v7513_v0 = vld [vmem:[#allocation10 + $0x6d0] sm:$0xf]  ;;  %v8606_v6 = vld [vmem:[#allocation10 + $0x504] sm:$0xf0] }
 0x2d5   : > { %v7514_v8 = vor.u32 %v8664_v3, %v7513_v0  ;;  %v7385_v18 = vld [vmem:[#allocation10 + $0x5d0] sm:$0xf]  ;;  %v8660_v25 = vld [vmem:[#allocation10 + $0x6b4] sm:$0xf0]  ;;  %v7377_v31 = vld [vmem:[#allocation10 + $0x5c0] sm:$0xf] }
 0x2d6   : > { %3959 = vmatpush.bf16.msrb.mxu0 %v7226_v35  ;;  %3921 = vmatpush.bf16.msrb.mxu1 %v7026_v33  ;;  %v7098_v35 = vor.u32 %v8560_v28, %v7097_v27  ;;  %v7521_v33 = vld [vmem:[#allocation10 + $0x6e0] sm:$0xf]  ;;  %v7386_v26 = vor.u32 %v8632_v19, %v7385_v18  ;;  %v8648_v27 = vld [vmem:[#allocation10 + $0x654] sm:$0xf0]  ;;  %v8630_v32 = vld [vmem:[#allocation10 + $0x5c4] sm:$0xf0] }
 0x2d7   : > { %3941 = vmatpush.bf16.msrb.mxu3 %v7202_v38  ;;  %v8610_v38 = vld [vmem:[#allocation10 + $0x524] sm:$0xf0]  ;;  %v7481_v46 = vld [vmem:[#allocation10 + $0x690] sm:$0xf]  ;;  %v8656_v47 = vld [vmem:[#allocation10 + $0x694] sm:$0xf0] }
 0x2d8   : > { %3931 = vmatpush.bf16.msrb.mxu2 %v7114_v43  ;;  %v7298_v45 = vor.u32 %v8610_v38, %v7297_v37  ;;  %v7457_v43 = vld [vmem:[#allocation10 + $0x660] sm:$0xf]  ;;  %v8658_v37 = vld [vmem:[#allocation10 + $0x6a4] sm:$0xf0]  ;;  %v7378_v38 = vor.u32 %v8630_v32, %v7377_v31  ;;  %v8644_v49 = vld [vmem:[#allocation10 + $0x634] sm:$0xf0] }
 0x2d9   : > { %v7458_v48 = vor.u32 %v8650_v11, %v7457_v43  ;;  %v8730_v43 = vld [vmem:[#allocation10 + $0x8e4] sm:$0xf0]  ;;  %v8728_v18 = vld [vmem:[#allocation10 + $0x8d4] sm:$0xf0]  ;;  %v7585_v31 = vld [vmem:[#allocation10 + $0x760] sm:$0xf] }
 0x2da   : > { %3966 = vmatpush.bf16.msra.mxu1 %v7338_v1  ;;  %3960 = vmatpush.bf16.msrb.mxu0 %v7218_v55  ;;  %v7530_v1 = vor.u32 %v8668_v34, %v7529_v29  ;;  %v8636_v55 = vld [vmem:[#allocation10 + $0x5f4] sm:$0xf0]  ;;  %v7441_v34 = vld [vmem:[#allocation10 + $0x640] sm:$0xf]  ;;  %v8682_v32 = vld [vmem:[#allocation10 + $0x764] sm:$0xf0] }
 0x2db   : > { %3942 = vmatpush.bf16.msrb.mxu3 %v7194_v56  ;;  %v7465_v56 = vld [vmem:[#allocation10 + $0x670] sm:$0xf]  ;;  %v7402_v59 = vor.u32 %v8636_v55, %v7401_v50  ;;  %v7482_v50 = vor.u32 %v8656_v47, %v7481_v46  ;;  %v8626_v55 = vld [vmem:[#allocation10 + $0x5a4] sm:$0xf0]  ;;  %v2017_v47 = vshll.u32 %v10053_v23, 16 }
 0x2dc   : > { %3932 = vmatpush.bf16.msrb.mxu2 %v7106_v21  ;;  %v7466_v62 = vor.u32 %v8652_v36, %v7465_v56  ;;  %v7449_v21 = vld [vmem:[#allocation10 + $0x650] sm:$0xf]  ;;  %v7425_v56 = vld [vmem:[#allocation10 + $0x620] sm:$0xf] }
 0x2dd   : > { %v7450_v28 = vor.u32 %v8648_v27, %v7449_v21  ;;  %v7473_v36 = vld [vmem:[#allocation10 + $0x680] sm:$0xf]  ;;  %v7593_v21 = vld [vmem:[#allocation10 + $0x770] sm:$0xf]  ;;  %v8726_v27 = vld [vmem:[#allocation10 + $0x8c4] sm:$0xf0] }
 0x2de   : > { %3967 = vmatpush.bf16.msra.mxu1 %v7330_v63  ;;  %v7522_v63 = vor.u32 %v8666_v24, %v7521_v33  ;;  %v7369_v33 = vld [vmem:[#allocation10 + $0x5b0] sm:$0xf]  ;;  %v8628_v24 = vld [vmem:[#allocation10 + $0x5b4] sm:$0xf0] }
 0x2df   : > { %3943 = vmatpush.bf16.msrb.mxu3 %v7186_v54  ;;  %v7281_v54 = vld [vmem:[#allocation10 + $0x500] sm:$0xf] }
 0x2e0   : > { %3933 = vmatpush.bf16.msrb.mxu2 %v7098_v35  ;;  %v7282_v9 = vor.u32 %v8606_v6, %v7281_v54  ;;  %v7489_v35 = vld [vmem:[#allocation10 + $0x6a0] sm:$0xf]  ;;  %v8624_v54 = vld [vmem:[#allocation10 + $0x594] sm:$0xf0]  ;;  %v7417_v6 = vld [vmem:[#allocation10 + $0x610] sm:$0xf] }
 0x2e1   : > { %v7490_v44 = vor.u32 %v8658_v37, %v7489_v35  ;;  %v7753_v37 = vld [vmem:[#allocation10 + $0x8b0] sm:$0xf] }
 0x2e2   : > { %3968 = vmatpush.bf16.msra.mxu1 %v7322_v7  ;;  %v7393_v7 = vld [vmem:[#allocation10 + $0x5e0] sm:$0xf] }
 0x2e3   : > { %v1989_v15 = vpop.permute.xlu2 %1988  ;;  %3944 = vmatpush.bf16.msrb.mxu3 %v7178_v12  ;;  %v7505_v12 = vld [vmem:[#allocation10 + $0x6c0] sm:$0xf]  ;;  %v7394_v40 = vor.u32 %v8634_v10, %v7393_v7 }
 0x2e4   : > { %v10098_v20 = vsel %vm1998_vm11, %v10094_v42, %v1989_v15  ;;  %3934 = vmatpush.bf16.msrb.mxu2 %v7090_v53  ;;  %v7506_v17 = vor.u32 %v8662_v13, %v7505_v12  ;;  %v7361_v53 = vld [vmem:[#allocation10 + $0x5a0] sm:$0xf]  ;;  %v8622_v13 = vld [vmem:[#allocation10 + $0x584] sm:$0xf0] }
 0x2e5   : > { %3896 = vmatmul.bf16.vlgmr.msra.gmra.mxu3 %v10098_v20  ;;  %v7777_v10 = vld [vmem:[#allocation10 + $0x8e0] sm:$0xf] }
 0x2e6   : > { %3969 = vmatpush.bf16.msra.mxu1 %v7314_v16  ;;  %v2012_v16 = vrot.slane %v2010_v5, 1  ;;  %v7353_v5 = vld [vmem:[#allocation10 + $0x590] sm:$0xf]  ;;  %v7345_v12 = vld [vmem:[#allocation10 + $0x580] sm:$0xf] }
 0x2e7   : > { %3945 = vmatpush.bf16.msrb.mxu3 %v7170_v60  ;;  %v7497_v60 = vld [vmem:[#allocation10 + $0x6b0] sm:$0xf] }
 0x2e8   : > { %3979 = vmatpush.bf16.msra.mxu2 %v7402_v59  ;;  %v7362_v59 = vor.u32 %v8626_v55, %v7361_v53  ;;  %v2015_v55 = vshrl.u32 %v10053_v23, 16 }
 0x2ea   : > { %3970 = vmatpush.bf16.msra.mxu1 %v7306_v30  ;;  %v7498_v30 = vor.u32 %v8660_v25, %v7497_v60  ;;  %v8684_v60 = vld [vmem:[#allocation10 + $0x774] sm:$0xf0] }
 0x2eb   : > { %v10101_v2 = vpop.permute.xlu2 %1990  ;;  %3946 = vmatpush.bf16.msrb.mxu3 %v7162_v39  ;;  %v8646_v39 = vld [vmem:[#allocation10 + $0x644] sm:$0xf0] }
 0x2ec   : > { %v10105_v57 = vsel %vm1998_vm11, %v1989_v15, %v10101_v2  ;;  %v2008_v15 = vshrl.u32 %v10071_v22, 16  ;;  %3980 = vmatpush.bf16.msra.mxu2 %v7394_v40  ;;  %v7442_v41 = vor.u32 %v8646_v39, %v7441_v34  ;;  %v7409_v40 = vld [vmem:[#allocation10 + $0x600] sm:$0xf]  ;;  %v7586_v39 = vor.u32 %v8682_v32, %v7585_v31  ;;  %v6699_v31 = vld [vmem:[#allocation10 + $0x78] sm:$0xf0] }
 0x2ed   : > { %3909 = vmatmul.bf16.vlgmr.msra.gmra.mxu0 %v10105_v57  ;;  %v2036_v32 = vshrl.u32 %v10094_v42, 16 }
 0x2ee   : > { %3971 = vmatpush.bf16.msra.mxu1 %v7298_v45  ;;  %4005 = vmatpush.bf16.msra.mxu0 %v7530_v1  ;;  %v10110_v29 = vor.u32 %v2012_v16, %v2008_v15  ;;  %v7433_v45 = vld [vmem:[#allocation10 + $0x630] sm:$0xf]  ;;  %v7370_v1 = vor.u32 %v8628_v24, %v7369_v33  ;;  %v7346_v15 = vor.u32 %v8622_v13, %v7345_v12  ;;  %v8638_v16 = vld [vmem:[#allocation10 + $0x604] sm:$0xf0]  ;;  %v7745_v24 = vld [vmem:[#allocation10 + $0x8a0] sm:$0xf] }
 0x2ef   : > { %3947 = vmatpush.bf16.msrb.mxu3 %v7154_v52  ;;  %v7434_v58 = vor.u32 %v8644_v49, %v7433_v45  ;;  %v8654_v52 = vld [vmem:[#allocation10 + $0x684] sm:$0xf0]  ;;  %v7410_v19 = vor.u32 %v8638_v16, %v7409_v40  ;;  %v2038_v12 = vshll.u32 %v10094_v42, 16  ;;  %v2031_v42 = vshll.u32 %v10088_v14, 16 }
 0x2f0   : > { %3981 = vmatpush.bf16.msra.mxu2 %v7386_v26  ;;  %v7474_v3 = vor.u32 %v8654_v52, %v7473_v36  ;;  %v7761_v26 = vld [vmem:[#allocation10 + $0x8c0] sm:$0xf]  ;;  %v8722_v45 = vld [vmem:[#allocation10 + $0x8a4] sm:$0xf0]  ;;  %v7561_v36 = vld [vmem:[#allocation10 + $0x730] sm:$0xf] }
 0x2f1   : > { %v7762_v34 = vor.u32 %v8726_v27, %v7761_v26  ;;  %v8678_v49 = vld [vmem:[#allocation10 + $0x744] sm:$0xf0]  ;;  %v8676_v52 = vld [vmem:[#allocation10 + $0x734] sm:$0xf0] }
 0x2f2   : > { %3972 = vmatpush.bf16.msra.mxu1 %v7290_v61  ;;  %4006 = vmatpush.bf16.msra.mxu0 %v7522_v63  ;;  %v8642_v61 = vld [vmem:[#allocation10 + $0x624] sm:$0xf0]  ;;  %v8732_v63 = vld [vmem:[#allocation10 + $0x8f4] sm:$0xf0] }
 0x2f3   : > { %3992 = vmatpush.bf16.msra.mxu3 %v7466_v62  ;;  %v7785_v62 = vld [vmem:[#allocation10 + $0x8f0] sm:$0xf]  ;;  %v7426_v0 = vor.u32 %v8642_v61, %v7425_v56  ;;  %v2019_v56 = vrot.slane %v2017_v47, 1  ;;  %v7729_v61 = vld [vmem:[#allocation10 + $0x880] sm:$0xf] }
 0x2f4   : > { %3982 = vmatpush.bf16.msra.mxu2 %v7378_v38  ;;  %v7786_v7 = vor.u32 %v8732_v63, %v7785_v62  ;;  %v8724_v38 = vld [vmem:[#allocation10 + $0x8b4] sm:$0xf0]  ;;  %v8718_v62 = vld [vmem:[#allocation10 + $0x884] sm:$0xf0]  ;;  %v7562_v63 = vor.u32 %v8676_v52, %v7561_v36  ;;  %v8457_v47 = vld [vmem:[#allocation10 + $0x64] sm:$0xf] }
 0x2f5   : > { %v7754_v33 = vor.u32 %v8724_v38, %v7753_v37  ;;  %v8714_v27 = vld [vmem:[#allocation10 + $0x864] sm:$0xf0] }
 0x2f6   : > { %3973 = vmatpush.bf16.msra.mxu1 %v7282_v9  ;;  %4007 = vmatpush.bf16.msra.mxu0 %v7514_v8  ;;  %v7354_v8 = vor.u32 %v8624_v54, %v7353_v5  ;;  %v8640_v9 = vld [vmem:[#allocation10 + $0x614] sm:$0xf0]  ;;  %v8674_v5 = vld [vmem:[#allocation10 + $0x724] sm:$0xf0]  ;;  %v7730_v54 = vor.u32 %v8718_v62, %v7729_v61  ;;  %v7697_v61 = vld [vmem:[#allocation10 + $0x840] sm:$0xf] }
 0x2f7   : > { %3993 = vmatpush.bf16.msra.mxu3 %v7458_v48  ;;  %v7418_v11 = vor.u32 %v8640_v9, %v7417_v6  ;;  %v7778_v48 = vor.u32 %v8730_v43, %v7777_v10  ;;  %v7657_v9 = vld [vmem:[#allocation10 + $0x7f0] sm:$0xf]  ;;  %v8700_v10 = vld [vmem:[#allocation10 + $0x7f4] sm:$0xf0]  ;;  %v8505_v62 = vld [vmem:[#allocation10 + $0x1e4] sm:$0xf] }
 0x2f8   : > { %3983 = vmatpush.bf16.msra.mxu2 %v7370_v1  ;;  %v7569_v1 = vld [vmem:[#allocation10 + $0x740] sm:$0xf]  ;;  %v7721_v43 = vld [vmem:[#allocation10 + $0x870] sm:$0xf]  ;;  %v7658_v40 = vor.u32 %v8700_v10, %v7657_v9  ;;  %v2029_v10 = vshrl.u32 %v10088_v14, 16 }
 0x2f9   : > { %v7570_v53 = vor.u32 %v8678_v49, %v7569_v1  ;;  %v6691_v1 = vld [vmem:[#allocation10 + $0x68] sm:$0xf0]  ;;  %v2024_v49 = vshll.u32 %v10083_v4, 16 }
 0x2fa   : > { %4008 = vmatpush.bf16.msra.mxu0 %v7506_v17  ;;  %v7769_v17 = vld [vmem:[#allocation10 + $0x8d0] sm:$0xf] }
 0x2fb   : > { %3994 = vmatpush.bf16.msra.mxu3 %v7450_v28  ;;  %v7770_v25 = vor.u32 %v8728_v18, %v7769_v17  ;;  %v7594_v28 = vor.u32 %v8684_v60, %v7593_v21  ;;  %v8698_v21 = vld [vmem:[#allocation10 + $0x7e4] sm:$0xf0]  ;;  %v7713_v60 = vld [vmem:[#allocation10 + $0x860] sm:$0xf]  ;;  %v2026_v9 = vrot.slane %v2024_v49, 1 }
 0x2fc   : > { %3984 = vmatpush.bf16.msra.mxu2 %v7362_v59  ;;  %v7609_v49 = vld [vmem:[#allocation10 + $0x790] sm:$0xf] }
 0x2fd   : > { %3961 = vmatmul.bf16.vlgmr.msrb.gmra.mxu0 %v10110_v29 }
 0x2fe   : > { %4009 = vmatpush.bf16.msra.mxu0 %v7498_v30 }
 0x2ff   : > { %3995 = vmatpush.bf16.msra.mxu3 %v7442_v41  ;;  %v7577_v41 = vld [vmem:[#allocation10 + $0x750] sm:$0xf] }
 0x300   : > { %3985 = vmatpush.bf16.msra.mxu2 %v7354_v8  ;;  %v8672_v8 = vld [vmem:[#allocation10 + $0x714] sm:$0xf0] }
 0x302   : > { %4010 = vmatpush.bf16.msra.mxu0 %v7490_v44  ;;  %v8680_v44 = vld [vmem:[#allocation10 + $0x754] sm:$0xf0] }
 0x303   : > { %3996 = vmatpush.bf16.msra.mxu3 %v7434_v58  ;;  %v7578_v46 = vor.u32 %v8680_v44, %v7577_v41  ;;  %v7737_v58 = vld [vmem:[#allocation10 + $0x890] sm:$0xf]  ;;  %v7714_v41 = vor.u32 %v8714_v27, %v7713_v60  ;;  %v6675_v60 = vld [vmem:[#allocation10 + $0x48] sm:$0xf0] }
 0x304   : > { %3986 = vmatpush.bf16.msra.mxu2 %v7346_v15  ;;  %v8670_v15 = vld [vmem:[#allocation10 + $0x704] sm:$0xf0] }
 0x306   : > { %4011 = vmatpush.bf16.msra.mxu0 %v7482_v50  ;;  %v8720_v50 = vld [vmem:[#allocation10 + $0x894] sm:$0xf0] }
 0x307   : > { %3997 = vmatpush.bf16.msra.mxu3 %v7426_v0  ;;  %v7738_v59 = vor.u32 %v8720_v50, %v7737_v58  ;;  %v10123_v0 = vor.u32 %v2019_v56, %v2015_v55  ;;  %v8694_v55 = vld [vmem:[#allocation10 + $0x7c4] sm:$0xf0] }
 0x30a   : > { %4012 = vmatpush.bf16.msra.mxu0 %v7474_v3  ;;  %v7553_v3 = vld [vmem:[#allocation10 + $0x720] sm:$0xf] }
 0x30b   : > { %3998 = vmatpush.bf16.msra.mxu3 %v7418_v11  ;;  %v7554_v6 = vor.u32 %v8674_v5, %v7553_v3  ;;  %v8716_v11 = vld [vmem:[#allocation10 + $0x874] sm:$0xf0] }
 0x30c   : > { %v7722_v18 = vor.u32 %v8716_v11, %v7721_v43  ;;  %v2033_v43 = vrot.slane %v2031_v42, 1  ;;  %v8688_v42 = vld [vmem:[#allocation10 + $0x794] sm:$0xf0] }
 0x30e   : > { %4057 = vmatpush.bf16.msrb.mxu0 %v7786_v7  ;;  %v7545_v7 = vld [vmem:[#allocation10 + $0x710] sm:$0xf] }
 0x30f   : > { %3999 = vmatpush.bf16.msra.mxu3 %v7410_v19  ;;  %v7546_v13 = vor.u32 %v8672_v8, %v7545_v7  ;;  %v7649_v19 = vld [vmem:[#allocation10 + $0x7e0] sm:$0xf]  ;;  %v6683_v7 = vld [vmem:[#allocation10 + $0x58] sm:$0xf0]  ;;  %v2022_v8 = vshrl.u32 %v10083_v4, 16 }
 0x310   : > { %v7650_v38 = vor.u32 %v8698_v21, %v7649_v19  ;;  %v8708_v19 = vld [vmem:[#allocation10 + $0x834] sm:$0xf0]  ;;  %v8453_v21 = vld [vmem:[#allocation10 + $0x44] sm:$0xf] }
 0x311   : > { %v10152_v27 = vor.u32 %v2026_v9, %v2022_v8  ;;  %v7665_v8 = vld [vmem:[#allocation10 + $0x800] sm:$0xf] }
 0x312   : > { %4058 = vmatpush.bf16.msrb.mxu0 %v7778_v48  ;;  %v7537_v48 = vld [vmem:[#allocation10 + $0x700] sm:$0xf] }
 0x313   : > { %v7538_v37 = vor.u32 %v8670_v15, %v7537_v48 }
 0x316   : > { %4059 = vmatpush.bf16.msrb.mxu0 %v7770_v25 }
 0x317   : > { %v10113_v30 = vpop.permute.xlu0 %1992 }
 0x318   : > { %v10118_v35 = vsel %vm1998_vm11, %v10101_v2, %v10113_v30  ;;  %v7746_v2 = vor.u32 %v8722_v45, %v7745_v24  ;;  %v8507_v24 = vld [vmem:[#allocation10 + $0x1f4] sm:$0xf]  ;;  %v6891_v45 = vld [vmem:[#allocation10 + $0x1f8] sm:$0xf0] }
 0x319   : > { %3922 = vmatmul.bf16.vlgmr.msrb.gmra.mxu1 %v10118_v35  ;;  %v6894_v50 = vor.u32 %v8507_v24, %v6891_v45  ;;  %v8706_v24 = vld [vmem:[#allocation10 + $0x824] sm:$0xf0]  ;;  %v8451_v45 = vld [vmem:[#allocation10 + $0x34] sm:$0xf] }
 0x31a   : > { %4018 = vmatpush.bf16.msrb.mxu1 %v7594_v28  ;;  %4060 = vmatpush.bf16.msrb.mxu0 %v7762_v34  ;;  %v8459_v28 = vld [vmem:[#allocation10 + $0x74] sm:$0xf]  ;;  %v2040_v34 = vrot.slane %v2038_v12, 1 }
 0x31b   : > { %v6702_v44 = vor.u32 %v8459_v28, %v6699_v31 }
 0x31e   : > { %4019 = vmatpush.bf16.msrb.mxu1 %v7586_v39  ;;  %4061 = vmatpush.bf16.msrb.mxu0 %v7754_v33  ;;  %v7641_v39 = vld [vmem:[#allocation10 + $0x7d0] sm:$0xf] }
 0x31f   : > { %v7705_v33 = vld [vmem:[#allocation10 + $0x850] sm:$0xf] }
 0x322   : > { %4020 = vmatpush.bf16.msrb.mxu1 %v7578_v46  ;;  %4062 = vmatpush.bf16.msrb.mxu0 %v7746_v2  ;;  %v8712_v46 = vld [vmem:[#allocation10 + $0x854] sm:$0xf0]  ;;  %v2041_v2 = vor.u32 %v2040_v34, %v2036_v32  ;;  %v7617_v32 = vld [vmem:[#allocation10 + $0x7a0] sm:$0xf]  ;;  %v8690_v34 = vld [vmem:[#allocation10 + $0x7a4] sm:$0xf0] }
 0x323   : > { %v7706_v52 = vor.u32 %v8712_v46, %v7705_v33  ;;  %v6867_v33 = vld [vmem:[#allocation10 + $0x1c8] sm:$0xf0]  ;;  %v6667_v46 = vld [vmem:[#allocation10 + $0x38] sm:$0xf0] }
 0x326   : > { %4021 = vmatpush.bf16.msrb.mxu1 %v7570_v53  ;;  %4063 = vmatpush.bf16.msrb.mxu0 %v7738_v59  ;;  %v7633_v53 = vld [vmem:[#allocation10 + $0x7c0] sm:$0xf]  ;;  %v6694_v59 = vor.u32 %v8457_v47, %v6691_v1  ;;  %v7618_v47 = vor.u32 %v8690_v34, %v7617_v32  ;;  %v6843_v34 = vld [vmem:[#allocation10 + $0x198] sm:$0xf0] }
 0x327   : > { %v7634_v11 = vor.u32 %v8694_v55, %v7633_v53  ;;  %v8499_v53 = vld [vmem:[#allocation10 + $0x1b4] sm:$0xf]  ;;  %v6859_v55 = vld [vmem:[#allocation10 + $0x1b8] sm:$0xf0] }
 0x329   : > { %3974 = vmatmul.bf16.vlgmr.msra.gmra.mxu1 %v10123_v0 }
 0x32a   : > { %4022 = vmatpush.bf16.msrb.mxu1 %v7562_v63  ;;  %4064 = vmatpush.bf16.msrb.mxu0 %v7730_v54  ;;  %v6883_v63 = vld [vmem:[#allocation10 + $0x1e8] sm:$0xf0]  ;;  %v8710_v54 = vld [vmem:[#allocation10 + $0x844] sm:$0xf0] }
 0x32b   : > { %v6886_v12 = vor.u32 %v8505_v62, %v6883_v63  ;;  %v7698_v48 = vor.u32 %v8710_v54, %v7697_v61  ;;  %v7610_v63 = vor.u32 %v8688_v42, %v7609_v49  ;;  %v6862_v54 = vor.u32 %v8499_v53, %v6859_v55  ;;  %v8493_v55 = vld [vmem:[#allocation10 + $0x184] sm:$0xf] }
 0x32d   : > { %v10162_v62 = vpop.f32.mrf.mxu0 }
 0x32e   : > { %4023 = vmatpush.bf16.msrb.mxu1 %v7554_v6  ;;  %v8455_v6 = vld [vmem:[#allocation10 + $0x54] sm:$0xf] }
 0x32f   : > { %v1997_v16 = vpop.permute.xlu0 %1996  ;;  %v1995_v17 = vpop.permute.xlu1 %1994  ;;  %v6686_v15 = vor.u32 %v8455_v6, %v6683_v7  ;;  %v7601_v6 = vld [vmem:[#allocation10 + $0x780] sm:$0xf]  ;;  %v8686_v7 = vld [vmem:[#allocation10 + $0x784] sm:$0xf0] }
 0x330   : > { %v10129_v25 = vsel %vm1998_vm11, %v10113_v30, %v1995_v17  ;;  %v10132_v26 = vsel %vm1998_vm11, %v1995_v17, %v1997_v16  ;;  %v8696_v30 = vld [vmem:[#allocation10 + $0x7d4] sm:$0xf0]  ;;  %v7689_v16 = vld [vmem:[#allocation10 + $0x830] sm:$0xf]  ;;  %v8503_v17 = vld [vmem:[#allocation10 + $0x1d4] sm:$0xf] }
 0x331   : > { %3935 = vmatmul.bf16.vlgmr.msrb.gmra.mxu2 %v10129_v25  ;;  %3948 = vmatmul.bf16.vlgmr.msrb.gmra.mxu3 %v10132_v26  ;;  %v7642_v58 = vor.u32 %v8696_v30, %v7641_v39  ;;  %v7690_v39 = vor.u32 %v8708_v19, %v7689_v16  ;;  %v6678_v30 = vor.u32 %v8453_v21, %v6675_v60  ;;  %v8475_v16 = vld [vmem:[#allocation10 + $0xf4] sm:$0xf]  ;;  %v6827_v19 = vld [vmem:[#allocation10 + $0x178] sm:$0xf0] }
 0x332   : > { %4024 = vmatpush.bf16.msrb.mxu1 %v7546_v13  ;;  %4031 = vmatpush.bf16.msrb.mxu2 %v7658_v40  ;;  %v7625_v13 = vld [vmem:[#allocation10 + $0x7b0] sm:$0xf]  ;;  %v8692_v40 = vld [vmem:[#allocation10 + $0x7b4] sm:$0xf0]  ;;  %v7602_v21 = vor.u32 %v8686_v7, %v7601_v6  ;;  %v8471_v6 = vld [vmem:[#allocation10 + $0xd4] sm:$0xf] }
 0x333   : > { %4044 = vmatpush.bf16.msrb.mxu3 %v7722_v18  ;;  %v6875_v18 = vld [vmem:[#allocation10 + $0x1d8] sm:$0xf0]  ;;  %v7626_v28 = vor.u32 %v8692_v40, %v7625_v13  ;;  %v6851_v13 = vld [vmem:[#allocation10 + $0x1a8] sm:$0xf0]  ;;  %v8571_v7 = vld [vmem:[#allocation10 + $0x3f4] sm:$0xf] }
 0x334   : > { %v6878_v31 = vor.u32 %v8503_v17, %v6875_v18  ;;  %v6763_v17 = vld [vmem:[#allocation10 + $0xf8] sm:$0xf0]  ;;  %v8491_v18 = vld [vmem:[#allocation10 + $0x174] sm:$0xf] }
 0x335   : > { %v3860_v42 = vpop.f32.mrf.mxu0 }
 0x336   : > { %4025 = vmatpush.bf16.msrb.mxu1 %v7538_v37  ;;  %4032 = vmatpush.bf16.msrb.mxu2 %v7650_v38  ;;  %v10154_v37 = vpop.permute.xlu2 %2080  ;;  %v10156_v38 = vor.u32 %v2033_v43, %v2029_v10  ;;  %v6731_v42 = vld [vmem:[#allocation10 + $0xb8] sm:$0xf0] }
 0x337   : > { %4045 = vmatpush.bf16.msrb.mxu3 %v7714_v41  ;;  %v2077_v56 = vpop.permute.xlu0 %2076  ;;  %v10139_v36 = vpop.permute.xlu1 %2078  ;;  %v7681_v41 = vld [vmem:[#allocation10 + $0x820] sm:$0xf] }
 0x338   : > { %v10142_v3 = vsel %vm1998_vm11, %v2041_v2, %v2077_v56  ;;  %v10146_v5 = vsel %vm1998_vm11, %v2077_v56, %v10139_v36  ;;  %v7682_v2 = vor.u32 %v8706_v24, %v7681_v41  ;;  %v8704_v56 = vld [vmem:[#allocation10 + $0x814] sm:$0xf0]  ;;  %v6766_v41 = vor.u32 %v8475_v16, %v6763_v17  ;;  %v6755_v24 = vld [vmem:[#allocation10 + $0xe8] sm:$0xf0] }
 0x339   : > { %4013 = vmatmul.bf16.vlgmr.msra.gmra.mxu0 %v10142_v3  ;;  %4026 = vmatmul.bf16.vlgmr.msrb.gmra.mxu1 %v10146_v5  ;;  %v6947_v16 = vld [vmem:[#allocation10 + $0x268] sm:$0xf0] }
 0x33a   : > { %4070 = vmatpush.bf16.msra.mxu1 %v6702_v44  ;;  %4033 = vmatpush.bf16.msrb.mxu2 %v7642_v58  ;;  %v8501_v44 = vld [vmem:[#allocation10 + $0x1c4] sm:$0xf]  ;;  %v6670_v58 = vor.u32 %v8451_v45, %v6667_v46  ;;  %v2390_v45 = vld [vmem:[#allocation11] sm:$0x3]  ;;  %v3845_v46 = vpop.f32.mrf.mxu3 }
 0x33b   : > { %4109 = vmatpush.bf16.msra.mxu0 %v6894_v50  ;;  %4046 = vmatpush.bf16.msrb.mxu3 %v7706_v52  ;;  %v6870_v1 = vor.u32 %v8501_v44, %v6867_v33  ;;  %v7673_v50 = vld [vmem:[#allocation10 + $0x810] sm:$0xf]  ;;  %v8449_v52 = vld [vmem:[#allocation10 + $0x24] sm:$0xf]  ;;  %v6830_v44 = vor.u32 %v8491_v18, %v6827_v19  ;;  %v2392_v49 = vperm.slane %v2390_v45, 0 }
 0x33c   : > { %v7674_v10 = vor.u32 %v8704_v56, %v7673_v50  ;;  %v8473_v33 = vld [vmem:[#allocation10 + $0xe4] sm:$0xf]  ;;  %v6955_v50 = vld [vmem:[#allocation10 + $0x278] sm:$0xf0]  ;;  %v6835_v56 = vld [vmem:[#allocation10 + $0x188] sm:$0xf0] }
 0x33d   : > { %v8469_v19 = vld [vmem:[#allocation10 + $0xc4] sm:$0xf] }
 0x33e   : > { %4071 = vmatpush.bf16.msra.mxu1 %v6694_v59  ;;  %4034 = vmatpush.bf16.msrb.mxu2 %v7634_v11  ;;  %v6659_v59 = vld [vmem:[#allocation10 + $0x28] sm:$0xf0]  ;;  %v2085_v9 = vpop.permute.xlu2 %2084  ;;  %v8702_v11 = vld [vmem:[#allocation10 + $0x804] sm:$0xf0] }
 0x33f   : > { %4110 = vmatpush.bf16.msra.mxu0 %v6886_v12  ;;  %4047 = vmatpush.bf16.msrb.mxu3 %v7698_v48  ;;  %v10160_v61 = vpop.permute.xlu1 %2082  ;;  %v6662_v43 = vor.u32 %v8449_v52, %v6659_v59  ;;  %v8497_v12 = vld [vmem:[#allocation10 + $0x1a4] sm:$0xf]  ;;  %v8447_v48 = vld [vmem:[#allocation10 + $0x14] sm:$0xf]  ;;  %v3846_v52 = vadd.f32 %v3845_v46, %v2392_v49  ;;  %v10172_v59 = vsel %vm1998_vm11, %v10139_v36, %v10154_v37  ;;  %v6811_v36 = vld [vmem:[#allocation10 + $0x158] sm:$0xf0] }
 0x340   : > { %v10166_v40 = vsel %vm1998_vm11, %v10160_v61, %v2085_v9  ;;  %v6854_v60 = vor.u32 %v8497_v12, %v6851_v13  ;;  %v3871_v9 = vpop.f32.mrf.mxu1  ;;  %v8487_v12 = vld [vmem:[#allocation10 + $0x154] sm:$0xf] }
 0x341   : > { %3987 = vmatmul.bf16.vlgmr.msra.gmra.mxu2 %v10152_v27  ;;  %4000 = vmatmul.bf16.vlgmr.msra.gmra.mxu3 %v10156_v38  ;;  %v3859_v13 = vadd.f32 %v10162_v62, %v3846_v52  ;;  %v6739_v62 = vld [vmem:[#allocation10 + $0xc8] sm:$0xf0]  ;;  %v8467_v46 = vld [vmem:[#allocation10 + $0xb4] sm:$0xf] }
 0x342   : > { %4072 = vmatpush.bf16.msra.mxu1 %v6686_v15  ;;  %4035 = vmatpush.bf16.msrb.mxu2 %v7626_v28  ;;  %v6651_v15 = vld [vmem:[#allocation10 + $0x18] sm:$0xf0]  ;;  %v8495_v28 = vld [vmem:[#allocation10 + $0x194] sm:$0xf] }
 0x343   : > { %4111 = vmatpush.bf16.msra.mxu0 %v6878_v31  ;;  %4048 = vmatpush.bf16.msrb.mxu3 %v7690_v39  ;;  %v7666_v31 = vor.u32 %v8702_v11, %v7665_v8  ;;  %v6654_v32 = vor.u32 %v8447_v48, %v6651_v15  ;;  %v8445_v39 = vld [vmem:[#allocation10 + $0x4] sm:$0xf]  ;;  %v7147_v8 = vld [vmem:[#allocation10 + $0x3f8] sm:$0xf0]  ;;  %v6838_v48 = vor.u32 %v8493_v55, %v6835_v56 }
 0x344   : > { %v6747_v11 = vld [vmem:[#allocation10 + $0xd8] sm:$0xf0]  ;;  %v8521_v15 = vld [vmem:[#allocation10 + $0x264] sm:$0xf]  ;;  %v7150_v17 = vor.u32 %v8571_v7, %v7147_v8  ;;  %v3872_v18 = vadd.f32 %v3871_v9, %v3859_v13  ;;  %v6734_v56 = vor.u32 %v8467_v46, %v6731_v42  ;;  %v6723_v8 = vld [vmem:[#allocation10 + $0xa8] sm:$0xf0] }
 0x345   : > { %v8481_v9 = vld [vmem:[#allocation10 + $0x124] sm:$0xf]  ;;  %v6907_v46 = vld [vmem:[#allocation10 + $0x218] sm:$0xf0] }
 0x346   : > { %4073 = vmatpush.bf16.msra.mxu1 %v6678_v30  ;;  %4036 = vmatpush.bf16.msrb.mxu2 %v7618_v47  ;;  %v6643_v30 = vld [vmem:[#allocation10 + $0x8] sm:$0xf0]  ;;  %v8489_v47 = vld [vmem:[#allocation10 + $0x164] sm:$0xf]  ;;  %v7083_v42 = vld [vmem:[#allocation10 + $0x378] sm:$0xf0] }
 0x347   : > { %4112 = vmatpush.bf16.msra.mxu0 %v6870_v1  ;;  %4049 = vmatpush.bf16.msrb.mxu3 %v7682_v2  ;;  %v6819_v1 = vld [vmem:[#allocation10 + $0x168] sm:$0xf0]  ;;  %v6846_v2 = vor.u32 %v8495_v28, %v6843_v34  ;;  %v6646_v53 = vor.u32 %v8445_v39, %v6643_v30  ;;  %v3847_v28 = vpop.f32.mrf.mxu3  ;;  %v8519_v39 = vld [vmem:[#allocation10 + $0x254] sm:$0xf]  ;;  %v6939_v30 = vld [vmem:[#allocation10 + $0x258] sm:$0xf0] }
 0x348   : > { %v6803_v34 = vld [vmem:[#allocation10 + $0x148] sm:$0xf0]  ;;  %v3873_v49 = vpop.f32.mrf.mxu1 }
 0x349   : > { %4065 = vmatmul.bf16.vlgmr.msrb.gmra.mxu0 %v10166_v40 }
 0x34a   : > { %4074 = vmatpush.bf16.msra.mxu1 %v6670_v58  ;;  %4037 = vmatpush.bf16.msrb.mxu2 %v7610_v63  ;;  %v8523_v58 = vld [vmem:[#allocation10 + $0x274] sm:$0xf]  ;;  %v6758_v63 = vor.u32 %v8473_v33, %v6755_v24  ;;  %v6742_v24 = vor.u32 %v8469_v19, %v6739_v62  ;;  %v6779_v19 = vld [vmem:[#allocation10 + $0x118] sm:$0xf0] }
 0x34b   : > { %4113 = vmatpush.bf16.msra.mxu0 %v6862_v54  ;;  %4050 = vmatpush.bf16.msrb.mxu3 %v7674_v10  ;;  %v6822_v54 = vor.u32 %v8489_v47, %v6819_v1  ;;  %v10177_v10 = vsel %vm1998_vm11, %v10154_v37, %v10160_v61  ;;  %v6750_v37 = vor.u32 %v8471_v6, %v6747_v11  ;;  %v8567_v47 = vld [vmem:[#allocation10 + $0x3d4] sm:$0xf]  ;;  %v7131_v1 = vld [vmem:[#allocation10 + $0x3d8] sm:$0xf0]  ;;  %v7123_v6 = vld [vmem:[#allocation10 + $0x3c8] sm:$0xf0] }
 0x34c   : > { %v6814_v61 = vor.u32 %v8487_v12, %v6811_v36  ;;  %v7134_v55 = vor.u32 %v8567_v47, %v7131_v1  ;;  %v6923_v11 = vld [vmem:[#allocation10 + $0x238] sm:$0xf0]  ;;  %v8539_v47 = vld [vmem:[#allocation10 + $0x2f4] sm:$0xf] }
 0x34d   : > { %v7019_v1 = vld [vmem:[#allocation10 + $0x2f8] sm:$0xf0] }
 0x34e   : > { %4075 = vmatpush.bf16.msra.mxu1 %v6662_v43  ;;  %4038 = vmatpush.bf16.msrb.mxu2 %v7602_v21  ;;  %v6958_v43 = vor.u32 %v8523_v58, %v6955_v50  ;;  %v8569_v21 = vld [vmem:[#allocation10 + $0x3e4] sm:$0xf]  ;;  %v6795_v58 = vld [vmem:[#allocation10 + $0x138] sm:$0xf0] }
 0x34f   : > { %4114 = vmatpush.bf16.msra.mxu0 %v6854_v60  ;;  %4051 = vmatpush.bf16.msrb.mxu3 %v7666_v31  ;;  %v7139_v60 = vld [vmem:[#allocation10 + $0x3e8] sm:$0xf0]  ;;  %v6950_v31 = vor.u32 %v8521_v15, %v6947_v16  ;;  %v8517_v50 = vld [vmem:[#allocation10 + $0x244] sm:$0xf]  ;;  %v8463_v15 = vld [vmem:[#allocation10 + $0x94] sm:$0xf] }
 0x350   : > { %v8563_v16 = vld [vmem:[#allocation10 + $0x3b4] sm:$0xf] }
 0x351   : > { %4039 = vmatmul.bf16.vlgmr.msrb.gmra.mxu2 %v10172_v59 }
 0x352   : > { %4076 = vmatpush.bf16.msra.mxu1 %v6654_v32  ;;  %4083 = vmatpush.bf16.msra.mxu2 %v6766_v41  ;;  %v8485_v32 = vld [vmem:[#allocation10 + $0x144] sm:$0xf] }
 0x353   : > { %4096 = vmatpush.bf16.msra.mxu3 %v6830_v44  ;;  %4115 = vmatpush.bf16.msra.mxu0 %v6846_v2  ;;  %v7142_v44 = vor.u32 %v8569_v21, %v7139_v60  ;;  %v6806_v45 = vor.u32 %v8485_v32, %v6803_v34  ;;  %v8483_v2 = vld [vmem:[#allocation10 + $0x134] sm:$0xf]  ;;  %v8513_v21 = vld [vmem:[#allocation10 + $0x224] sm:$0xf]  ;;  %v6915_v60 = vld [vmem:[#allocation10 + $0x228] sm:$0xf0] }
 0x354   : > { %4052 = vmatmul.bf16.vlgmr.msrb.gmra.mxu3 %v10177_v10  ;;  %v6798_v52 = vor.u32 %v8483_v2, %v6795_v58  ;;  %v6707_v34 = vld [vmem:[#allocation10 + $0x88] sm:$0xf0] }
 0x356   : > { %4077 = vmatpush.bf16.msra.mxu1 %v6646_v53  ;;  %4084 = vmatpush.bf16.msra.mxu2 %v6758_v63  ;;  %v3884_v41 = vpop.f32.mrf.mxu2  ;;  %v6931_v53 = vld [vmem:[#allocation10 + $0x248] sm:$0xf0]  ;;  %v8465_v63 = vld [vmem:[#allocation10 + $0xa4] sm:$0xf] }
 0x357   : > { %4097 = vmatpush.bf16.msra.mxu3 %v6822_v54  ;;  %4116 = vmatpush.bf16.msra.mxu0 %v6838_v48  ;;  %v10183_v33 = vadd.f32 %v3884_v41, %v3872_v18  ;;  %v8565_v54 = vld [vmem:[#allocation10 + $0x3c4] sm:$0xf]  ;;  %v6934_v7 = vor.u32 %v8517_v50, %v6931_v53  ;;  %v6726_v13 = vor.u32 %v8465_v63, %v6723_v8  ;;  %v8559_v50 = vld [vmem:[#allocation10 + $0x394] sm:$0xf]  ;;  %v6899_v63 = vld [vmem:[#allocation10 + $0x208] sm:$0xf0] }
 0x358   : > { %v7126_v36 = vor.u32 %v8565_v54, %v7123_v6  ;;  %v6918_v41 = vor.u32 %v8513_v21, %v6915_v60  ;;  %v8537_v6 = vld [vmem:[#allocation10 + $0x2e4] sm:$0xf]  ;;  %v8635_v21 = vld [vmem:[#allocation10 + $0x5f4] sm:$0xf]  ;;  %v7403_v60 = vld [vmem:[#allocation10 + $0x5f8] sm:$0xf0] }
 0x359   : > { %4078 = vmatmul.bf16.vlgmr.msra.gmra.mxu1 %v10071_v22  ;;  %v6942_v22 = vor.u32 %v8519_v39, %v6939_v30  ;;  %v8561_v39 = vld [vmem:[#allocation10 + $0x3a4] sm:$0xf]  ;;  %v7107_v30 = vld [vmem:[#allocation10 + $0x3a8] sm:$0xf0] }
 0x35a   : > { %4122 = vmatpush.bf16.msrb.mxu1 %v6958_v43  ;;  %4085 = vmatpush.bf16.msra.mxu2 %v6750_v37  ;;  %v8515_v43 = vld [vmem:[#allocation10 + $0x234] sm:$0xf]  ;;  %v6715_v37 = vld [vmem:[#allocation10 + $0x98] sm:$0xf0]  ;;  %v7110_v49 = vor.u32 %v8561_v39, %v7107_v30  ;;  %v8553_v8 = vld [vmem:[#allocation10 + $0x364] sm:$0xf]  ;;  %v7406_v30 = vor.u32 %v8635_v21, %v7403_v60 }
 0x35b   : > { %4161 = vmatpush.bf16.msrb.mxu0 %v7150_v17  ;;  %4098 = vmatpush.bf16.msra.mxu3 %v6814_v61  ;;  %v7115_v17 = vld [vmem:[#allocation10 + $0x3b8] sm:$0xf0]  ;;  %v6926_v18 = vor.u32 %v8515_v43, %v6923_v11  ;;  %v8479_v61 = vld [vmem:[#allocation10 + $0x114] sm:$0xf]  ;;  %v6718_v62 = vor.u32 %v8463_v15, %v6715_v37  ;;  %v7091_v15 = vld [vmem:[#allocation10 + $0x388] sm:$0xf0] }
 0x35c   : > { %4117 = vmatmul.bf16.vlgmr.msra.gmra.mxu0 %v10088_v14  ;;  %v6787_v14 = vld [vmem:[#allocation10 + $0x128] sm:$0xf0]  ;;  %v7118_v28 = vor.u32 %v8563_v16, %v7115_v17  ;;  %v6782_v32 = vor.u32 %v8479_v61, %v6779_v19  ;;  %v7211_v43 = vld [vmem:[#allocation10 + $0x478] sm:$0xf0]  ;;  %v8535_v16 = vld [vmem:[#allocation10 + $0x2d4] sm:$0xf] }
 0x35d   : > { %v6790_v48 = vor.u32 %v8481_v9, %v6787_v14  ;;  %v7075_v9 = vld [vmem:[#allocation10 + $0x368] sm:$0xf0]  ;;  %v8587_v14 = vld [vmem:[#allocation10 + $0x474] sm:$0xf]  ;;  %v7003_v17 = vld [vmem:[#allocation10 + $0x2d8] sm:$0xf0] }
 0x35e   : > { %4123 = vmatpush.bf16.msrb.mxu1 %v6950_v31  ;;  %4086 = vmatpush.bf16.msra.mxu2 %v6742_v24  ;;  %v3886_v12 = vpop.f32.mrf.mxu2  ;;  %v8461_v31 = vld [vmem:[#allocation10 + $0x84] sm:$0xf]  ;;  %v6771_v24 = vld [vmem:[#allocation10 + $0x108] sm:$0xf0]  ;;  %v7078_v37 = vor.u32 %v8553_v8, %v7075_v9  ;;  %v7214_v61 = vor.u32 %v8587_v14, %v7211_v43  ;;  %v8551_v19 = vld [vmem:[#allocation10 + $0x354] sm:$0xf] }
 0x35f   : > { %4162 = vmatpush.bf16.msrb.mxu0 %v7142_v44  ;;  %4099 = vmatpush.bf16.msra.mxu3 %v6806_v45  ;;  %v8477_v44 = vld [vmem:[#allocation10 + $0x104] sm:$0xf]  ;;  %v8511_v45 = vld [vmem:[#allocation10 + $0x214] sm:$0xf]  ;;  %v6710_v2 = vor.u32 %v8461_v31, %v6707_v34  ;;  %v7067_v31 = vld [vmem:[#allocation10 + $0x358] sm:$0xf0] }
 0x360   : > { %v6774_v58 = vor.u32 %v8477_v44, %v6771_v24  ;;  %v6910_v53 = vor.u32 %v8511_v45, %v6907_v46  ;;  %v8557_v12 = vld [vmem:[#allocation10 + $0x384] sm:$0xf]  ;;  %v6995_v44 = vld [vmem:[#allocation10 + $0x2c8] sm:$0xf0]  ;;  %v7070_v24 = vor.u32 %v8551_v19, %v7067_v31  ;;  %v8543_v60 = vld [vmem:[#allocation10 + $0x314] sm:$0xf] }
 0x361   : > { %v7094_v39 = vor.u32 %v8557_v12, %v7091_v15  ;;  %v8633_v46 = vld [vmem:[#allocation10 + $0x5e4] sm:$0xf]  ;;  %v6979_v43 = vld [vmem:[#allocation10 + $0x2a8] sm:$0xf0]  ;;  %v7371_v31 = vld [vmem:[#allocation10 + $0x5b8] sm:$0xf0] }
 0x362   : > { %4124 = vmatpush.bf16.msrb.mxu1 %v6942_v22  ;;  %4087 = vmatpush.bf16.msra.mxu2 %v6734_v56  ;;  %v8555_v22 = vld [vmem:[#allocation10 + $0x374] sm:$0xf]  ;;  %v7099_v56 = vld [vmem:[#allocation10 + $0x398] sm:$0xf0]  ;;  %v8529_v14 = vld [vmem:[#allocation10 + $0x2a4] sm:$0xf] }
 0x363   : > { %4163 = vmatpush.bf16.msrb.mxu0 %v7134_v55  ;;  %4100 = vmatpush.bf16.msra.mxu3 %v6798_v52  ;;  %v7022_v55 = vor.u32 %v8539_v47, %v7019_v1  ;;  %v8509_v52 = vld [vmem:[#allocation10 + $0x204] sm:$0xf]  ;;  %v7086_v54 = vor.u32 %v8555_v22, %v7083_v42  ;;  %v7102_v11 = vor.u32 %v8559_v50, %v7099_v56  ;;  %v7059_v47 = vld [vmem:[#allocation10 + $0x348] sm:$0xf0]  ;;  %v8583_v1 = vld [vmem:[#allocation10 + $0x454] sm:$0xf] }
 0x364   : > { %v6987_v50 = vld [vmem:[#allocation10 + $0x2b8] sm:$0xf0]  ;;  %v8547_v56 = vld [vmem:[#allocation10 + $0x334] sm:$0xf]  ;;  %v7043_v15 = vld [vmem:[#allocation10 + $0x328] sm:$0xf0] }
 0x366   : > { %4125 = vmatpush.bf16.msrb.mxu1 %v6934_v7  ;;  %4088 = vmatpush.bf16.msra.mxu2 %v6726_v13  ;;  %v7011_v7 = vld [vmem:[#allocation10 + $0x2e8] sm:$0xf0]  ;;  %v6902_v13 = vor.u32 %v8509_v52, %v6899_v63  ;;  %v8631_v52 = vld [vmem:[#allocation10 + $0x5d4] sm:$0xf]  ;;  %v7387_v63 = vld [vmem:[#allocation10 + $0x5d8] sm:$0xf0] }
 0x367   : > { %4164 = vmatpush.bf16.msrb.mxu0 %v7126_v36  ;;  %4101 = vmatpush.bf16.msra.mxu3 %v6790_v48  ;;  %v7014_v48 = vor.u32 %v8537_v6, %v7011_v7  ;;  %v7051_v6 = vld [vmem:[#allocation10 + $0x338] sm:$0xf0]  ;;  %v7187_v7 = vld [vmem:[#allocation10 + $0x448] sm:$0xf0]  ;;  %v7390_v9 = vor.u32 %v8631_v52, %v7387_v63  ;;  %v8623_v63 = vld [vmem:[#allocation10 + $0x594] sm:$0xf] }
 0x368   : > { %v3897_v36 = vpop.f32.mrf.mxu3 }
 0x36a   : > { %4126 = vmatpush.bf16.msrb.mxu1 %v6926_v18  ;;  %4089 = vmatpush.bf16.msra.mxu2 %v6718_v62  ;;  %v3898_v18 = vadd.f32 %v3897_v36, %v10183_v33  ;;  %v8585_v62 = vld [vmem:[#allocation10 + $0x464] sm:$0xf]  ;;  %v7006_v33 = vor.u32 %v8535_v16, %v7003_v17  ;;  %v8579_v16 = vld [vmem:[#allocation10 + $0x434] sm:$0xf]  ;;  %v7179_v17 = vld [vmem:[#allocation10 + $0x438] sm:$0xf0] }
 0x36b   : > { %4165 = vmatpush.bf16.msrb.mxu0 %v7118_v28  ;;  %4102 = vmatpush.bf16.msra.mxu3 %v6782_v32  ;;  %v3910_v28 = vpop.f32.mrf.mxu0  ;;  %v7203_v32 = vld [vmem:[#allocation10 + $0x468] sm:$0xf0]  ;;  %v8545_v36 = vld [vmem:[#allocation10 + $0x324] sm:$0xf]  ;;  %v7182_v21 = vor.u32 %v8579_v16, %v7179_v17 }
 0x36c   : > { %v10189_v34 = vadd.f32 %v3910_v28, %v3898_v18  ;;  %v7206_v45 = vor.u32 %v8585_v62, %v7203_v32  ;;  %v7046_v19 = vor.u32 %v8545_v36, %v7043_v15  ;;  %v8627_v28 = vld [vmem:[#allocation10 + $0x5b4] sm:$0xf]  ;;  %v7035_v32 = vld [vmem:[#allocation10 + $0x318] sm:$0xf0]  ;;  %v8621_v16 = vld [vmem:[#allocation10 + $0x584] sm:$0xf] }
 0x36d   : > { %v7347_v17 = vld [vmem:[#allocation10 + $0x588] sm:$0xf0] }
 0x36e   : > { %4127 = vmatpush.bf16.msrb.mxu1 %v6918_v41  ;;  %4090 = vmatpush.bf16.msra.mxu2 %v6710_v2  ;;  %v8533_v41 = vld [vmem:[#allocation10 + $0x2c4] sm:$0xf] }
 0x36f   : > { %4166 = vmatpush.bf16.msrb.mxu0 %v7110_v49  ;;  %4103 = vmatpush.bf16.msra.mxu3 %v6774_v58  ;;  %v7195_v49 = vld [vmem:[#allocation10 + $0x458] sm:$0xf0]  ;;  %v6998_v42 = vor.u32 %v8533_v41, %v6995_v44  ;;  %v8531_v58 = vld [vmem:[#allocation10 + $0x2b4] sm:$0xf]  ;;  %v7374_v41 = vor.u32 %v8627_v28, %v7371_v31  ;;  %v8525_v44 = vld [vmem:[#allocation10 + $0x284] sm:$0xf] }
 0x370   : > { %v3899_v22 = vpop.f32.mrf.mxu3  ;;  %v6990_v8 = vor.u32 %v8531_v58, %v6987_v50  ;;  %v8619_v58 = vld [vmem:[#allocation10 + $0x574] sm:$0xf]  ;;  %v7339_v50 = vld [vmem:[#allocation10 + $0x578] sm:$0xf0] }
 0x371   : > { %4091 = vmatmul.bf16.vlgmr.msra.gmra.mxu2 %v10053_v23  ;;  %v8549_v23 = vld [vmem:[#allocation10 + $0x344] sm:$0xf]  ;;  %v7163_v22 = vld [vmem:[#allocation10 + $0x418] sm:$0xf0]  ;;  %v8615_v28 = vld [vmem:[#allocation10 + $0x554] sm:$0xf] }
 0x372   : > { %4128 = vmatpush.bf16.msrb.mxu1 %v6910_v53  ;;  %4135 = vmatpush.bf16.msrb.mxu2 %v7022_v55  ;;  %v7062_v53 = vor.u32 %v8549_v23, %v7059_v47  ;;  %v7198_v55 = vor.u32 %v8583_v1, %v7195_v49  ;;  %v7038_v23 = vor.u32 %v8543_v60, %v7035_v32  ;;  %v8625_v47 = vld [vmem:[#allocation10 + $0x5a4] sm:$0xf]  ;;  %v7363_v1 = vld [vmem:[#allocation10 + $0x5a8] sm:$0xf0]  ;;  %v8575_v49 = vld [vmem:[#allocation10 + $0x414] sm:$0xf] }
 0x373   : > { %4148 = vmatpush.bf16.msrb.mxu3 %v7086_v54  ;;  %4167 = vmatpush.bf16.msrb.mxu0 %v7102_v11  ;;  %v3912_v54 = vpop.f32.mrf.mxu0  ;;  %v7054_v11 = vor.u32 %v8547_v56, %v7051_v6  ;;  %v7166_v52 = vor.u32 %v8575_v49, %v7163_v22  ;;  %v7259_v60 = vld [vmem:[#allocation10 + $0x4d8] sm:$0xf0]  ;;  %v7350_v32 = vor.u32 %v8621_v16, %v7347_v17  ;;  %v8591_v17 = vld [vmem:[#allocation10 + $0x494] sm:$0xf] }
 0x374   : > { %4104 = vmatmul.bf16.vlgmr.msra.gmra.mxu3 %v10083_v4  ;;  %v7395_v4 = vld [vmem:[#allocation10 + $0x5e8] sm:$0xf0]  ;;  %v7355_v54 = vld [vmem:[#allocation10 + $0x598] sm:$0xf0] }
 0x375   : > { %v7398_v2 = vor.u32 %v8633_v46, %v7395_v4  ;;  %v7027_v4 = vld [vmem:[#allocation10 + $0x308] sm:$0xf0]  ;;  %v7358_v36 = vor.u32 %v8623_v63, %v7355_v54  ;;  %v7323_v31 = vld [vmem:[#allocation10 + $0x558] sm:$0xf0] }
 0x376   : > { %4129 = vmatpush.bf16.msrb.mxu1 %v6902_v13  ;;  %4136 = vmatpush.bf16.msrb.mxu2 %v7014_v48  ;;  %v8629_v13 = vld [vmem:[#allocation10 + $0x5c4] sm:$0xf]  ;;  %v7379_v48 = vld [vmem:[#allocation10 + $0x5c8] sm:$0xf0] }
 0x377   : > { %4149 = vmatpush.bf16.msrb.mxu3 %v7078_v37  ;;  %4168 = vmatpush.bf16.msrb.mxu0 %v7094_v39  ;;  %v7382_v18 = vor.u32 %v8629_v13, %v7379_v48  ;;  %v8527_v37 = vld [vmem:[#allocation10 + $0x294] sm:$0xf]  ;;  %v8577_v39 = vld [vmem:[#allocation10 + $0x424] sm:$0xf]  ;;  %v7467_v48 = vld [vmem:[#allocation10 + $0x678] sm:$0xf0] }
 0x378   : > { %v8651_v13 = vld [vmem:[#allocation10 + $0x674] sm:$0xf]  ;;  %v7443_v63 = vld [vmem:[#allocation10 + $0x648] sm:$0xf0] }
 0x379   : > { %4130 = vmatmul.bf16.vlgmr.msrb.gmra.mxu1 %v10098_v20  ;;  %v8581_v20 = vld [vmem:[#allocation10 + $0x444] sm:$0xf] }
 0x37a   : > { %4174 = vmatpush.bf16.msra.mxu1 %v7214_v61  ;;  %4137 = vmatpush.bf16.msrb.mxu2 %v7006_v33  ;;  %v7190_v12 = vor.u32 %v8581_v20, %v7187_v7  ;;  %v6971_v61 = vld [vmem:[#allocation10 + $0x298] sm:$0xf0]  ;;  %v7171_v33 = vld [vmem:[#allocation10 + $0x428] sm:$0xf0]  ;;  %v7342_v7 = vor.u32 %v8619_v58, %v7339_v50  ;;  %v8695_v58 = vld [vmem:[#allocation10 + $0x7d4] sm:$0xf] }
 0x37b   : > { %4213 = vmatpush.bf16.msra.mxu0 %v7406_v30  ;;  %4150 = vmatpush.bf16.msrb.mxu3 %v7070_v24  ;;  %v10193_v62 = vpop.f32.mrf.mxu0  ;;  %v6974_v30 = vor.u32 %v8527_v37, %v6971_v61  ;;  %v6963_v24 = vld [vmem:[#allocation10 + $0x288] sm:$0xf0]  ;;  %v7174_v46 = vor.u32 %v8577_v39, %v7171_v33  ;;  %v8599_v37 = vld [vmem:[#allocation10 + $0x4d4] sm:$0xf]  ;;  %v8649_v39 = vld [vmem:[#allocation10 + $0x664] sm:$0xf] }
 0x37c   : > { %4169 = vmatmul.bf16.vlgmr.msrb.gmra.mxu0 %v10129_v25  ;;  %v6982_v25 = vor.u32 %v8529_v14, %v6979_v43  ;;  %v8601_v14 = vld [vmem:[#allocation10 + $0x4e4] sm:$0xf]  ;;  %v7267_v43 = vld [vmem:[#allocation10 + $0x4e8] sm:$0xf0]  ;;  %v8699_v61 = vld [vmem:[#allocation10 + $0x7f4] sm:$0xf] }
 0x37d   : > { %v7459_v33 = vld [vmem:[#allocation10 + $0x668] sm:$0xf0]  ;;  %v7643_v50 = vld [vmem:[#allocation10 + $0x7d8] sm:$0xf0] }
 0x37e   : > { %4175 = vmatpush.bf16.msra.mxu1 %v7206_v45  ;;  %4138 = vmatpush.bf16.msrb.mxu2 %v6998_v42  ;;  %v8541_v45 = vld [vmem:[#allocation10 + $0x304] sm:$0xf]  ;;  %v8603_v42 = vld [vmem:[#allocation10 + $0x4f4] sm:$0xf] }
 0x37f   : > { %4214 = vmatpush.bf16.msra.mxu0 %v7398_v2  ;;  %4151 = vmatpush.bf16.msrb.mxu3 %v7062_v53  ;;  %v7275_v2 = vld [vmem:[#allocation10 + $0x4f8] sm:$0xf0]  ;;  %v6966_v53 = vor.u32 %v8525_v44, %v6963_v24  ;;  %v7030_v56 = vor.u32 %v8541_v45, %v7027_v4  ;;  %v7326_v44 = vor.u32 %v8615_v28, %v7323_v31  ;;  %v8597_v24 = vld [vmem:[#allocation10 + $0x4c4] sm:$0xf]  ;;  %v7427_v28 = vld [vmem:[#allocation10 + $0x628] sm:$0xf0] }
 0x380   : > { %v7278_v20 = vor.u32 %v8603_v42, %v7275_v2  ;;  %v8697_v45 = vld [vmem:[#allocation10 + $0x7e4] sm:$0xf]  ;;  %v8595_v2 = vld [vmem:[#allocation10 + $0x4b4] sm:$0xf] }
 0x381   : > { %v8613_v4 = vld [vmem:[#allocation10 + $0x544] sm:$0xf] }
 0x382   : > { %4176 = vmatpush.bf16.msra.mxu1 %v7198_v55  ;;  %4139 = vmatpush.bf16.msrb.mxu2 %v6990_v8  ;;  %v7366_v55 = vor.u32 %v8625_v47, %v7363_v1  ;;  %v8573_v8 = vld [vmem:[#allocation10 + $0x404] sm:$0xf]  ;;  %v7315_v47 = vld [vmem:[#allocation10 + $0x548] sm:$0xf0]  ;;  %v7451_v1 = vld [vmem:[#allocation10 + $0x658] sm:$0xf0] }
 0x383   : > { %4215 = vmatpush.bf16.msra.mxu0 %v7390_v9  ;;  %4152 = vmatpush.bf16.msrb.mxu3 %v7054_v11  ;;  %v3964_v6 = vpop.f32.mrf.mxu0  ;;  %v7155_v9 = vld [vmem:[#allocation10 + $0x408] sm:$0xf0]  ;;  %v8617_v11 = vld [vmem:[#allocation10 + $0x564] sm:$0xf]  ;;  %v7318_v42 = vor.u32 %v8613_v4, %v7315_v47  ;;  %v7419_v4 = vld [vmem:[#allocation10 + $0x618] sm:$0xf0] }
 0x384   : > { %v7158_v15 = vor.u32 %v8573_v8, %v7155_v9  ;;  %v7646_v6 = vor.u32 %v8695_v58, %v7643_v50  ;;  %v8593_v8 = vld [vmem:[#allocation10 + $0x4a4] sm:$0xf]  ;;  %v8667_v47 = vld [vmem:[#allocation10 + $0x6f4] sm:$0xf] }
 0x385   : > { %v8693_v9 = vld [vmem:[#allocation10 + $0x7c4] sm:$0xf]  ;;  %v8687_v58 = vld [vmem:[#allocation10 + $0x794] sm:$0xf] }
 0x386   : > { %4177 = vmatpush.bf16.msra.mxu1 %v7190_v12  ;;  %4140 = vmatpush.bf16.msrb.mxu2 %v6982_v25  ;;  %v7331_v12 = vld [vmem:[#allocation10 + $0x568] sm:$0xf0]  ;;  %v7270_v25 = vor.u32 %v8601_v14, %v7267_v43 }
 0x387   : > { %4216 = vmatpush.bf16.msra.mxu0 %v7382_v18  ;;  %4153 = vmatpush.bf16.msrb.mxu3 %v7046_v19  ;;  %v7334_v18 = vor.u32 %v8617_v11, %v7331_v12  ;;  %v7659_v19 = vld [vmem:[#allocation10 + $0x7f8] sm:$0xf0]  ;;  %v7635_v14 = vld [vmem:[#allocation10 + $0x7c8] sm:$0xf0]  ;;  %v8609_v11 = vld [vmem:[#allocation10 + $0x524] sm:$0xf] }
 0x388   : > { %v7299_v12 = vld [vmem:[#allocation10 + $0x528] sm:$0xf0] }
 0x389   : > { %v7302_v16 = vor.u32 %v8609_v11, %v7299_v12  ;;  %v8685_v12 = vld [vmem:[#allocation10 + $0x784] sm:$0xf] }
 0x38a   : > { %4178 = vmatpush.bf16.msra.mxu1 %v7182_v21  ;;  %4141 = vmatpush.bf16.msrb.mxu2 %v6974_v30  ;;  %v7470_v21 = vor.u32 %v8651_v13, %v7467_v48  ;;  %v7662_v30 = vor.u32 %v8699_v61, %v7659_v19  ;;  %v7435_v13 = vld [vmem:[#allocation10 + $0x638] sm:$0xf0]  ;;  %v7638_v48 = vor.u32 %v8693_v9, %v7635_v14  ;;  %v8607_v19 = vld [vmem:[#allocation10 + $0x514] sm:$0xf] }
 0x38b   : > { %4217 = vmatpush.bf16.msra.mxu0 %v7374_v41  ;;  %4154 = vmatpush.bf16.msrb.mxu3 %v7038_v23  ;;  %v7262_v41 = vor.u32 %v8599_v37, %v7259_v60  ;;  %v7651_v23 = vld [vmem:[#allocation10 + $0x7e8] sm:$0xf0]  ;;  %v7227_v61 = vld [vmem:[#allocation10 + $0x498] sm:$0xf0]  ;;  %v8641_v60 = vld [vmem:[#allocation10 + $0x624] sm:$0xf] }
 0x38c   : > { %v7654_v49 = vor.u32 %v8697_v45, %v7651_v23  ;;  %v7430_v45 = vor.u32 %v8641_v60, %v7427_v28  ;;  %v8605_v23 = vld [vmem:[#allocation10 + $0x504] sm:$0xf]  ;;  %v8715_v9 = vld [vmem:[#allocation10 + $0x874] sm:$0xf]  ;;  %v7723_v14 = vld [vmem:[#allocation10 + $0x878] sm:$0xf0] }
 0x38d   : > { %v8661_v28 = vld [vmem:[#allocation10 + $0x6c4] sm:$0xf] }
 0x38e   : > { %4179 = vmatpush.bf16.msra.mxu1 %v7174_v46  ;;  %4142 = vmatpush.bf16.msrb.mxu2 %v6966_v53  ;;  %v7251_v46 = vld [vmem:[#allocation10 + $0x4c8] sm:$0xf0] }
 0x38f   : > { %4218 = vmatpush.bf16.msra.mxu0 %v7366_v55  ;;  %4155 = vmatpush.bf16.msrb.mxu3 %v7030_v56  ;;  %v7254_v22 = vor.u32 %v8597_v24, %v7251_v46  ;;  %v7243_v55 = vld [vmem:[#allocation10 + $0x4b8] sm:$0xf0]  ;;  %v8611_v56 = vld [vmem:[#allocation10 + $0x534] sm:$0xf]  ;;  %v7619_v24 = vld [vmem:[#allocation10 + $0x7a8] sm:$0xf0] }
 0x390   : > { %v8639_v46 = vld [vmem:[#allocation10 + $0x614] sm:$0xf] }
 0x391   : > { %4143 = vmatmul.bf16.vlgmr.msrb.gmra.mxu2 %v10105_v57  ;;  %v7462_v57 = vor.u32 %v8649_v39, %v7459_v33  ;;  %v8589_v39 = vld [vmem:[#allocation10 + $0x484] sm:$0xf]  ;;  %v7230_v33 = vor.u32 %v8591_v17, %v7227_v61  ;;  %v7422_v50 = vor.u32 %v8639_v46, %v7419_v4  ;;  %v8679_v17 = vld [vmem:[#allocation10 + $0x754] sm:$0xf]  ;;  %v7699_v4 = vld [vmem:[#allocation10 + $0x848] sm:$0xf0] }
 0x392   : > { %4180 = vmatpush.bf16.msra.mxu1 %v7166_v52  ;;  %4187 = vmatpush.bf16.msra.mxu2 %v7278_v20  ;;  %v7307_v52 = vld [vmem:[#allocation10 + $0x538] sm:$0xf0]  ;;  %v7246_v20 = vor.u32 %v8595_v2, %v7243_v55  ;;  %v8709_v46 = vld [vmem:[#allocation10 + $0x844] sm:$0xf] }
 0x393   : > { %4200 = vmatpush.bf16.msra.mxu3 %v7342_v7  ;;  %4219 = vmatpush.bf16.msra.mxu0 %v7358_v36  ;;  %v7310_v7 = vor.u32 %v8611_v56, %v7307_v52  ;;  %v8643_v36 = vld [vmem:[#allocation10 + $0x634] sm:$0xf]  ;;  %v7611_v55 = vld [vmem:[#allocation10 + $0x798] sm:$0xf0]  ;;  %v8637_v56 = vld [vmem:[#allocation10 + $0x604] sm:$0xf] }
 0x394   : > { %4156 = vmatmul.bf16.vlgmr.msrb.gmra.mxu3 %v10118_v35  ;;  %v8647_v35 = vld [vmem:[#allocation10 + $0x654] sm:$0xf]  ;;  %v7438_v37 = vor.u32 %v8643_v36, %v7435_v13  ;;  %v7411_v52 = vld [vmem:[#allocation10 + $0x608] sm:$0xf0] }
 0x395   : > { %v7454_v53 = vor.u32 %v8647_v35, %v7451_v1  ;;  %v7531_v35 = vld [vmem:[#allocation10 + $0x6f8] sm:$0xf0]  ;;  %v7603_v36 = vld [vmem:[#allocation10 + $0x788] sm:$0xf0] }
 0x396   : > { %4181 = vmatpush.bf16.msra.mxu1 %v7158_v15  ;;  %4188 = vmatpush.bf16.msra.mxu2 %v7270_v25  ;;  %v10199_v54 = vpop.f32.mrf.mxu1  ;;  %v8691_v25 = vld [vmem:[#allocation10 + $0x7b4] sm:$0xf]  ;;  %v7606_v61 = vor.u32 %v8685_v12, %v7603_v36 }
 0x397   : > { %4201 = vmatpush.bf16.msra.mxu3 %v7334_v18  ;;  %4220 = vmatpush.bf16.msra.mxu0 %v7350_v32  ;;  %v7627_v18 = vld [vmem:[#allocation10 + $0x7b8] sm:$0xf0] }
 0x398   : > { %v7630_v32 = vor.u32 %v8691_v25, %v7627_v18  ;;  %v7579_v25 = vld [vmem:[#allocation10 + $0x758] sm:$0xf0]  ;;  %v8713_v18 = vld [vmem:[#allocation10 + $0x864] sm:$0xf] }
 0x399   : > { %4182 = vmatmul.bf16.vlgmr.msra.gmra.mxu1 %v10132_v26  ;;  %v8645_v26 = vld [vmem:[#allocation10 + $0x644] sm:$0xf] }
 0x39a   : > { %4226 = vmatpush.bf16.msrb.mxu1 %v7470_v21  ;;  %4189 = vmatpush.bf16.msra.mxu2 %v7262_v41  ;;  %v7446_v43 = vor.u32 %v8645_v26, %v7443_v63  ;;  %v7291_v21 = vld [vmem:[#allocation10 + $0x518] sm:$0xf0]  ;;  %v7219_v41 = vld [vmem:[#allocation10 + $0x488] sm:$0xf0]  ;;  %v8665_v63 = vld [vmem:[#allocation10 + $0x6e4] sm:$0xf] }
 0x39b   : > { %4265 = vmatpush.bf16.msrb.mxu0 %v7662_v30  ;;  %4202 = vmatpush.bf16.msra.mxu3 %v7326_v44  ;;  %v7294_v30 = vor.u32 %v8607_v19, %v7291_v21  ;;  %v8689_v44 = vld [vmem:[#allocation10 + $0x7a4] sm:$0xf]  ;;  %v7582_v21 = vor.u32 %v8679_v17, %v7579_v25 }
 0x39c   : > { %4221 = vmatmul.bf16.vlgmr.msra.gmra.mxu0 %v10152_v27  ;;  %v7235_v27 = vld [vmem:[#allocation10 + $0x4a8] sm:$0xf0]  ;;  %v7622_v1 = vor.u32 %v8689_v44, %v7619_v24  ;;  %v8659_v24 = vld [vmem:[#allocation10 + $0x6b4] sm:$0xf] }
 0x39d   : > { %v7238_v15 = vor.u32 %v8593_v8, %v7235_v27  ;;  %v7587_v8 = vld [vmem:[#allocation10 + $0x768] sm:$0xf0]  ;;  %v7414_v27 = vor.u32 %v8637_v56, %v7411_v52  ;;  %v8707_v56 = vld [vmem:[#allocation10 + $0x834] sm:$0xf]  ;;  %v7691_v52 = vld [vmem:[#allocation10 + $0x838] sm:$0xf0] }
 0x39e   : > { %4227 = vmatpush.bf16.msrb.mxu1 %v7462_v57  ;;  %4190 = vmatpush.bf16.msra.mxu2 %v7254_v22  ;;  %v3925_v31 = vpop.f32.mrf.mxu1  ;;  %v7283_v57 = vld [vmem:[#allocation10 + $0x508] sm:$0xf0]  ;;  %v7595_v22 = vld [vmem:[#allocation10 + $0x778] sm:$0xf0] }
 0x39f   : > { %4266 = vmatpush.bf16.msrb.mxu0 %v7654_v49  ;;  %4203 = vmatpush.bf16.msra.mxu3 %v7318_v42  ;;  %v8683_v49 = vld [vmem:[#allocation10 + $0x774] sm:$0xf]  ;;  %v7222_v42 = vor.u32 %v8589_v39, %v7219_v41  ;;  %v7286_v2 = vor.u32 %v8605_v23, %v7283_v57  ;;  %v7507_v31 = vld [vmem:[#allocation10 + $0x6c8] sm:$0xf0]  ;;  %v7563_v57 = vld [vmem:[#allocation10 + $0x738] sm:$0xf0] }
 0x3a0   : > { %v7598_v26 = vor.u32 %v8683_v49, %v7595_v22  ;;  %v8675_v23 = vld [vmem:[#allocation10 + $0x734] sm:$0xf] }
 0x3a1   : > { %v7566_v22 = vor.u32 %v8675_v23, %v7563_v57 }
 0x3a2   : > { %4228 = vmatpush.bf16.msrb.mxu1 %v7454_v53  ;;  %4191 = vmatpush.bf16.msra.mxu2 %v7246_v20  ;;  %v7534_v53 = vor.u32 %v8667_v47, %v7531_v35  ;;  %v8681_v20 = vld [vmem:[#allocation10 + $0x764] sm:$0xf]  ;;  %v3924_v47 = vadd.f32 %v10199_v54, %v10189_v34 }
 0x3a3   : > { %4267 = vmatpush.bf16.msrb.mxu0 %v7646_v6  ;;  %4204 = vmatpush.bf16.msra.mxu3 %v7310_v7  ;;  %v7523_v6 = vld [vmem:[#allocation10 + $0x6e8] sm:$0xf0]  ;;  %v7590_v13 = vor.u32 %v8681_v20, %v7587_v8  ;;  %v8655_v20 = vld [vmem:[#allocation10 + $0x694] sm:$0xf]  ;;  %v7483_v8 = vld [vmem:[#allocation10 + $0x698] sm:$0xf0] }
 0x3a4   : > { %v7526_v11 = vor.u32 %v8665_v63, %v7523_v6  ;;  %v7694_v6 = vor.u32 %v8707_v56, %v7691_v52  ;;  %v7486_v36 = vor.u32 %v8655_v20, %v7483_v8  ;;  %v8721_v56 = vld [vmem:[#allocation10 + $0x8a4] sm:$0xf]  ;;  %v7747_v52 = vld [vmem:[#allocation10 + $0x8a8] sm:$0xf0]  ;;  %v8719_v20 = vld [vmem:[#allocation10 + $0x894] sm:$0xf] }
 0x3a5   : > { %v7739_v8 = vld [vmem:[#allocation10 + $0x898] sm:$0xf0] }
 0x3a6   : > { %4229 = vmatpush.bf16.msrb.mxu1 %v7446_v43  ;;  %4192 = vmatpush.bf16.msra.mxu2 %v7238_v15  ;;  %v10201_v7 = vpop.f32.mrf.mxu1  ;;  %v7614_v43 = vor.u32 %v8687_v58, %v7611_v55  ;;  %v8663_v15 = vld [vmem:[#allocation10 + $0x6d4] sm:$0xf]  ;;  %v7491_v58 = vld [vmem:[#allocation10 + $0x6a8] sm:$0xf0] }
 0x3a7   : > { %4268 = vmatpush.bf16.msrb.mxu0 %v7638_v48  ;;  %4205 = vmatpush.bf16.msra.mxu3 %v7302_v16  ;;  %v7726_v48 = vor.u32 %v8715_v9, %v7723_v14  ;;  %v7515_v16 = vld [vmem:[#allocation10 + $0x6d8] sm:$0xf0]  ;;  %v7555_v55 = vld [vmem:[#allocation10 + $0x728] sm:$0xf0]  ;;  %v8671_v9 = vld [vmem:[#allocation10 + $0x714] sm:$0xf] }
 0x3a8   : > { %v7518_v19 = vor.u32 %v8663_v15, %v7515_v16  ;;  %v7547_v14 = vld [vmem:[#allocation10 + $0x718] sm:$0xf0]  ;;  %v8653_v15 = vld [vmem:[#allocation10 + $0x684] sm:$0xf] }
 0x3a9   : > { %v8669_v16 = vld [vmem:[#allocation10 + $0x704] sm:$0xf] }
 0x3aa   : > { %4230 = vmatpush.bf16.msrb.mxu1 %v7438_v37  ;;  %4193 = vmatpush.bf16.msra.mxu2 %v7230_v33  ;;  %v7715_v37 = vld [vmem:[#allocation10 + $0x868] sm:$0xf0] }
 0x3ab   : > { %4269 = vmatpush.bf16.msrb.mxu0 %v7630_v32  ;;  %4206 = vmatpush.bf16.msra.mxu3 %v7294_v30  ;;  %v7718_v60 = vor.u32 %v8713_v18, %v7715_v37  ;;  %v8677_v32 = vld [vmem:[#allocation10 + $0x744] sm:$0xf]  ;;  %v7571_v33 = vld [vmem:[#allocation10 + $0x748] sm:$0xf0]  ;;  %v7707_v30 = vld [vmem:[#allocation10 + $0x858] sm:$0xf0] }
 0x3ac   : > { %v7574_v41 = vor.u32 %v8677_v32, %v7571_v33  ;;  %v7539_v18 = vld [vmem:[#allocation10 + $0x708] sm:$0xf0]  ;;  %v8703_v37 = vld [vmem:[#allocation10 + $0x814] sm:$0xf] }
 0x3ad   : > { %v7667_v33 = vld [vmem:[#allocation10 + $0x808] sm:$0xf0] }
 0x3ae   : > { %4231 = vmatpush.bf16.msrb.mxu1 %v7430_v45  ;;  %4194 = vmatpush.bf16.msra.mxu2 %v7222_v42  ;;  %v3977_v39 = vpop.f32.mrf.mxu1  ;;  %v7499_v45 = vld [vmem:[#allocation10 + $0x6b8] sm:$0xf0]  ;;  %v7702_v42 = vor.u32 %v8709_v46, %v7699_v4  ;;  %v8727_v46 = vld [vmem:[#allocation10 + $0x8d4] sm:$0xf] }
 0x3af   : > { %4270 = vmatpush.bf16.msrb.mxu0 %v7622_v1  ;;  %4207 = vmatpush.bf16.msra.mxu3 %v7286_v2  ;;  %v7502_v1 = vor.u32 %v8659_v24, %v7499_v45  ;;  %v8657_v2 = vld [vmem:[#allocation10 + $0x6a4] sm:$0xf]  ;;  %v7771_v4 = vld [vmem:[#allocation10 + $0x8d8] sm:$0xf0] }
 0x3b0   : > { %v7494_v54 = vor.u32 %v8657_v2, %v7491_v58  ;;  %v8701_v39 = vld [vmem:[#allocation10 + $0x804] sm:$0xf]  ;;  %v7755_v58 = vld [vmem:[#allocation10 + $0x8b8] sm:$0xf0] }
 0x3b1   : > { %4195 = vmatmul.bf16.vlgmr.msra.gmra.mxu2 %v10110_v29  ;;  %v8711_v29 = vld [vmem:[#allocation10 + $0x854] sm:$0xf]  ;;  %v7670_v24 = vor.u32 %v8701_v39, %v7667_v33 }
 0x3b2   : > { %4232 = vmatpush.bf16.msrb.mxu1 %v7422_v50  ;;  %4239 = vmatpush.bf16.msrb.mxu2 %v7534_v53  ;;  %v7710_v44 = vor.u32 %v8711_v29, %v7707_v30  ;;  %v8673_v50 = vld [vmem:[#allocation10 + $0x724] sm:$0xf]  ;;  %v7779_v30 = vld [vmem:[#allocation10 + $0x8e8] sm:$0xf0] }
 0x3b3   : > { %4252 = vmatpush.bf16.msrb.mxu3 %v7598_v26  ;;  %4271 = vmatpush.bf16.msrb.mxu0 %v7614_v43  ;;  %v7558_v63 = vor.u32 %v8673_v50, %v7555_v55  ;;  %v8705_v43 = vld [vmem:[#allocation10 + $0x824] sm:$0xf] }
 0x3b4   : > { %4208 = vmatmul.bf16.vlgmr.msra.gmra.mxu3 %v10123_v0  ;;  %v7510_v0 = vor.u32 %v8661_v28, %v7507_v31  ;;  %v3949_v35 = vpop.f32.mrf.mxu3  ;;  %v7542_v28 = vor.u32 %v8669_v16, %v7539_v18  ;;  %v8729_v29 = vld [vmem:[#allocation10 + $0x8e4] sm:$0xf] }
 0x3b5   : > { %v7782_v23 = vor.u32 %v8729_v29, %v7779_v30 }
 0x3b6   : > { %4233 = vmatpush.bf16.msrb.mxu1 %v7414_v27  ;;  %4240 = vmatpush.bf16.msrb.mxu2 %v7526_v11  ;;  %v10209_v53 = vpop.f32.mrf.mxu0  ;;  %v7683_v27 = vld [vmem:[#allocation10 + $0x828] sm:$0xf0] }
 0x3b7   : > { %4253 = vmatpush.bf16.msrb.mxu3 %v7590_v13  ;;  %4272 = vmatpush.bf16.msrb.mxu0 %v7606_v61  ;;  %v7550_v13 = vor.u32 %v8671_v9, %v7547_v14  ;;  %v7675_v61 = vld [vmem:[#allocation10 + $0x818] sm:$0xf0] }
 0x3b8   : > { %v7678_v31 = vor.u32 %v8703_v37, %v7675_v61 }
 0x3b9   : > { %4234 = vmatmul.bf16.vlgmr.msrb.gmra.mxu1 %v10156_v38  ;;  %v3936_v38 = vpop.f32.mrf.mxu2 }
 0x3ba   : > { %4278 = vmatpush.bf16.msra.mxu1 %v7726_v48  ;;  %4241 = vmatpush.bf16.msrb.mxu2 %v7518_v19  ;;  %v3937_v49 = vadd.f32 %v3936_v38, %v3924_v47  ;;  %v7686_v48 = vor.u32 %v8705_v43, %v7683_v27  ;;  %v8731_v19 = vld [vmem:[#allocation10 + $0x8f4] sm:$0xf]  ;;  %v7774_v47 = vor.u32 %v8727_v46, %v7771_v4  ;;  %v8717_v27 = vld [vmem:[#allocation10 + $0x884] sm:$0xf] }
 0x3bb   : > { %4254 = vmatpush.bf16.msrb.mxu3 %v7582_v21  ;;  %4273 = vmatmul.bf16.vlgmr.msrb.gmra.mxu0 %v10172_v59  ;;  %v10211_v59 = vpop.f32.mrf.mxu1  ;;  %v7787_v21 = vld [vmem:[#allocation10 + $0x8f8] sm:$0xf0] }
 0x3bc   : > { %v3950_v34 = vadd.f32 %v3949_v35, %v3937_v49  ;;  %v3951_v12 = vpop.f32.mrf.mxu3  ;;  %v7790_v32 = vor.u32 %v8731_v19, %v7787_v21  ;;  %v8725_v35 = vld [vmem:[#allocation10 + $0x8c4] sm:$0xf] }
 0x3be   : > { %4279 = vmatpush.bf16.msra.mxu1 %v7718_v60  ;;  %4242 = vmatpush.bf16.msrb.mxu2 %v7510_v0  ;;  %v3963_v26 = vadd.f32 %v10193_v62, %v3950_v34  ;;  %v7475_v62 = vld [vmem:[#allocation10 + $0x688] sm:$0xf0]  ;;  %v4016_v17 = vpop.f32.mrf.mxu0 }
 0x3bf   : > { %4255 = vmatpush.bf16.msrb.mxu3 %v7574_v41  ;;  %v7478_v60 = vor.u32 %v8653_v15, %v7475_v62  ;;  %v9073_v62 = vld [vmem:[#allocation11] sm:$0x3] }
 0x3c0   : > { %v2393_v16 = vperm.slane %v9073_v62, 1 }
 0x3c1   : > { %v3938_v11 = vpop.f32.mrf.mxu2 }
 0x3c2   : > { %4280 = vmatpush.bf16.msra.mxu1 %v7710_v44  ;;  %4243 = vmatpush.bf16.msrb.mxu2 %v7502_v1  ;;  %v3976_v44 = vadd.f32 %v10201_v7, %v3963_v26  ;;  %v7763_v1 = vld [vmem:[#allocation10 + $0x8c8] sm:$0xf0] }
 0x3c3   : > { %4256 = vmatpush.bf16.msrb.mxu3 %v7566_v22  ;;  %v4029_v25 = vpop.f32.mrf.mxu1  ;;  %v7731_v11 = vld [vmem:[#allocation10 + $0x888] sm:$0xf0] }
 0x3c4   : > { %v4001_v41 = vpop.f32.mrf.mxu3 }
 0x3c6   : > { %4281 = vmatpush.bf16.msra.mxu1 %v7702_v42  ;;  %4244 = vmatpush.bf16.msrb.mxu2 %v7494_v54  ;;  %v4066_v45 = vpop.f32.mrf.mxu0  ;;  %v7766_v42 = vor.u32 %v8725_v35, %v7763_v1 }
 0x3c7   : > { %4257 = vmatpush.bf16.msrb.mxu3 %v7558_v63  ;;  %v7750_v63 = vor.u32 %v8721_v56, %v7747_v52 }
 0x3c9   : > { %v3988_v0 = vpop.f32.mrf.mxu2 }
 0x3ca   : > { %4282 = vmatpush.bf16.msra.mxu1 %v7694_v6  ;;  %4245 = vmatpush.bf16.msrb.mxu2 %v7486_v36  ;;  %v3989_v57 = vadd.f32 %v3988_v0, %v3976_v44 }
 0x3cb   : > { %4258 = vmatpush.bf16.msrb.mxu3 %v7550_v13 }
 0x3cc   : > { %v4002_v38 = vadd.f32 %v4001_v41, %v3989_v57  ;;  %v4003_v49 = vpop.f32.mrf.mxu3 }
 0x3ce   : > { %4283 = vmatpush.bf16.msra.mxu1 %v7686_v48  ;;  %4246 = vmatpush.bf16.msrb.mxu2 %v7478_v60  ;;  %v4068_v22 = vpop.f32.mrf.mxu0  ;;  %v4015_v2 = vadd.f32 %v10209_v53, %v4002_v38  ;;  %v7742_v53 = vor.u32 %v8719_v20, %v7739_v8  ;;  %v7734_v48 = vor.u32 %v8717_v27, %v7731_v11 }
 0x3cf   : > { %4259 = vmatpush.bf16.msrb.mxu3 %v7542_v28 }
 0x3d0   : > { %v4028_v55 = vadd.f32 %v10211_v59, %v4015_v2 }
 0x3d1   : > { %4247 = vmatmul.bf16.vlgmr.msrb.gmra.mxu2 %v10142_v3  ;;  %v3990_v7 = vpop.f32.mrf.mxu2  ;;  %v8723_v3 = vld [vmem:[#allocation10 + $0x8b4] sm:$0xf] }
 0x3d2   : > { %4284 = vmatpush.bf16.msra.mxu1 %v7678_v31  ;;  %4291 = vmatpush.bf16.msra.mxu2 %v7790_v32  ;;  %v7758_v50 = vor.u32 %v8723_v3, %v7755_v58 }
 0x3d3   : > { %4260 = vmatmul.bf16.vlgmr.msrb.gmra.mxu3 %v10146_v5 }
 0x3d6   : > { %4285 = vmatpush.bf16.msra.mxu1 %v7670_v24  ;;  %4292 = vmatpush.bf16.msra.mxu2 %v7782_v23  ;;  %v4079_v5 = vpop.f32.mrf.mxu1 }
 0x3d7   : > { %v4053_v26 = vpop.f32.mrf.mxu3  ;;  %v4080_v17 = vadd.f32 %v4079_v5, %v2393_v16 }
 0x3d9   : > { %4286 = vmatmul.bf16.vlgmr.msra.gmra.mxu1 %v10177_v10  ;;  %v4040_v34 = vpop.f32.mrf.mxu2  ;;  %v4118_v10 = vpop.f32.mrf.mxu0 }
 0x3da   : > { %4293 = vmatpush.bf16.msra.mxu2 %v7774_v47  ;;  %v4041_v54 = vadd.f32 %v4040_v34, %v4028_v55 }
 0x3dc   : > { %v4054_v6 = vadd.f32 %v4053_v26, %v4041_v54  ;;  %v4346_v26 = vld [vmem:[#allocation14] sm:$0x3] }
 0x3de   : > { %4294 = vmatpush.bf16.msra.mxu2 %v7766_v42  ;;  %v4067_v9 = vadd.f32 %v4066_v45, %v4054_v6  ;;  %v4081_v43 = vpop.f32.mrf.mxu1  ;;  %v4308_v42 = vld [vmem:[#allocation13] sm:$0x3] }
 0x3df   : > { %v4055_v36 = vpop.f32.mrf.mxu3 }
 0x3e0   : > { %v4304_v14 = vmax.f32 %v4067_v9, 0.0 }
 0x3e1   : > { %v4042_v12 = vpop.f32.mrf.mxu2  ;;  %v4120_v13 = vpop.f32.mrf.mxu0 }
 0x3e2   : > { %4295 = vmatpush.bf16.msra.mxu2 %v7758_v50  ;;  %v4306_v59 = vpack.c.bf16 %v4304_v14, %v4304_v14 }
 0x3e4   : > { %v4314_v15 = vsel %vm1510_vm1, %v4306_v59, 0 }
 0x3e5   : > { %4326 = vmatpush.bf16.msra.mxu3 %v4314_v15  ;;  %4357 = vmatpush.bf16.msrb.mxu1 %v4314_v15 }
 0x3e6   : > { %4296 = vmatpush.bf16.msra.mxu2 %v7750_v63 }
 0x3e8   : > { %7791 = vmatmul.msk.bf16.vlgmr.msra.gmra.mxu3 %vm4309_vm12, %v4308_v42 }
 0x3e9   : > { %7793 = vmatmul.msk.bf16.vlgmr.msrb.gmra.mxu1 %vm4309_vm12, %v4346_v26 }
 0x3ea   : > { %4297 = vmatpush.bf16.msra.mxu2 %v7742_v53 }
 0x3ee   : > { %4298 = vmatpush.bf16.msra.mxu2 %v7734_v48 }
 0x3f1   : > { %4299 = vmatmul.bf16.vlgmr.msra.gmra.mxu2 %v10166_v40 }
 0x3f4   : > { %v4092_v18 = vpop.f32.mrf.mxu2 }
 0x3f5   : > { %v4093_v61 = vadd.f32 %v4092_v18, %v4080_v17 }
 0x3f6   : > { %v4131_v25 = vpop.f32.mrf.mxu1 }
 0x3f7   : > { %v4105_v37 = vpop.f32.mrf.mxu3 }
 0x3f8   : > { %v4106_v21 = vadd.f32 %v4105_v37, %v4093_v61 }
 0x3f9   : > { %v4170_v19 = vpop.f32.mrf.mxu0 }
 0x3fa   : > { %v4119_v60 = vadd.f32 %v4118_v10, %v4106_v21 }
 0x3fc   : > { %v4132_v31 = vadd.f32 %v4131_v25, %v4119_v60  ;;  %v4094_v32 = vpop.f32.mrf.mxu2 }
 0x3fd   : > { %v8748_v32 = vld [vmem:[#allocation16 + $0x78] sm:$0xff] }
 0x3fe   : > { %v4133_v28 = vpop.f32.mrf.mxu1 }
 0x3ff   : > { %v4107_v39 = vpop.f32.mrf.mxu3 }
 0x400   : > { %v8747_v39 = vld [vmem:[#allocation16 + $0x70] sm:$0xff] }
 0x401   : > { %v4172_v33 = vpop.f32.mrf.mxu0 }
 0x402   : > { %v8740_v33 = vld [vmem:[#allocation16 + $0x38] sm:$0xff] }
 0x403   : > { %5150 = vmatpush.bf16.msrb.mxu3 %v8740_v33  ;;  %v8770_v33 = vld [vmem:[#allocation16 + $0x128] sm:$0xff] }
 0x414   : > { %v4144_v30 = vpop.f32.mrf.mxu2 }
 0x415   : > { %v4145_v0 = vadd.f32 %v4144_v30, %v4132_v31  ;;  %v8746_v30 = vld [vmem:[#allocation16 + $0x68] sm:$0xff] }
 0x416   : > { %v4183_v29 = vpop.f32.mrf.mxu1 }
 0x417   : > { %v4157_v41 = vpop.f32.mrf.mxu3 }
 0x418   : > { %v4158_v44 = vadd.f32 %v4157_v41, %v4145_v0  ;;  %v8738_v0 = vld [vmem:[#allocation16 + $0x28] sm:$0xff]  ;;  %v8745_v41 = vld [vmem:[#allocation16 + $0x60] sm:$0xff] }
 0x419   : > { %v4222_v40 = vpop.f32.mrf.mxu0 }
 0x41a   : > { %v4171_v24 = vadd.f32 %v4170_v19, %v4158_v44  ;;  %v8744_v44 = vld [vmem:[#allocation16 + $0x58] sm:$0xff] }
 0x41c   : > { %v4184_v23 = vadd.f32 %v4183_v29, %v4171_v24  ;;  %v4146_v57 = vpop.f32.mrf.mxu2  ;;  %v8739_v29 = vld [vmem:[#allocation16 + $0x30] sm:$0xff]  ;;  %v8736_v24 = vld [vmem:[#allocation16 + $0x18] sm:$0xff] }
 0x41d   : > { %5151 = vmatpush.bf16.msrb.mxu3 %v8739_v29  ;;  %v8777_v29 = vld [vmem:[#allocation16 + $0x160] sm:$0xff] }
 0x41e   : > { %v4185_v45 = vpop.f32.mrf.mxu1 }
 0x41f   : > { %v4159_v46 = vpop.f32.mrf.mxu3  ;;  %v8743_v45 = vld [vmem:[#allocation16 + $0x50] sm:$0xff] }
 0x421   : > { %v4224_v4 = vpop.f32.mrf.mxu0  ;;  %5152 = vmatpush.bf16.msrb.mxu3 %v8738_v0  ;;  %v8776_v0 = vld [vmem:[#allocation16 + $0x158] sm:$0xff] }
 0x434   : > { %v4196_v38 = vpop.f32.mrf.mxu2 }
 0x435   : > { %v4197_v1 = vadd.f32 %v4196_v38, %v4184_v23  ;;  %v8756_v38 = vld [vmem:[#allocation16 + $0xb8] sm:$0xff] }
 0x436   : > { %v4235_v47 = vpop.f32.mrf.mxu1  ;;  %5176 = vmatpush.bf16.msra.mxu1 %v8756_v38  ;;  %v8767_v38 = vld [vmem:[#allocation16 + $0x110] sm:$0xff] }
 0x437   : > { %v4209_v35 = vpop.f32.mrf.mxu3 }
 0x438   : > { %v4274_v7 = vpop.f32.mrf.mxu0  ;;  %v4210_v49 = vadd.f32 %v4209_v35, %v4197_v1 }
 0x43a   : > { %v4223_v22 = vadd.f32 %v4222_v40, %v4210_v49  ;;  %v8737_v40 = vld [vmem:[#allocation16 + $0x20] sm:$0xff]  ;;  %v8764_v49 = vld [vmem:[#allocation16 + $0xf8] sm:$0xff] }
 0x43b   : > { %5153 = vmatpush.bf16.msrb.mxu3 %v8737_v40  ;;  %v8775_v40 = vld [vmem:[#allocation16 + $0x150] sm:$0xff] }
 0x43c   : > { %v4198_v3 = vpop.f32.mrf.mxu2  ;;  %v4236_v10 = vadd.f32 %v4235_v47, %v4223_v22  ;;  %v8735_v47 = vld [vmem:[#allocation16 + $0x10] sm:$0xff] }
 0x43d   : > { %v8742_v3 = vld [vmem:[#allocation16 + $0x48] sm:$0xff] }
 0x43e   : > { %v4237_v2 = vpop.f32.mrf.mxu1 }
 0x43f   : > { %v4211_v58 = vpop.f32.mrf.mxu3  ;;  %5154 = vmatpush.bf16.msrb.mxu3 %v8736_v24  ;;  %v8774_v24 = vld [vmem:[#allocation16 + $0x148] sm:$0xff] }
 0x440   : > { %v4276_v50 = vpop.f32.mrf.mxu0 }
 0x443   : > { %5155 = vmatpush.bf16.msrb.mxu3 %v8735_v47  ;;  %v8759_v47 = vld [vmem:[#allocation16 + $0xd0] sm:$0xff] }
 0x454   : > { %v4248_v55 = vpop.f32.mrf.mxu2 }
 0x455   : > { %v4249_v63 = vadd.f32 %v4248_v55, %v4236_v10 }
 0x456   : > { %v4287_v5 = vpop.f32.mrf.mxu1  ;;  %v4261_v56 = vpop.f32.mrf.mxu3 }
 0x457   : > { %v4262_v6 = vadd.f32 %v4261_v56, %v4249_v63  ;;  %v8734_v56 = vld [vmem:[#allocation16 + $0x8] sm:$0xff]  ;;  %v8741_v63 = vld [vmem:[#allocation16 + $0x40] sm:$0xff] }
 0x458   : > { %5156 = vmatpush.bf16.msrb.mxu3 %v8734_v56  ;;  %v8787_v56 = vld [vmem:[#allocation16 + $0x1b0] sm:$0xff] }
 0x459   : > { %v4275_v20 = vadd.f32 %v4274_v7, %v4262_v6 }
 0x45b   : > { %v4288_v8 = vadd.f32 %v4287_v5, %v4275_v20 }
 0x45c   : > { %v4250_v34 = vpop.f32.mrf.mxu2 }
 0x45e   : > { %v4289_v52 = vpop.f32.mrf.mxu1  ;;  %v4263_v54 = vpop.f32.mrf.mxu3 }
 0x45f   : > { %v8755_v52 = vld [vmem:[#allocation16 + $0xb0] sm:$0xff] }
 0x460   : > { %5177 = vmatpush.bf16.msra.mxu1 %v8755_v52  ;;  %v8795_v52 = vld [vmem:[#allocation16 + $0x1f0] sm:$0xff] }
 0x466   : > { %v4359_v36 = vpop.f32.mrf.mxu1 }
 0x46b   : > { %v4328_v12 = vpop.f32.mrf.mxu3 }
 0x46e   : > { %v4361_v13 = vpop.f32.mrf.mxu1 }
 0x46f   : > { %v8762_v13 = vld [vmem:[#allocation16 + $0xe8] sm:$0xff] }
 0x473   : > { %v4330_v59 = vpop.f32.mrf.mxu3 }
 0x474   : > { %v4300_v9 = vpop.f32.mrf.mxu2 }
 0x475   : > { %v4301_v53 = vadd.f32 %v4300_v9, %v4288_v8 }
 0x477   : > { %v4305_v14 = vmax.f32 %v4301_v53, 0.0 }
 0x479   : > { %v4307_v43 = vpack.c.bf16 %v4305_v14, %v4305_v14  ;;  %v8780_v14 = vld [vmem:[#allocation16 + $0x178] sm:$0xff] }
 0x47b   : > { %v4317_v27 = vsel %vm1510_vm1, %v4307_v43, 0 }
 0x47c   : > { %v4302_v11 = vpop.f32.mrf.mxu2  ;;  %4339 = vmatpush.bf16.msra.mxu0 %v4317_v27  ;;  %4370 = vmatpush.bf16.msrb.mxu2 %v4317_v27  ;;  %v8754_v27 = vld [vmem:[#allocation16 + $0xa8] sm:$0xff] }
 0x47d   : > { %5178 = vmatpush.bf16.msra.mxu1 %v8754_v27  ;;  %v8792_v27 = vld [vmem:[#allocation16 + $0x1d8] sm:$0xff] }
 0x47f   : > { %7792 = vmatmul.msk.bf16.vlgmr.msra.gmra.mxu0 %vm4309_vm12, %v4308_v42  ;;  %7794 = vmatmul.msk.bf16.vlgmr.msrb.gmra.mxu2 %vm4309_vm12, %v4346_v26  ;;  %v8763_v26 = vld [vmem:[#allocation16 + $0xf0] sm:$0xff] }
 0x480   : > { %5163 = vmatpush.bf16.msrb.mxu0 %v8748_v32  ;;  %5189 = vmatpush.bf16.msra.mxu2 %v8764_v49  ;;  %v8766_v49 = vld [vmem:[#allocation16 + $0x108] sm:$0xff] }
 0x484   : > { %5164 = vmatpush.bf16.msrb.mxu0 %v8747_v39  ;;  %5190 = vmatpush.bf16.msra.mxu2 %v8763_v26  ;;  %v8760_v39 = vld [vmem:[#allocation16 + $0xd8] sm:$0xff]  ;;  %v8786_v26 = vld [vmem:[#allocation16 + $0x1a8] sm:$0xff] }
 0x488   : > { %5165 = vmatpush.bf16.msrb.mxu0 %v8746_v30  ;;  %5191 = vmatpush.bf16.msra.mxu2 %v8762_v13  ;;  %v8769_v30 = vld [vmem:[#allocation16 + $0x120] sm:$0xff]  ;;  %v8799_v13 = vld [vmem:[#allocation16 + $0x210] sm:$0xff] }
 0x48c   : > { %5166 = vmatpush.bf16.msrb.mxu0 %v8745_v41  ;;  %v8768_v41 = vld [vmem:[#allocation16 + $0x118] sm:$0xff] }
 0x490   : > { %5167 = vmatpush.bf16.msrb.mxu0 %v8744_v44 }
 0x494   : > { %5168 = vmatpush.bf16.msrb.mxu0 %v8743_v45 }
 0x498   : > { %5169 = vmatpush.bf16.msrb.mxu0 %v8742_v3  ;;  %v8765_v3 = vld [vmem:[#allocation16 + $0x100] sm:$0xff] }
 0x49c   : > { %5170 = vmatpush.bf16.msrb.mxu0 %v8741_v63  ;;  %v8802_v63 = vld [vmem:[#allocation16 + $0x228] sm:$0xff] }
 0x4a0   : > { %5215 = vmatpush.bf16.msra.mxu0 %v8780_v14  ;;  %v8784_v14 = vld [vmem:[#allocation16 + $0x198] sm:$0xff] }
 0x4fc   : > { %v4341_v48 = vpop.f32.mrf.mxu0 }
 0x4fd   : > { %v4345_v15 = vpack.c.bf16 %v4341_v48, %v4328_v12 }
 0x4ff   : > { %v4378_v62 = vunpack.c.l.b16 %v4345_v15  ;;  %v4379_v16 = vunpack.c.h.b16 %v4345_v15 }
 0x501   : > { %v4380_v17 = vpack.c.b16 %v4378_v62, %v4378_v62  ;;  %v4381_v25 = vpack.c.b16 %v4379_v16, %v4379_v16  ;;  %v8772_v16 = vld [vmem:[#allocation16 + $0x138] sm:$0xff] }
 0x502   : > { %v4372_v18 = vpop.f32.mrf.mxu2 }
 0x503   : > { %4384 = vrot.lane.b32.xlu1 %v4381_v25, %s9644_s25  ;;  %4382 = vrot.lane.b32.xlu0 %v4380_v17, %s9644_s25  ;;  %v4376_v37 = vpack.c.bf16 %v4372_v18, %v4359_v36  ;;  %v8733_v36 = vld [vmem:[#allocation16] sm:$0xff]  ;;  %v8779_v18 = vld [vmem:[#allocation16 + $0x170] sm:$0xff] }
 0x504   : > { %v4343_v61 = vpop.f32.mrf.mxu0  ;;  %v8753_v25 = vld [vmem:[#allocation16 + $0xa0] sm:$0xff]  ;;  %5157 = vmatpush.bf16.msrb.mxu3 %v8733_v36  ;;  %5216 = vmatpush.bf16.msra.mxu0 %v8779_v18  ;;  %v8791_v36 = vld [vmem:[#allocation16 + $0x1d0] sm:$0xff] }
 0x505   : > { %v4392_v19 = vunpack.c.l.b16 %v4376_v37  ;;  %v4393_v21 = vunpack.c.h.b16 %v4376_v37  ;;  %v8761_v61 = vld [vmem:[#allocation16 + $0xe0] sm:$0xff]  ;;  %5179 = vmatpush.bf16.msra.mxu1 %v8753_v25 }
 0x506   : > { %5192 = vmatpush.bf16.msra.mxu2 %v8761_v61  ;;  %v8789_v25 = vld [vmem:[#allocation16 + $0x1c0] sm:$0xff] }
 0x507   : > { %v4394_v60 = vpack.c.b16 %v4392_v19, %v4392_v19  ;;  %v4395_v28 = vpack.c.b16 %v4393_v21, %v4393_v21  ;;  %v8771_v21 = vld [vmem:[#allocation16 + $0x130] sm:$0xff]  ;;  %v8797_v18 = vld [vmem:[#allocation16 + $0x200] sm:$0xff] }
 0x508   : > { %5202 = vmatpush.bf16.msra.mxu3 %v8772_v16  ;;  %v8798_v16 = vld [vmem:[#allocation16 + $0x208] sm:$0xff] }
 0x509   : > { %4396 = vrot.lane.b32.xlu2 %v4394_v60, %s9644_s25  ;;  %v8752_v60 = vld [vmem:[#allocation16 + $0x98] sm:$0xff] }
 0x50a   : > { %v4374_v31 = vpop.f32.mrf.mxu2  ;;  %5180 = vmatpush.bf16.msra.mxu1 %v8752_v60  ;;  %5193 = vmatpush.bf16.msra.mxu2 %v8760_v39 }
 0x50b   : > { %4398 = vrot.lane.b32.xlu0 %v4395_v28, %s9644_s25  ;;  %v8778_v31 = vld [vmem:[#allocation16 + $0x168] sm:$0xff] }
 0x50c   : > { %5203 = vmatpush.bf16.msra.mxu3 %v8771_v21  ;;  %5217 = vmatpush.bf16.msra.mxu0 %v8778_v31 }
 0x50e   : > { %5194 = vmatpush.bf16.msra.mxu2 %v8759_v47 }
 0x510   : > { %5204 = vmatpush.bf16.msra.mxu3 %v8770_v33  ;;  %5218 = vmatpush.bf16.msra.mxu0 %v8777_v29 }
 0x514   : > { %5205 = vmatpush.bf16.msra.mxu3 %v8769_v30  ;;  %5219 = vmatpush.bf16.msra.mxu0 %v8776_v0 }
 0x518   : > { %5206 = vmatpush.bf16.msra.mxu3 %v8768_v41  ;;  %5220 = vmatpush.bf16.msra.mxu0 %v8775_v40 }
 0x51c   : > { %5221 = vmatpush.bf16.msra.mxu0 %v8774_v24  ;;  %5207 = vmatpush.bf16.msra.mxu3 %v8767_v38 }
 0x520   : > { %5208 = vmatpush.bf16.msra.mxu3 %v8766_v49  ;;  %v9071_v49 = vld [vmem:[#allocation17] ss:$0 sm:$0xff] }
 0x524   : > { %5209 = vmatpush.bf16.msra.mxu3 %v8765_v3 }
 0x563   : > { %v4397_v23 = vpop.permute.xlu2 %4396 }
 0x564   : > { %v4402_v4 = vsel %vm1894_vm7, 0, %v4397_v23 }
 0x565   : > { %v4405_v5 = vshrl.u32 %v4402_v4, 16  ;;  %v4408_v9 = vshll.u32 %v4402_v4, 16  ;;  %v8751_v4 = vld [vmem:[#allocation16 + $0x90] sm:$0xff] }
 0x566   : > { %5181 = vmatpush.bf16.msra.mxu1 %v8751_v4 }
 0x567   : > { %v4407_v8 = vrot.slane %v4405_v5, 7  ;;  %v8804_v5 = vld [vmem:[#allocation16 + $0x238] sm:$0xff] }
 0x569   : > { %v4410_v17 = vor.u32 %v4408_v9, %v4407_v8  ;;  %v8793_v8 = vld [vmem:[#allocation16 + $0x1e0] sm:$0xff] }
 0x56a   : > { %v8801_v9 = vld [vmem:[#allocation16 + $0x220] sm:$0xff] }
 0x56b   : > { %v4427_v28 = vsel %vm10045_vm10, 0, %v4410_v17  ;;  %v8781_v17 = vld [vmem:[#allocation16 + $0x180] sm:$0xff] }
 0x56c   : > { %5158 = vmatmul.bf16.vlgmr.msrb.gmra.mxu3 %v4427_v28  ;;  %v4451_v44 = vshll.u32 %v4427_v28, 16  ;;  %v4449_v45 = vshrl.u32 %v4427_v28, 16 }
 0x56d   : > { %5254 = vmatpush.bf16.msrb.mxu3 %v8804_v5 }
 0x575   : > { %v4385_v57 = vpop.permute.xlu1 %4384  ;;  %v4383_v46 = vpop.permute.xlu0 %4382 }
 0x576   : > { %v4390_v35 = vsel %vm1894_vm7, %v4385_v57, 0  ;;  %v4386_v1 = vsel %vm1894_vm7, %v4383_v46, %v4385_v57  ;;  %v4388_v7 = vsel %vm1894_vm7, 0, %v4383_v46  ;;  %v8773_v57 = vld [vmem:[#allocation16 + $0x140] sm:$0xff] }
 0x577   : > { %v4434_v22 = vsel %vm4430_vm13, %v4390_v35, 0  ;;  %v4431_v42 = vsel %vm4430_vm13, %v4388_v7, 0  ;;  %v4433_v2 = vsel %vm4430_vm13, %v4386_v1, 0  ;;  %5222 = vmatpush.bf16.msra.mxu0 %v8773_v57  ;;  %v8812_v35 = vld [vmem:[#allocation16 + $0x278] sm:$0xff]  ;;  %v8750_v1 = vld [vmem:[#allocation16 + $0x88] sm:$0xff] }
 0x578   : > { %v4485_v58 = vshll.u32 %v4434_v22, 16  ;;  %4442 = vrot.lane.b32.xlu0 %v4434_v22, %s9645_s30  ;;  %4438 = vrot.lane.b32.xlu1 %v4431_v42, %s9645_s30  ;;  %v4473_v50 = vshll.u32 %v4431_v42, 16  ;;  %v4479_v55 = vshll.u32 %v4433_v2, 16  ;;  %v4483_v6 = vshrl.u32 %v4434_v22, 16  ;;  %v8758_v7 = vld [vmem:[#allocation16 + $0xc8] sm:$0xff]  ;;  %v8811_v22 = vld [vmem:[#allocation16 + $0x270] sm:$0xff] }
 0x579   : > { %4440 = vrot.lane.b32.xlu2 %v4433_v2, %s9645_s30  ;;  %v4471_v20 = vshrl.u32 %v4431_v42, 16  ;;  %v4477_v53 = vshrl.u32 %v4433_v2, 16  ;;  %5182 = vmatpush.bf16.msra.mxu1 %v8750_v1  ;;  %v8749_v42 = vld [vmem:[#allocation16 + $0x80] sm:$0xff] }
 0x57a   : > { %v4487_v34 = vrot.slane %v4485_v58, 1  ;;  %v4475_v54 = vrot.slane %v4473_v50, 1  ;;  %v4481_v10 = vrot.slane %v4479_v55, 1  ;;  %5195 = vmatpush.bf16.msra.mxu2 %v8758_v7  ;;  %v8757_v2 = vld [vmem:[#allocation16 + $0xc0] sm:$0xff]  ;;  %v8788_v58 = vld [vmem:[#allocation16 + $0x1b8] sm:$0xff]  ;;  %v8810_v55 = vld [vmem:[#allocation16 + $0x268] sm:$0xff] }
 0x57b   : > { %v8796_v50 = vld [vmem:[#allocation16 + $0x1f8] sm:$0xff] }
 0x57c   : > { %v4488_v11 = vor.u32 %v4487_v34, %v4483_v6  ;;  %v4476_v12 = vor.u32 %v4475_v54, %v4471_v20  ;;  %v4482_v48 = vor.u32 %v4481_v10, %v4477_v53  ;;  %v8803_v34 = vld [vmem:[#allocation16 + $0x230] sm:$0xff]  ;;  %v8809_v54 = vld [vmem:[#allocation16 + $0x260] sm:$0xff]  ;;  %v8794_v10 = vld [vmem:[#allocation16 + $0x1e8] sm:$0xff] }
 0x57d   : > { %v10241_v43 = vpop.permute.xlu0 %4398  ;;  %5183 = vmatpush.bf16.msra.mxu1 %v8749_v42  ;;  %5255 = vmatpush.bf16.msrb.mxu3 %v8803_v34  ;;  %v8808_v6 = vld [vmem:[#allocation16 + $0x258] sm:$0xff]  ;;  %v8785_v20 = vld [vmem:[#allocation16 + $0x1a0] sm:$0xff]  ;;  %v8807_v53 = vld [vmem:[#allocation16 + $0x250] sm:$0xff] }
 0x57e   : > { %v4400_v59 = vsel %vm1894_vm7, %v4397_v23, %v10241_v43  ;;  %v4453_v23 = vrot.slane %v4451_v44, 1  ;;  %5196 = vmatpush.bf16.msra.mxu2 %v8757_v2 }
 0x57f   : > { %v4412_v15 = vshrl.u32 %v4400_v59, 16  ;;  %v4415_v62 = vshll.u32 %v4400_v59, 16  ;;  %v8783_v59 = vld [vmem:[#allocation16 + $0x190] sm:$0xff] }
 0x580   : > { %4493 = vrot.lane.b32.xlu0 %v4488_v11, %s9645_s30  ;;  %4489 = vrot.lane.b32.xlu1 %v4476_v12, %s9645_s30  ;;  %v4454_v46 = vor.u32 %v4453_v23, %v4449_v45  ;;  %v8800_v11 = vld [vmem:[#allocation16 + $0x218] sm:$0xff]  ;;  %v8806_v12 = vld [vmem:[#allocation16 + $0x248] sm:$0xff] }
 0x581   : > { %4491 = vrot.lane.b32.xlu2 %v4482_v48, %s9645_s30  ;;  %v4414_v37 = vrot.slane %v4412_v15, 7  ;;  %5228 = vmatpush.bf16.msrb.mxu1 %v8788_v58  ;;  %v8805_v48 = vld [vmem:[#allocation16 + $0x240] sm:$0xff]  ;;  %v8782_v15 = vld [vmem:[#allocation16 + $0x188] sm:$0xff] }
 0x582   : > { %5241 = vmatpush.bf16.msrb.mxu2 %v8796_v50  ;;  %5256 = vmatpush.bf16.msrb.mxu3 %v8802_v63 }
 0x583   : > { %v4417_v19 = vor.u32 %v4415_v62, %v4414_v37  ;;  %v8790_v62 = vld [vmem:[#allocation16 + $0x1c8] sm:$0xff]  ;;  %v4404_v37 = vsel %vm1894_vm7, %v10241_v43, 0 }
 0x584   : > { %v4418_v61 = vshrl.u32 %v4404_v37, 16  ;;  %v4421_v21 = vshll.u32 %v4404_v37, 16 }
 0x585   : > { %v10252_v32 = vsel %vm10045_vm10, 0, %v4417_v19  ;;  %5229 = vmatpush.bf16.msrb.mxu1 %v8787_v56 }
 0x586   : > { %5171 = vmatmul.bf16.vlgmr.msrb.gmra.mxu0 %v10252_v32  ;;  %5242 = vmatpush.bf16.msrb.mxu2 %v8795_v52  ;;  %v4420_v19 = vrot.slane %v4418_v61, 7  ;;  %v4458_v41 = vshll.u32 %v10252_v32, 16  ;;  %v4456_v57 = vshrl.u32 %v10252_v32, 16 }
 0x587   : > { %5267 = vmatpush.bf16.msrb.mxu0 %v8812_v35  ;;  %5257 = vmatpush.bf16.msrb.mxu3 %v8801_v9 }
 0x588   : > { %v4423_v60 = vor.u32 %v4421_v21, %v4420_v19 }
 0x589   : > { %5230 = vmatpush.bf16.msrb.mxu1 %v8786_v26 }
 0x58a   : > { %5243 = vmatpush.bf16.msrb.mxu2 %v8794_v10  ;;  %v4429_v39 = vsel %vm10045_vm10, 0, %v4423_v60 }
 0x58b   : > { %5268 = vmatpush.bf16.msrb.mxu0 %v8811_v22  ;;  %5258 = vmatpush.bf16.msrb.mxu3 %v8800_v11  ;;  %v4465_v43 = vshll.u32 %v4429_v39, 16  ;;  %v4463_v45 = vshrl.u32 %v4429_v39, 16 }
 0x58d   : > { %5231 = vmatpush.bf16.msrb.mxu1 %v8785_v20  ;;  %v4467_v23 = vrot.slane %v4465_v43, 1  ;;  %v8827_v43 = vld [vmem:[%s10484_s14 + $0x70] sm:$0xff] }
 0x58e   : > { %5244 = vmatpush.bf16.msrb.mxu2 %v8793_v8 }
 0x58f   : > { %5269 = vmatpush.bf16.msrb.mxu0 %v8810_v55  ;;  %5259 = vmatpush.bf16.msrb.mxu3 %v8799_v13  ;;  %v4468_v47 = vor.u32 %v4467_v23, %v4463_v45  ;;  %v8825_v45 = vld [vmem:[%s10484_s14 + $0x60] sm:$0xff]  ;;  %v8816_v23 = vld [vmem:[%s10484_s14 + $0x18] sm:$0xff] }
 0x591   : > { %5232 = vmatpush.bf16.msrb.mxu1 %v8784_v14 }
 0x592   : > { %5245 = vmatpush.bf16.msrb.mxu2 %v8792_v27 }
 0x593   : > { %5270 = vmatpush.bf16.msrb.mxu0 %v8809_v54  ;;  %5260 = vmatpush.bf16.msrb.mxu3 %v8798_v16 }
 0x595   : > { %5233 = vmatpush.bf16.msrb.mxu1 %v8783_v59 }
 0x596   : > { %5223 = vmatmul.bf16.vlgmr.msra.gmra.mxu0 %v4454_v46  ;;  %5246 = vmatpush.bf16.msrb.mxu2 %v8791_v36  ;;  %v4460_v46 = vrot.slane %v4458_v41, 1  ;;  %v8818_v41 = vld [vmem:[%s10484_s14 + $0x28] sm:$0xff] }
 0x597   : > { %5271 = vmatpush.bf16.msrb.mxu0 %v8808_v6  ;;  %5261 = vmatpush.bf16.msrb.mxu3 %v8797_v18 }
 0x598   : > { %v4461_v38 = vor.u32 %v4460_v46, %v4456_v57  ;;  %v8836_v46 = vld [vmem:[%s10484_s14 + $0xb8] sm:$0xff] }
 0x599   : > { %5234 = vmatpush.bf16.msrb.mxu1 %v8782_v15 }
 0x59a   : > { %5247 = vmatpush.bf16.msrb.mxu2 %v8790_v62 }
 0x59b   : > { %5272 = vmatpush.bf16.msrb.mxu0 %v8807_v53 }
 0x59d   : > { %5235 = vmatpush.bf16.msrb.mxu1 %v8781_v17  ;;  %v5282_v17 = vld [vmem:[#allocation19] sm:$0x1] }
 0x59e   : > { %5248 = vmatpush.bf16.msrb.mxu2 %v8789_v25  ;;  %v5304_v25 = vld [vmem:[#allocation20] sm:$0x1] }
 0x59f   : > { %5273 = vmatpush.bf16.msrb.mxu0 %v8806_v12 }
 0x5a3   : > { %5274 = vmatpush.bf16.msrb.mxu0 %v8805_v48 }
 0x5d3   : > { %v4441_v28 = vpop.permute.xlu2 %4440 }
 0x5db   : > { %v4492_v40 = vpop.permute.xlu2 %4491 }
 0x5ea   : > { %v4439_v31 = vpop.permute.xlu1 %4438  ;;  %v4443_v33 = vpop.permute.xlu0 %4442 }
 0x5eb   : > { %v4444_v29 = vsel %vm1998_vm11, %v4439_v31, %v4441_v28  ;;  %v4500_v30 = vsel %vm1998_vm11, %v4429_v39, %v4439_v31  ;;  %v4445_v0 = vsel %vm1998_vm11, %v4441_v28, %v4443_v33 }
 0x5ec   : > { %5184 = vmatmul.bf16.vlgmr.msra.gmra.mxu1 %v4500_v30  ;;  %5197 = vmatmul.bf16.vlgmr.msra.gmra.mxu2 %v4444_v29  ;;  %v8820_v29 = vld [vmem:[%s10484_s14 + $0x38] sm:$0xff]  ;;  %v8819_v30 = vld [vmem:[%s10484_s14 + $0x30] sm:$0xff] }
 0x5ed   : > { %5210 = vmatmul.bf16.vlgmr.msra.gmra.mxu3 %v4445_v0  ;;  %v8828_v0 = vld [vmem:[%s10484_s14 + $0x78] sm:$0xff] }
 0x5ee   : > { %5819 = vmatpush.bf16.msra.mxu3 %v8836_v46  ;;  %v8856_v46 = vld [vmem:[%s10484_s14 + $0x158] sm:$0xff] }
 0x5ef   : > { %v5159_v22 = vpop.f32.mrf.mxu3 }
 0x5f0   : > { %v5160_v42 = vadd.f32 %v9071_v49, %v5159_v22  ;;  %v8823_v49 = vld [vmem:[%s10484_s14 + $0x50] sm:$0xff] }
 0x5f2   : > { %v4494_v44 = vpop.permute.xlu0 %4493  ;;  %v4490_v4 = vpop.permute.xlu1 %4489 }
 0x5f3   : > { %v4496_v24 = vsel %vm1998_vm11, %v4492_v40, %v4494_v44  ;;  %v4504_v35 = vsel %vm1998_vm11, %v4468_v47, %v4490_v4  ;;  %v4495_v1 = vsel %vm1998_vm11, %v4490_v4, %v4492_v40  ;;  %v8826_v40 = vld [vmem:[%s10484_s14 + $0x68] sm:$0xff]  ;;  %v8817_v44 = vld [vmem:[%s10484_s14 + $0x20] sm:$0xff]  ;;  %v8824_v4 = vld [vmem:[%s10484_s14 + $0x58] sm:$0xff] }
 0x5f4   : > { %5275 = vmatmul.bf16.vlgmr.msrb.gmra.mxu0 %v4496_v24  ;;  %v8815_v47 = vld [vmem:[%s10484_s14 + $0x10] sm:$0xff] }
 0x5f7   : > { %v5161_v58 = vpop.f32.mrf.mxu3 }
 0x5fc   : > { %5236 = vmatmul.bf16.vlgmr.msrb.gmra.mxu1 %v4461_v38  ;;  %5249 = vmatmul.bf16.vlgmr.msrb.gmra.mxu2 %v4504_v35  ;;  %v8835_v35 = vld [vmem:[%s10484_s14 + $0xb0] sm:$0xff] }
 0x5fd   : > { %5262 = vmatmul.bf16.vlgmr.msrb.gmra.mxu3 %v4495_v1  ;;  %v8844_v1 = vld [vmem:[%s10484_s14 + $0xf8] sm:$0xff] }
 0x5fe   : > { %5820 = vmatpush.bf16.msra.mxu3 %v8835_v35  ;;  %5832 = vmatpush.bf16.msra.mxu0 %v8844_v1  ;;  %v8854_v1 = vld [vmem:[%s10484_s14 + $0x148] sm:$0xff] }
 0x603   : > { %v5172_v7 = vpop.f32.mrf.mxu0 }
 0x604   : > { %v5173_v3 = vadd.f32 %v5172_v7, %v5160_v42 }
 0x60b   : > { %v5174_v2 = vpop.f32.mrf.mxu0 }
 0x60c   : > { %v8814_v2 = vld [vmem:[%s10484_s14 + $0x8] sm:$0xff] }
 0x613   : > { %v5224_v50 = vpop.f32.mrf.mxu0 }
 0x61b   : > { %v5226_v32 = vpop.f32.mrf.mxu0 }
 0x669   : > { %v5185_v5 = vpop.f32.mrf.mxu1 }
 0x66a   : > { %v5186_v54 = vadd.f32 %v5185_v5, %v5173_v3  ;;  %v8834_v5 = vld [vmem:[%s10484_s14 + $0xa8] sm:$0xff] }
 0x66b   : > { %5821 = vmatpush.bf16.msra.mxu3 %v8834_v5 }
 0x66f   : > { %v5198_v55 = vpop.f32.mrf.mxu2 }
 0x670   : > { %v5211_v56 = vpop.f32.mrf.mxu3  ;;  %v5199_v26 = vadd.f32 %v5198_v55, %v5186_v54  ;;  %v8843_v55 = vld [vmem:[%s10484_s14 + $0xf0] sm:$0xff] }
 0x671   : > { %v5187_v52 = vpop.f32.mrf.mxu1  ;;  %v5276_v34 = vpop.f32.mrf.mxu0  ;;  %5833 = vmatpush.bf16.msra.mxu0 %v8843_v55 }
 0x672   : > { %v5212_v63 = vadd.f32 %v5211_v56, %v5199_v26 }
 0x674   : > { %v5225_v9 = vadd.f32 %v5224_v50, %v5212_v63  ;;  %v8813_v63 = vld [vmem:[%s10484_s14] sm:$0xff] }
 0x677   : > { %v5200_v10 = vpop.f32.mrf.mxu2 }
 0x678   : > { %v5213_v6 = vpop.f32.mrf.mxu3 }
 0x679   : > { %v5237_v20 = vpop.f32.mrf.mxu1  ;;  %v5278_v8 = vpop.f32.mrf.mxu0 }
 0x67a   : > { %v5238_v53 = vadd.f32 %v5237_v20, %v5225_v9  ;;  %v8852_v20 = vld [vmem:[%s10484_s14 + $0x138] sm:$0xff]  ;;  %v8833_v8 = vld [vmem:[%s10484_s14 + $0xa0] sm:$0xff]  ;;  %v8842_v9 = vld [vmem:[%s10484_s14 + $0xe8] sm:$0xff] }
 0x67b   : > { %5822 = vmatpush.bf16.msra.mxu3 %v8833_v8  ;;  %5834 = vmatpush.bf16.msra.mxu0 %v8842_v9 }
 0x67f   : > { %v5250_v14 = vpop.f32.mrf.mxu2 }
 0x680   : > { %v5251_v27 = vadd.f32 %v5250_v14, %v5238_v53  ;;  %v5263_v11 = vpop.f32.mrf.mxu3 }
 0x681   : > { %v5239_v12 = vpop.f32.mrf.mxu1 }
 0x682   : > { %v5264_v59 = vadd.f32 %v5263_v11, %v5251_v27  ;;  %v8851_v12 = vld [vmem:[%s10484_s14 + $0x130] sm:$0xff] }
 0x684   : > { %v5277_v36 = vadd.f32 %v5276_v34, %v5264_v59  ;;  %v8822_v34 = vld [vmem:[%s10484_s14 + $0x48] sm:$0xff] }
 0x685   : > { %v8850_v59 = vld [vmem:[%s10484_s14 + $0x128] sm:$0xff] }
 0x686   : > { %v5280_v13 = vmax.f32 %v5277_v36, 0.0  ;;  %v8849_v36 = vld [vmem:[%s10484_s14 + $0x120] sm:$0xff] }
 0x687   : > { %v5252_v48 = vpop.f32.mrf.mxu2 }
 0x688   : > { %v5281_v15 = vpack.c.bf16 %v5280_v13, %v5280_v13  ;;  %v5265_v62 = vpop.f32.mrf.mxu3  ;;  %v8848_v13 = vld [vmem:[%s10484_s14 + $0x118] sm:$0xff]  ;;  %v8847_v48 = vld [vmem:[%s10484_s14 + $0x110] sm:$0xff] }
 0x689   : > { %v8845_v62 = vld [vmem:[%s10484_s14 + $0x100] sm:$0xff] }
 0x68a   : > { %v5288_v16 = vsel %vm4430_vm13, %v5281_v15, 0  ;;  %v8846_v15 = vld [vmem:[%s10484_s14 + $0x108] sm:$0xff] }
 0x68b   : > { %5297 = vmatpush.bf16.msra.mxu1 %v5288_v16  ;;  %5315 = vmatpush.bf16.msra.mxu2 %v5288_v16  ;;  %v8841_v16 = vld [vmem:[%s10484_s14 + $0xe0] sm:$0xff] }
 0x68c   : > { %5835 = vmatpush.bf16.msra.mxu0 %v8841_v16 }
 0x68e   : > { %8115 = vmatmul.msk.bf16.vlgmr.msra.gmra.mxu1 %vm5283_vm14, %v5282_v17  ;;  %8116 = vmatmul.msk.bf16.vlgmr.msra.gmra.mxu2 %vm5283_vm14, %v5304_v25  ;;  %v8840_v17 = vld [vmem:[%s10484_s14 + $0xd8] sm:$0xff]  ;;  %v8821_v25 = vld [vmem:[%s10484_s14 + $0x40] sm:$0xff] }
 0x68f   : > { %5793 = vmatpush.bf16.msrb.mxu1 %v8820_v29  ;;  %5806 = vmatpush.bf16.msrb.mxu2 %v8828_v0  ;;  %v8830_v0 = vld [vmem:[%s10484_s14 + $0x88] sm:$0xff] }
 0x690   : > { %5836 = vmatpush.bf16.msra.mxu0 %v8840_v17 }
 0x693   : > { %5794 = vmatpush.bf16.msrb.mxu1 %v8819_v30  ;;  %5807 = vmatpush.bf16.msrb.mxu2 %v8827_v43  ;;  %v8858_v30 = vld [vmem:[%s10484_s14 + $0x168] sm:$0xff]  ;;  %v8837_v43 = vld [vmem:[%s10484_s14 + $0xc0] sm:$0xff] }
 0x697   : > { %5795 = vmatpush.bf16.msrb.mxu1 %v8818_v41  ;;  %5808 = vmatpush.bf16.msrb.mxu2 %v8826_v40 }
 0x69b   : > { %5796 = vmatpush.bf16.msrb.mxu1 %v8817_v44  ;;  %5809 = vmatpush.bf16.msrb.mxu2 %v8825_v45 }
 0x69f   : > { %5797 = vmatpush.bf16.msrb.mxu1 %v8816_v23  ;;  %5810 = vmatpush.bf16.msrb.mxu2 %v8824_v4  ;;  %v8829_v23 = vld [vmem:[%s10484_s14 + $0x80] sm:$0xff] }
 0x6a3   : > { %5798 = vmatpush.bf16.msrb.mxu1 %v8815_v47  ;;  %5811 = vmatpush.bf16.msrb.mxu2 %v8823_v49  ;;  %v8855_v47 = vld [vmem:[%s10484_s14 + $0x150] sm:$0xff] }
 0x6a7   : > { %5799 = vmatpush.bf16.msrb.mxu1 %v8814_v2  ;;  %5812 = vmatpush.bf16.msrb.mxu2 %v8822_v34 }
 0x6ab   : > { %5800 = vmatpush.bf16.msrb.mxu1 %v8813_v63  ;;  %5813 = vmatpush.bf16.msrb.mxu2 %v8821_v25  ;;  %v9072_v63 = vld [vmem:[#allocation22] ss:$0 sm:$0xff] }
 0x6af   : > { %5845 = vmatpush.bf16.msra.mxu1 %v8852_v20 }
 0x6b3   : > { %5846 = vmatpush.bf16.msra.mxu1 %v8851_v12 }
 0x6b7   : > { %5847 = vmatpush.bf16.msra.mxu1 %v8850_v59 }
 0x6bb   : > { %5848 = vmatpush.bf16.msra.mxu1 %v8849_v36  ;;  %v8863_v36 = vld [vmem:[#allocation23 + $0x10] sm:$0xff] }
 0x6bf   : > { %5849 = vmatpush.bf16.msra.mxu1 %v8848_v13 }
 0x6c3   : > { %5850 = vmatpush.bf16.msra.mxu1 %v8847_v48  ;;  %v8862_v48 = vld [vmem:[#allocation23 + $0x8] sm:$0xff] }
 0x6c7   : > { %5851 = vmatpush.bf16.msra.mxu1 %v8846_v15 }
 0x6cb   : > { %5852 = vmatpush.bf16.msra.mxu1 %v8845_v62 }
 0x70b   : > { %v5299_v18 = vpop.f32.mrf.mxu1 }
 0x70c   : > { %v5303_v37 = vpack.c.bf16 %v5299_v18, %v5299_v18  ;;  %v8839_v18 = vld [vmem:[%s10484_s14 + $0xd0] sm:$0xff] }
 0x70d   : > { %5837 = vmatpush.bf16.msra.mxu0 %v8839_v18 }
 0x70e   : > { %v5323_v61 = vunpack.c.l.b16 %v5303_v37 }
 0x710   : > { %v5324_v19 = vpack.c.b16 %v5323_v61, %v5323_v61  ;;  %v8860_v61 = vld [vmem:[%s10484_s14 + $0x178] sm:$0xff] }
 0x711   : > { %v5317_v21 = vpop.f32.mrf.mxu2  ;;  %5858 = vmatpush.bf16.msra.mxu2 %v8860_v61 }
 0x712   : > { %5325 = vrot.lane.b32.xlu1 %v5324_v19, %s9644_s25  ;;  %v5321_v60 = vpack.c.bf16 %v5317_v21, %v5317_v21  ;;  %v8832_v19 = vld [vmem:[%s10484_s14 + $0x98] sm:$0xff] }
 0x713   : > { %v5301_v28 = vpop.f32.mrf.mxu1  ;;  %5823 = vmatpush.bf16.msra.mxu3 %v8832_v19 }
 0x714   : > { %v5331_v31 = vunpack.c.l.b16 %v5321_v60  ;;  %v8859_v60 = vld [vmem:[%s10484_s14 + $0x170] sm:$0xff] }
 0x715   : > { %v8831_v28 = vld [vmem:[%s10484_s14 + $0x90] sm:$0xff]  ;;  %5859 = vmatpush.bf16.msra.mxu2 %v8859_v60  ;;  %v5895_v60 = vld [vmem:[#allocation25] sm:$0x1] }
 0x716   : > { %v5332_v39 = vpack.c.b16 %v5331_v31, %v5331_v31  ;;  %v8838_v31 = vld [vmem:[%s10484_s14 + $0xc8] sm:$0xff] }
 0x717   : > { %5838 = vmatpush.bf16.msra.mxu0 %v8838_v31  ;;  %5824 = vmatpush.bf16.msra.mxu3 %v8831_v28 }
 0x718   : > { %5333 = vrot.lane.b32.xlu2 %v5332_v39, %s9644_s25  ;;  %s808_s25 = scalar_lea.vmem [#allocation26], %s807_s2 }
 0x719   : > { %v5319_v33 = vpop.f32.mrf.mxu2  ;;  %5860 = vmatpush.bf16.msra.mxu2 %v8858_v30  ;;  %s5969_s5 = sshll.u32 %s808_s25, 4  ;;  %s5970_s5 = int_to_ptr.vmem [resolvable:$true] %s5969_s5 }
 0x71b   : > { %5839 = vmatpush.bf16.msra.mxu0 %v8837_v43  ;;  %5825 = vmatpush.bf16.msra.mxu3 %v8830_v0 }
 0x71f   : > { %5826 = vmatpush.bf16.msra.mxu3 %v8829_v23 }
 0x772   : > { %v10291_v24 = vpop.permute.xlu2 %5333 }
 0x773   : > { %v5336_v57 = vsel %vm1894_vm7, 0, %v10291_v24  ;;  %v5337_v21 = vsel %vm1894_vm7, %v10291_v24, 0  ;;  %v8857_v24 = vld [vmem:[%s10484_s14 + $0x160] sm:$0xff] }
 0x774   : > { %v5338_v38 = vshrl.u32 %v5336_v57, 16  ;;  %v5341_v58 = vshll.u32 %v5336_v57, 16  ;;  %v5344_v39 = vshrl.u32 %v5337_v21, 16  ;;  %v5347_v40 = vshll.u32 %v5337_v21, 16  ;;  %5861 = vmatpush.bf16.msra.mxu2 %v8857_v24 }
 0x776   : > { %v5340_v3 = vrot.slane %v5338_v38, 7  ;;  %v5346_v41 = vrot.slane %v5344_v39, 7 }
 0x778   : > { %v5343_v6 = vor.u32 %v5341_v58, %v5340_v3  ;;  %v5349_v45 = vor.u32 %v5347_v40, %v5346_v41  ;;  %5862 = vmatpush.bf16.msra.mxu2 %v8856_v46 }
 0x77a   : > { %v5352_v11 = vsel %vm10045_vm10, 0, %v5343_v6  ;;  %v5353_v57 = vsel %vm10045_vm10, 0, %v5349_v45  ;;  %v8866_v6 = vld [vmem:[#allocation23 + $0x28] sm:$0xff] }
 0x77b   : > { %5801 = vmatmul.bf16.vlgmr.msrb.gmra.mxu1 %v5352_v11  ;;  %v5368_v37 = vshll.u32 %v5352_v11, 16  ;;  %v5366_v33 = vshrl.u32 %v5352_v11, 16  ;;  %v5375_v4 = vshll.u32 %v5353_v57, 16  ;;  %v5373_v38 = vshrl.u32 %v5353_v57, 16 }
 0x77c   : > { %5863 = vmatpush.bf16.msra.mxu2 %v8855_v47 }
 0x77d   : > { %v5370_v29 = vrot.slane %v5368_v37, 1  ;;  %v5377_v35 = vrot.slane %v5375_v4, 1  ;;  %v8861_v37 = vld [vmem:[#allocation23] sm:$0xff] }
 0x77f   : > { %v5371_v44 = vor.u32 %v5370_v29, %v5366_v33  ;;  %v5378_v51 = vor.u32 %v5377_v35, %v5373_v38 }
 0x780   : > { %5864 = vmatpush.bf16.msra.mxu2 %v8854_v1 }
 0x781   : > { %5840 = vmatmul.bf16.vlgmr.msra.gmra.mxu0 %v5371_v44 }
 0x784   : > { %v5326_v7 = vpop.permute.xlu1 %5325 }
 0x785   : > { %v5328_v22 = vsel %vm1894_vm7, 0, %v5326_v7  ;;  %v5329_v42 = vsel %vm1894_vm7, %v5326_v7, 0  ;;  %v8853_v7 = vld [vmem:[%s10484_s14 + $0x140] sm:$0xff] }
 0x786   : > { %v5355_v50 = vsel %vm1967_vm8, %v5328_v22, 0  ;;  %v5356_v32 = vsel %vm1967_vm8, %v5329_v42, 0  ;;  %5865 = vmatpush.bf16.msra.mxu2 %v8853_v7 }
 0x787   : > { %5359 = vrot.lane.b32.xlu0 %v5355_v50, %s9645_s30  ;;  %v5382_v56 = vshll.u32 %v5355_v50, 16  ;;  %5361 = vrot.lane.b32.xlu1 %v5356_v32, %s9645_s30  ;;  %v5388_v52 = vshll.u32 %v5356_v32, 16  ;;  %v5380_v54 = vshrl.u32 %v5355_v50, 16  ;;  %v5386_v53 = vshrl.u32 %v5356_v32, 16 }
 0x789   : > { %v5384_v26 = vrot.slane %v5382_v56, 1  ;;  %v5390_v10 = vrot.slane %v5388_v52, 1 }
 0x78b   : > { %v5385_v14 = vor.u32 %v5384_v26, %v5380_v54  ;;  %v5391_v27 = vor.u32 %v5390_v10, %v5386_v53  ;;  %v8868_v26 = vld [vmem:[#allocation23 + $0x38] sm:$0xff]  ;;  %v8867_v10 = vld [vmem:[#allocation23 + $0x30] sm:$0xff]  ;;  %v8865_v53 = vld [vmem:[#allocation23 + $0x20] sm:$0xff] }
 0x78c   : > { %5944 = vmatpush.bf16.msrb.mxu3 %v8868_v26 }
 0x78d   : > { %5392 = vrot.lane.b32.xlu2 %v5385_v14, %s9645_s30 }
 0x78f   : > { %5394 = vrot.lane.b32.xlu0 %v5391_v27, %s9645_s30  ;;  %v8864_v27 = vld [vmem:[#allocation23 + $0x18] sm:$0xff] }
 0x790   : > { %5945 = vmatpush.bf16.msrb.mxu3 %v8867_v10 }
 0x794   : > { %5946 = vmatpush.bf16.msrb.mxu3 %v8866_v6 }
 0x798   : > { %5947 = vmatpush.bf16.msrb.mxu3 %v8865_v53 }
 0x79c   : > { %5948 = vmatpush.bf16.msrb.mxu3 %v8864_v27 }
 0x7a0   : > { %5949 = vmatpush.bf16.msrb.mxu3 %v8863_v36 }
 0x7a4   : > { %5950 = vmatpush.bf16.msrb.mxu3 %v8862_v48 }
 0x7a8   : > { %5951 = vmatpush.bf16.msrb.mxu3 %v8861_v37 }
 0x7e7   : > { %v5393_v49 = vpop.permute.xlu2 %5392 }
 0x7e8   : > { %v5403_v22 = vsel %vm1998_vm11, %v5378_v51, %v5393_v49 }
 0x7e9   : > { %5853 = vmatmul.bf16.vlgmr.msra.gmra.mxu1 %v5403_v22 }
 0x7f8   : > { %v5802_v5 = vpop.f32.mrf.mxu1 }
 0x7f9   : > { %v5360_v42 = vpop.permute.xlu0 %5359  ;;  %v5362_v2 = vpop.permute.xlu1 %5361  ;;  %v5803_v9 = vadd.f32 %v9072_v63, %v5802_v5 }
 0x7fa   : > { %v5399_v3 = vsel %vm1998_vm11, %v5353_v57, %v5360_v42  ;;  %v5363_v58 = vsel %vm1998_vm11, %v5360_v42, %v5362_v2 }
 0x7fb   : > { %5814 = vmatmul.bf16.vlgmr.msrb.gmra.mxu2 %v5399_v3  ;;  %5827 = vmatmul.bf16.vlgmr.msra.gmra.mxu3 %v5363_v58 }
 0x7fe   : > { %v5841_v56 = vpop.f32.mrf.mxu0 }
 0x800   : > { %v5804_v55 = vpop.f32.mrf.mxu1 }
 0x801   : > { %v5395_v50 = vpop.permute.xlu0 %5394 }
 0x802   : > { %v5396_v32 = vsel %vm1998_vm11, %v5393_v49, %v5395_v50 }
 0x806   : > { %v5843_v52 = vpop.f32.mrf.mxu0 }
 0x80b   : > { %5866 = vmatmul.bf16.vlgmr.msra.gmra.mxu2 %v5396_v32 }
 0x866   : > { %v5854_v34 = vpop.f32.mrf.mxu1 }
 0x86e   : > { %v5856_v54 = vpop.f32.mrf.mxu1 }
 0x87e   : > { %v5815_v20 = vpop.f32.mrf.mxu2  ;;  %v5828_v8 = vpop.f32.mrf.mxu3 }
 0x87f   : > { %v5816_v14 = vadd.f32 %v5815_v20, %v5803_v9 }
 0x881   : > { %v5829_v11 = vadd.f32 %v5828_v8, %v5816_v14 }
 0x883   : > { %v5842_v13 = vadd.f32 %v5841_v56, %v5829_v11 }
 0x885   : > { %v5855_v15 = vadd.f32 %v5854_v34, %v5842_v13 }
 0x886   : > { %v5817_v12 = vpop.f32.mrf.mxu2  ;;  %v5830_v59 = vpop.f32.mrf.mxu3 }
 0x88e   : > { %v5867_v62 = vpop.f32.mrf.mxu2 }
 0x88f   : > { %v5868_v16 = vadd.f32 %v5867_v62, %v5855_v15 }
 0x891   : > { %v5871_v17 = vmax.f32 %v5868_v16, 0.0 }
 0x893   : > { %v5873_v25 = vrot.slane %v5871_v17, 1 }
 0x895   : > { %5874 = vrot.lane.b32.xlu1 %v5873_v25, %s9645_s30  ;;  %s5959_s30 = scalar_lea.sflag [#allocation4], %s807_s2 }
 0x896   : > { %v5869_v18 = vpop.f32.mrf.mxu2 }
 0x907   : > { %v5875_v61 = vpop.permute.xlu1 %5874 }
 0x908   : > { %v5877_v19 = vsel %vm1998_vm11, %v5871_v17, %v5875_v61 }
 0x909   : > { %v5878_v21 = vpack.c.bf16 %v5877_v19, %v5877_v19 }
 0x90b   : > { %5952 = vmatmul.bf16.vlgmr.msrb.gmra.mxu3 %v5878_v21 }
 0x98e   : > { %v5953_v28 = vpop.f32.mrf.mxu3 }
 0x98f   : > { %v5954_v31 = vadd.f32 %v5953_v28, %v5895_v60 }
 0x991   : > { %5957 = vst [vmem:[%s808_s25] sm:$0x1] %v5954_v31 }
 0x992   : > { %9551 = shalt.err (!%p9548_p8)
}
 0x993   : > { %8930 = dma.vmem_to_hbm [thread:$0]  (%p9779_p5), %s5970_s5, 16, %s5972_s9, %s5959_s30  }
 0x996   : > { %v5955_v39 = vpop.f32.mrf.mxu3 }
 0x997 PF: > { %s10527_s7 = sld [smem:[#allocation38_spill]] }
 0x998   : > { %s10528_s22 = sld [smem:[#allocation36_spill]] }
 0x99d   : > { %p9012_p9 = scmp.ge.s32.totalorder %s10527_s7, 2 }
 0x99e   : > { %s5983_s2 = sand.u32 1, %s10528_s22  }
 0x99f   : > { %p8979_p10 = pnand %p9012_p9, %p9783_p6  ;;  %s5984_s27 = scalar_lea.sflag [#allocation4], %s5983_s2 }
 0x9a1   : > { %p8980_p11 = pneg %p8979_p10 }
 0x9a3   : > { %9601 = dma.done.wait (%p8980_p11), %s5984_s27, 16  }
 0x9a4   : > { %9603 = vsyncadd (%p8980_p11), %s5984_s27, 4294967280  ;;  %s10530_s30 = sld [smem:[#allocation39_spill]]  ;;  %s10533_s27 = smov %s9610_s28 }
 0x9a5   : > { %s10531_s26 = sld [smem:[#allocation37_spill]] }
 0x9a6   : > { %s10532_s29 = sld [smem:[#allocation40_spill]] }
 0x9aa   : > { %p36_p12 = scmp.ge.s32.totalorder %s10530_s30, 4  }
 0x9ab   : > { %s10534_s28 = smov %s10531_s26 }
 0x9ac   :  { %38 = sbr.rel (!%p36_p12) target bundleno = 20 (0x14), region = 191 }
 0x9b1   :  { %5989 = vsyncpa [#allocation3], 1 }
 0x9b2   :  { %5991 = vsyncpa [#allocation3 + $0x1], 1 }
 0x9b3   :  { %5992 = vsyncpa [#allocation6], 1 }
 0x9b4   :  { %5993 = vsyncpa [#allocation9], 1 }
 0x9b5   :  { %5994 = vsyncpa [#allocation12], 1 }
 0x9b6   :  { %5995 = vsyncpa [#allocation15], 1 }
 0x9b7   :  { %5996 = vsyncpa [#allocation18], 1 }
 0x9b8   :  { %5997 = vsyncpa [#allocation21], 1 }
 0x9b9   :  { %5998 = vsyncpa [#allocation24], 1 }
 0x9ba   :  { %5999 = vsyncpa [#allocation4], 1 }
 0x9bb   :  { %6001 = vsyncpa [#allocation4 + $0x1], 1 }

</bundles_post_ra>
